<compile_context>
chip_gen: v7x
topology: tpu7x:2x2x1
jax: 0.10.0
libtpu: 0.0.40
codegen_flags: <defaults>
</compile_context>

<pallas_src>
import math
from functools import partial

import numpy as np
import jax
import jax.numpy as jnp
from jax.experimental import pallas as pl
from jax.experimental.pallas import tpu as pltpu

# ----------------------- small, module-consistent hyper-parameters -----------------------
B_SZ = 2          # batch
IN_CHANS = 3
IMG = 16          # img_size
PATCH = 4         # patch_size
PE_SIZE = 3       # patch_embed_size (roi_align output size / instance conv kernel)
NUM_BOX = 2
D = 32            # embed_dim
DEPTH = 2
HEADS = 4
MLP_RATIO = 4.0
NUM_CLASSES = 4
INIT_STD = 0.02
LN_EPS = 1e-6     # norm_layer assumed partial(nn.LayerNorm, eps=1e-6) (BEiT convention)

HP = IMG // PATCH
N_PATCH = HP * HP
SEQ = 1 + N_PATCH + NUM_BOX
MLP_H = int(D * MLP_RATIO)          # 128 -> lane-dense MLP hidden
HEAD_DIM = D // HEADS
HEAD_PAD = 128                      # lane-padded classification-head width
NEG_INF = -1e9                      # additive key mask (masked keys -> ~zero softmax weight)


# =============================== in-kernel math helpers ===============================

def _gelu(x):
    # TODO(synk): tanh-approximate GELU (EUP tanh) per perf review; exact-erf nn.GELU()
    # differs by <~1e-3 absolute, same order as default TPU matmul precision.
    return 0.5 * x * (1.0 + jnp.tanh(0.7978845608028654 * (x + 0.044715 * x * x * x)))


def _layernorm(z, w, b):
    mu = jnp.mean(z, axis=-1, keepdims=True)
    var = jnp.mean((z - mu) ** 2, axis=-1, keepdims=True)
    return (z - mu) * jax.lax.rsqrt(var + LN_EPS) * w + b


# =============================== the fused Pallas kernel ===============================

def _fused_kernel(x_ref, mask_ref,
                  ln1w_ref, ln1b_ref, wqkv_ref, bqkv_ref, wo_ref, bo_ref,
                  ln2w_ref, ln2b_ref, fc1w_ref, fc1b_ref, fc2w_ref, fc2b_ref,
                  normw_ref, normb_ref, headw_ref, headb_ref,
                  o_ref, *, depth, num_heads, head_dim, num_box, seq, n_batch):
    """DEPTH transformer blocks + final LayerNorm + (128-padded) head for one grid step.

    x_ref block: (1, n_batch*seq, D) -- n_batch batch elements folded on the sublane axis.
    Attention-mask semantics (Block class not provided): boolean key mask applied
    additively (-1e9) to logits before softmax; init_values=None -> no layer scale;
    dropout/drop_path = 0.  QKV weights are (D, 3D) lane-dense; proj weights (D, D);
    the classification head is zero-padded to 128 output lanes for an unmasked store.
    """
    dm = num_heads * head_dim
    x = x_ref[0]                      # (n_batch*seq, D) residual stream
    mask2d = mask_ref[0]              # (n_batch, seq)  additive key mask
    scale = head_dim ** -0.5

    for l in range(depth):            # DEPTH=2: static unroll, weights stay in VMEM
        # ---------------- attention ----------------
        h1 = _layernorm(x, ln1w_ref[l], ln1b_ref[l])                        # (rows, D)
        qkv = jnp.dot(h1, wqkv_ref[l],
                      preferred_element_type=jnp.float32) + bqkv_ref[l]     # (rows, 3D)
        ctx_rows = []
        for b in range(n_batch):
            r0 = b * seq
            madd = mask2d[b:b + 1, :]                                       # (1, seq)
            heads = []
            for h in range(num_heads):
                c0 = h * head_dim
                q = qkv[r0:r0 + seq, c0:c0 + head_dim] * scale              # (seq, hd)
                k = qkv[r0:r0 + seq, dm + c0:dm + c0 + head_dim]
                v = qkv[r0:r0 + seq, 2 * dm + c0:2 * dm + c0 + head_dim]
                s = jax.lax.dot_general(q, k, (((1,), (1,)), ((), ())),
                                        preferred_element_type=jnp.float32) + madd
                s = s - jnp.max(s, axis=-1, keepdims=True)
                p = jnp.exp(s)
                p = p * pl.reciprocal(jnp.sum(p, axis=-1, keepdims=True), approx=True)
                heads.append(jnp.dot(p, v, preferred_element_type=jnp.float32))  # (seq, hd)
            ctx_rows.append(jnp.concatenate(heads, axis=1))                 # (seq, D)
        ctx = ctx_rows[0] if n_batch == 1 else jnp.concatenate(ctx_rows, axis=0)
        x = x + jnp.dot(ctx, wo_ref[l],
                        preferred_element_type=jnp.float32) + bo_ref[l]     # one K=32 proj

        # ---------------- MLP ----------------
        h2 = _layernorm(x, ln2w_ref[l], ln2b_ref[l])
        h2 = jnp.dot(h2, fc1w_ref[l], preferred_element_type=jnp.float32) + fc1b_ref[l]
        h2 = _gelu(h2)
        h2 = jnp.dot(h2, fc2w_ref[l], preferred_element_type=jnp.float32) + fc2b_ref[l]
        x = x + h2

    # final LayerNorm is row-wise, so applying it only to the box-token rows is identical
    # to norm(full sequence)[-num_box:]; then the (zero-padded) linear head on those rows.
    if n_batch == 1:
        xb = x[seq - num_box:seq, :]
    else:
        xb = jnp.concatenate(
            [x[b * seq + seq - num_box:b * seq + seq, :] for b in range(n_batch)], axis=0)
    xb = _layernorm(xb, normw_ref[...], normb_ref[...])                     # (n_batch*nb, D)
    o_ref[0] = (jnp.dot(xb, headw_ref[...], preferred_element_type=jnp.float32)
                + headb_ref[...])                                           # (n_batch*nb, 128)


def _split_batch_across_cores():
    """True on v7x (2 TensorCores/chip -> one batch element per core); fold otherwise."""
    try:
        kind = jax.devices()[0].device_kind.lower()
    except Exception:
        kind = ""
    return "v7" in kind


def fused_transformer_head(x_seq, add_mask, params):
    """(B, S, D) activations + (B, S) additive mask -> (B, NUM_BOX, NUM_CLASSES) logits."""
    Bn, S, Dm = x_seq.shape
    bb = 1 if _split_batch_across_cores() else Bn   # per-grid-step batch block
    G = Bn // bb
    rows = bb * S

    x3 = x_seq.reshape(G, rows, Dm)                 # batch folded onto the sublane axis
    m3 = add_mask.reshape(G, bb, S)

    blk = params["blk"]
    weights = (blk["ln1_w"], blk["ln1_b"], blk["wqkv"], blk["bqkv"], blk["wo"], blk["bo"],
               blk["ln2_w"], blk["ln2_b"], blk["fc1_w"], blk["fc1_b"],
               blk["fc2_w"], blk["fc2_b"],
               params["norm_w"], params["norm_b"], params["head_w"], params["head_b"])

    kern = partial(_fused_kernel, depth=DEPTH, num_heads=HEADS, head_dim=HEAD_DIM,
                   num_box=NUM_BOX, seq=S, n_batch=bb)

    def rep(a):   # full-array block, same block every grid step (stays VMEM-resident)
        nd = a.ndim
        return pl.BlockSpec(a.shape, lambda i, _n=nd: (0,) * _n)

    out = pl.pallas_call(
        kern,
        out_shape=jax.ShapeDtypeStruct((G, bb * NUM_BOX, HEAD_PAD), jnp.float32),
        grid=(G,),
        in_specs=[pl.BlockSpec((1, rows, Dm), lambda i: (i, 0, 0)),    # activations
                  pl.BlockSpec((1, bb, S), lambda i: (i, 0, 0))]       # additive key mask
                 + [rep(w) for w in weights],
        out_specs=pl.BlockSpec((1, bb * NUM_BOX, HEAD_PAD), lambda i: (i, 0, 0)),
        compiler_params=pltpu.CompilerParams(
            dimension_semantics=("parallel",) if G > 1 else ("arbitrary",)),
    )(x3, m3, *weights)

    return out.reshape(Bn, NUM_BOX, HEAD_PAD)[:, :, :NUM_CLASSES]


# =============================== plain-JAX glue ===============================

def sinusoidal_pe(dim, max_len):
    # TODO(synk): PositionalEncoding class body not provided; assumed standard sinusoidal PE.
    pos = np.arange(max_len, dtype=np.float32)[:, None]
    div = np.exp(np.arange(0, dim, 2, dtype=np.float32) * (-math.log(10000.0) / dim))
    pe = np.zeros((max_len, dim), np.float32)
    pe[:, 0::2] = np.sin(pos * div)
    pe[:, 1::2] = np.cos(pos * div)
    return jnp.asarray(pe)[None]        # (1, max_len, dim)


def build_pos_embed(pex, pey, pew, peh):
    d4 = D // 4
    pe = jnp.concatenate([
        jnp.repeat(pex[:, :, None, :], IMG, axis=2),
        jnp.repeat(pey[:, None, :, :], IMG, axis=1),
        jnp.broadcast_to(pew[:, PATCH - 1][:, None, None, :], (1, IMG, IMG, d4)),
        jnp.broadcast_to(peh[:, PATCH - 1][:, None, None, :], (1, IMG, IMG, d4)),
    ], axis=3)                                              # (1, IMG, IMG, D)
    pe = jnp.transpose(pe, (0, 3, 1, 2))                    # NCHW
    # F.interpolate(..., mode='bilinear', align_corners=False) equivalent
    pe = jax.image.resize(pe, (1, D, HP, HP), method="bilinear", antialias=False)
    return jnp.transpose(pe.reshape(1, D, HP * HP), (0, 2, 1))   # (1, N, D)


def roi_align_jax(feat, rois, spatial_scale, out_size):
    """torchvision.ops.roi_align (aligned=False, sampling_ratio=-1) in plain JAX.

    feat: (Nb, C, H, W), rois: (K, 5) = [batch_idx, x1, y1, x2, y2].
    Adaptive per-ROI sampling grids are emulated with a static upper bound + masking
    (valid as long as boxes lie inside the image, which holds here).
    """
    Nb, C, H, W = feat.shape
    PH, PW = out_size
    GH = max(1, int(math.ceil(H / PH)))
    GW = max(1, int(math.ceil(W / PW)))

    bidx = rois[:, 0].astype(jnp.int32)
    x1 = rois[:, 1] * spatial_scale
    y1 = rois[:, 2] * spatial_scale
    x2 = rois[:, 3] * spatial_scale
    y2 = rois[:, 4] * spatial_scale
    roi_w = jnp.maximum(x2 - x1, 1.0)
    roi_h = jnp.maximum(y2 - y1, 1.0)
    bin_w = roi_w / PW
    bin_h = roi_h / PH
    grid_h = jnp.clip(jnp.ceil(roi_h / PH).astype(jnp.int32), 1, GH)
    grid_w = jnp.clip(jnp.ceil(roi_w / PW).astype(jnp.int32), 1, GW)

    ph = jnp.arange(PH, dtype=jnp.float32)
    pw = jnp.arange(PW, dtype=jnp.float32)
    iy = jnp.arange(GH, dtype=jnp.float32)
    ix = jnp.arange(GW, dtype=jnp.float32)

    def per_roi(b, x1_, y1_, bw, bh, gh, gw):
        fmap = feat[b]                                   # (C, H, W)
        ghf = gh.astype(jnp.float32)
        gwf = gw.astype(jnp.float32)
        ys = y1_ + ph[:, None] * bh + (iy[None, :] + 0.5) * bh / ghf   # (PH, GH)
        xs = x1_ + pw[:, None] * bw + (ix[None, :] + 0.5) * bw / gwf   # (PW, GW)
        y = ys[:, :, None, None]                          # (PH, GH, 1, 1)
        x = xs[None, None, :, :]                          # (1, 1, PW, GW)
        valid = (y >= -1.0) & (y <= H) & (x >= -1.0) & (x <= W)
        yc = jnp.clip(y, 0.0, H - 1.0)
        xc = jnp.clip(x, 0.0, W - 1.0)
        y0 = jnp.floor(yc).astype(jnp.int32)
        x0 = jnp.floor(xc).astype(jnp.int32)
        y1i = jnp.minimum(y0 + 1, H - 1)
        x1i = jnp.minimum(x0 + 1, W - 1)
        ly = yc - y0.astype(jnp.float32)
        lx = xc - x0.astype(jnp.float32)
        hy = 1.0 - ly
        hx = 1.0 - lx

        def g(yy, xx):                                    # (C, PH, GH, PW, GW)
            return fmap[:, yy, xx]

        val = (hy * hx) * g(y0, x0) + (hy * lx) * g(y0, x1i) \
            + (ly * hx) * g(y1i, x0) + (ly * lx) * g(y1i, x1i)
        val = val * valid.astype(val.dtype)
        smask = ((iy[None, :] < ghf)[:, :, None, None]
                 & (ix[None, :] < gwf)[None, None, :, :]).astype(val.dtype)
        val = val * smask
        count = jnp.maximum(ghf * gwf, 1.0)
        return val.sum(axis=(2, 4)) / count               # (C, PH, PW)

    return jax.vmap(per_roi)(bidx, x1, y1, bin_w, bin_h, grid_h, grid_w)


def wrap_idx(idx, size):
    # emulate PyTorch negative-index wrapping (the -1 "empty box" indexes row -1)
    return jnp.where(idx < 0, idx + size, idx)


# =============================== parameter init ===============================

def trunc_normal(key, shape, std=INIT_STD):
    # matches trunc_normal_(t, std=s): N(0, s^2) truncated to [-s, s]
    return (std * jax.random.truncated_normal(key, -1.0, 1.0, shape)).astype(jnp.float32)


def init_params(key):
    keys = iter(jax.random.split(key, 4 + 4 * DEPTH + 1))
    p = {}
    # PatchEmbed conv: (D, C, p, p)  -> row-major (C, kh, kw) unfold matmul weight
    p["patch_w"] = trunc_normal(next(keys), (D, IN_CHANS, PATCH, PATCH)).reshape(D, -1).T
    p["patch_b"] = jnp.zeros((D,), jnp.float32)
    # instance-embed conv: (D, D, 3, 3)
    p["inst_w"] = trunc_normal(next(keys), (D, D, PE_SIZE, PE_SIZE)).reshape(D, -1).T
    p["inst_b"] = jnp.zeros((D,), jnp.float32)
    p["cls_token"] = trunc_normal(next(keys), (1, 1, D))
    p["cls_pos_embed"] = trunc_normal(next(keys), (1, 1, D))

    pex = sinusoidal_pe(D // 4, IMG)
    pey = sinusoidal_pe(D // 4, IMG)
    pew = sinusoidal_pe(D // 4, IMG)
    peh = sinusoidal_pe(D // 4, IMG)
    p["pex"], p["pey"] = pex, pey
    p["pos_embed"] = build_pos_embed(pex, pey, pew, peh)    # (1, N, D)

    # ----- stacked, lane-dense transformer block weights (consumed by the fused kernel) -----
    acc = {k: [] for k in ("ln1_w", "ln1_b", "wqkv", "bqkv", "wo", "bo",
                           "ln2_w", "ln2_b", "fc1_w", "fc1_b", "fc2_w", "fc2_b")}
    for layer in range(DEPTH):
        rescale = 1.0 / math.sqrt(2.0 * (layer + 1))        # fix_init_weight
        W_qkv = trunc_normal(next(keys), (3 * D, D))        # torch (out, in), rows = [q|k|v]
        W_proj = trunc_normal(next(keys), (D, D)) * rescale
        W_fc1 = trunc_normal(next(keys), (MLP_H, D))
        W_fc2 = trunc_normal(next(keys), (D, MLP_H)) * rescale

        acc["wqkv"].append(jnp.transpose(W_qkv))            # (D, 3D) lane-dense
        acc["bqkv"].append(jnp.zeros((1, 3 * D), jnp.float32))
        acc["wo"].append(jnp.transpose(W_proj))              # (D, D), in-features head-major
        acc["bo"].append(jnp.zeros((1, D), jnp.float32))
        acc["ln1_w"].append(jnp.ones((1, D), jnp.float32))
        acc["ln1_b"].append(jnp.zeros((1, D), jnp.float32))
        acc["ln2_w"].append(jnp.ones((1, D), jnp.float32))
        acc["ln2_b"].append(jnp.zeros((1, D), jnp.float32))
        acc["fc1_w"].append(jnp.transpose(W_fc1))            # (D, MLP_H=128)
        acc["fc1_b"].append(jnp.zeros((1, MLP_H), jnp.float32))
        acc["fc2_w"].append(jnp.transpose(W_fc2))             # (MLP_H, D)
        acc["fc2_b"].append(jnp.zeros((1, D), jnp.float32))
    p["blk"] = {k: jnp.stack(v, axis=0) for k, v in acc.items()}

    p["norm_w"] = jnp.ones((1, D), jnp.float32)
    p["norm_b"] = jnp.zeros((1, D), jnp.float32)
    # classification head, zero-padded to 128 output lanes (unmasked kernel store)
    hw = trunc_normal(next(keys), (NUM_CLASSES, D)).T                       # (D, C)
    p["head_w"] = jnp.concatenate(
        [hw, jnp.zeros((D, HEAD_PAD - NUM_CLASSES), jnp.float32)], axis=1)  # (D, 128)
    p["head_b"] = jnp.zeros((1, HEAD_PAD), jnp.float32)
    return p


# =============================== forward pass ===============================

def patch_embed(x, w, b):
    # conv-as-unfold-matmul; plain jnp under jit (XLA fuses with reshapes / pos-embed add)
    Bn, C, H, W = x.shape
    hp, wp = H // PATCH, W // PATCH
    patches = x.reshape(Bn, C, hp, PATCH, wp, PATCH)
    patches = jnp.transpose(patches, (0, 2, 4, 1, 3, 5)).reshape(Bn, hp * wp,
                                                                 C * PATCH * PATCH)
    return patches @ w + b                                  # (B, N, D)


def extract_box_feature(x_tokens, boxes, scale):
    Bn = x_tokens.shape[0]
    nb = boxes.shape[1]
    feat = jnp.transpose(x_tokens.reshape(Bn, HP, HP, D), (0, 3, 1, 2))   # (B, D, hp, wp)
    batch_index = jnp.repeat(jnp.arange(Bn, dtype=jnp.float32), nb)
    rois = jnp.concatenate([batch_index[:, None], boxes.reshape(-1, 4)], axis=1)
    aligned = roi_align_jax(feat, rois, scale, (PE_SIZE, PE_SIZE))        # (B*nb, D, 3, 3)
    keep = (boxes[..., 0] != -1.0).reshape(-1).astype(aligned.dtype)[:, None, None, None]
    return aligned * keep


def add_box_feature(x_seq, boxes_feat, boxes, params):
    Bn = x_seq.shape[0]
    nb = boxes.shape[1]
    flat = boxes_feat.reshape(Bn * nb, D * PE_SIZE * PE_SIZE)
    # tiny (4 x 288)@(288 x 32) matmul: plain jnp under jit (no dedicated launch)
    bf = (flat @ params["inst_w"] + params["inst_b"]).reshape(Bn, nb, D)

    x_coord = jnp.mean(boxes[..., 0::2], axis=2).astype(jnp.int32)
    y_coord = jnp.mean(boxes[..., 1::2], axis=2).astype(jnp.int32)
    w_ = (boxes[..., 2] - boxes[..., 0]).astype(jnp.int32)
    h_ = (boxes[..., 3] - boxes[..., 1]).astype(jnp.int32)

    bpe = jnp.concatenate([
        jnp.repeat(params["pex"][:, :, None, :], IMG, axis=2),
        jnp.repeat(params["pey"][:, None, :, :], IMG, axis=1)], axis=3)[0]   # (IMG, IMG, D/2)
    emb1 = bpe[wrap_idx(y_coord, IMG), wrap_idx(x_coord, IMG)]
    emb2 = bpe[wrap_idx(h_, IMG), wrap_idx(w_, IMG)]
    bf = bf + jnp.concatenate([emb1, emb2], axis=2)
    return jnp.concatenate([x_seq, bf], axis=1)


@jax.jit
def forward_logits(params, x, boxes, attention_mask):
    """Everything up to the (static-shape) per-box logits, fully jitted."""
    Bn = x.shape[0]
    tokens = patch_embed(x, params["patch_w"], params["patch_b"])            # (B, N, D)
    n = tokens.shape[1]
    cls = jnp.broadcast_to(params["cls_token"], (Bn, 1, D))
    x_seq = jnp.concatenate([cls, tokens], axis=1)                           # (B, N+1, D)
    full_mask = jnp.concatenate([jnp.ones((Bn, n + 1), dtype=bool), attention_mask], axis=1)
    pos = jnp.concatenate([params["cls_pos_embed"], params["pos_embed"]], axis=1)
    x_seq = x_seq + pos                                                      # pos_drop = identity

    boxes_feat = extract_box_feature(x_seq[:, 1:], boxes, 1.0 / PATCH)
    agg = add_box_feature(x_seq, boxes_feat, boxes, params)                  # (B, S, D)

    add_mask = jnp.where(full_mask, 0.0, NEG_INF).astype(jnp.float32)        # (B, S)
    # fused: DEPTH blocks + final LayerNorm + head, all VMEM-resident
    return fused_transformer_head(agg, add_mask, params)                     # (B, nb, C)


def vision_instaformer_forward(params, x, boxes, attention_mask):
    logits = forward_logits(params, x, boxes, attention_mask)
    # head(aggregated_box[attention_mask]) -- shape-dynamic boolean selection stays outside jit
    return logits[attention_mask]


# =============================== main ===============================

if __name__ == "__main__":
    root = jax.random.PRNGKey(0)
    k_param, k_x = jax.random.split(root)

    params = init_params(k_param)

    x = jax.random.normal(k_x, (B_SZ, IN_CHANS, IMG, IMG), dtype=jnp.float32)
    boxes = jnp.array([[[1.0, 1.0, 9.0, 9.0],
                        [4.0, 6.0, 14.0, 15.0]],
                       [[0.0, 2.0, 8.0, 12.0],
                        [-1.0, -1.0, -1.0, -1.0]]], dtype=jnp.float32)       # (B, NUM_BOX, 4)
    attention_mask = jnp.array([[True, True],
                                [True, False]])                              # (B, NUM_BOX)

    out = vision_instaformer_forward(params, x, boxes, attention_mask)
    out = jax.block_until_ready(out)
    assert out.shape == (int(np.asarray(attention_mask).sum()), NUM_CLASSES)
    assert bool(jnp.all(jnp.isfinite(out)))
    print("KERNEL_OK")
</pallas_src>

<mosaic_0001>
module attributes {stable_mosaic.version = 11 : i64} {
  func.func @_fused_kernel(%arg0: i32, %arg1: memref<1x38x32xf32, #tpu.memory_space<vmem>>, %arg2: memref<1x2x19xf32, #tpu.memory_space<vmem>>, %arg3: memref<2x1x32xf32, #tpu.memory_space<vmem>>, %arg4: memref<2x1x32xf32, #tpu.memory_space<vmem>>, %arg5: memref<2x32x96xf32, #tpu.memory_space<vmem>>, %arg6: memref<2x1x96xf32, #tpu.memory_space<vmem>>, %arg7: memref<2x32x32xf32, #tpu.memory_space<vmem>>, %arg8: memref<2x1x32xf32, #tpu.memory_space<vmem>>, %arg9: memref<2x1x32xf32, #tpu.memory_space<vmem>>, %arg10: memref<2x1x32xf32, #tpu.memory_space<vmem>>, %arg11: memref<2x32x128xf32, #tpu.memory_space<vmem>>, %arg12: memref<2x1x128xf32, #tpu.memory_space<vmem>>, %arg13: memref<2x128x32xf32, #tpu.memory_space<vmem>>, %arg14: memref<2x1x32xf32, #tpu.memory_space<vmem>>, %arg15: memref<1x32xf32, #tpu.memory_space<vmem>>, %arg16: memref<1x32xf32, #tpu.memory_space<vmem>>, %arg17: memref<32x128xf32, #tpu.memory_space<vmem>>, %arg18: memref<1x128xf32, #tpu.memory_space<vmem>>, %arg19: memref<1x4x128xf32, #tpu.memory_space<vmem>>) attributes {dimension_semantics = [#tpu.dimension_semantics<arbitrary>], iteration_bounds = array<i64: 1>, scalar_prefetch = 0 : i64, scratch_operands = 0 : i64, tpu.core_type = #tpu.core_type<tc>, window_params = [{transform_indices = @transform_0, window_bounds = array<i64: 1, 38, 32>}, {transform_indices = @transform_1, window_bounds = array<i64: 1, 2, 19>}, {pipeline_mode = #tpu.pipeline_mode<synchronous>, transform_indices = @transform_2, window_bounds = array<i64: 2, 1, 32>}, {pipeline_mode = #tpu.pipeline_mode<synchronous>, transform_indices = @transform_3, window_bounds = array<i64: 2, 1, 32>}, {pipeline_mode = #tpu.pipeline_mode<synchronous>, transform_indices = @transform_4, window_bounds = array<i64: 2, 32, 96>}, {pipeline_mode = #tpu.pipeline_mode<synchronous>, transform_indices = @transform_5, window_bounds = array<i64: 2, 1, 96>}, {pipeline_mode = #tpu.pipeline_mode<synchronous>, transform_indices = @transform_6, window_bounds = array<i64: 2, 32, 32>}, {pipeline_mode = #tpu.pipeline_mode<synchronous>, transform_indices = @transform_7, window_bounds = array<i64: 2, 1, 32>}, {pipeline_mode = #tpu.pipeline_mode<synchronous>, transform_indices = @transform_8, window_bounds = array<i64: 2, 1, 32>}, {pipeline_mode = #tpu.pipeline_mode<synchronous>, transform_indices = @transform_9, window_bounds = array<i64: 2, 1, 32>}, {pipeline_mode = #tpu.pipeline_mode<synchronous>, transform_indices = @transform_10, window_bounds = array<i64: 2, 32, 128>}, {pipeline_mode = #tpu.pipeline_mode<synchronous>, transform_indices = @transform_11, window_bounds = array<i64: 2, 1, 128>}, {pipeline_mode = #tpu.pipeline_mode<synchronous>, transform_indices = @transform_12, window_bounds = array<i64: 2, 128, 32>}, {pipeline_mode = #tpu.pipeline_mode<synchronous>, transform_indices = @transform_13, window_bounds = array<i64: 2, 1, 32>}, {pipeline_mode = #tpu.pipeline_mode<synchronous>, transform_indices = @transform_14, window_bounds = array<i64: 1, 32>}, {pipeline_mode = #tpu.pipeline_mode<synchronous>, transform_indices = @transform_15, window_bounds = array<i64: 1, 32>}, {pipeline_mode = #tpu.pipeline_mode<synchronous>, transform_indices = @transform_16, window_bounds = array<i64: 32, 128>}, {pipeline_mode = #tpu.pipeline_mode<synchronous>, transform_indices = @transform_17, window_bounds = array<i64: 1, 128>}, {transform_indices = @transform_18, window_bounds = array<i64: 1, 4, 128>}]} {
    %c0 = arith.constant 0 : index
    %c0_0 = arith.constant 0 : index
    %c0_1 = arith.constant 0 : index
    %0 = vector.load %arg1[%c0, %c0_0, %c0_1] : memref<1x38x32xf32, #tpu.memory_space<vmem>>, vector<1x38x32xf32>
    %1 = vector.shape_cast %0 : vector<1x38x32xf32> to vector<38x32xf32>
    %c0_2 = arith.constant 0 : index
    %c0_3 = arith.constant 0 : index
    %c0_4 = arith.constant 0 : index
    %2 = vector.load %arg2[%c0_2, %c0_3, %c0_4] : memref<1x2x19xf32, #tpu.memory_space<vmem>>, vector<1x2x19xf32>
    %3 = vector.shape_cast %2 : vector<1x2x19xf32> to vector<2x19xf32>
    %c0_5 = arith.constant 0 : index
    %c0_6 = arith.constant 0 : index
    %c0_7 = arith.constant 0 : index
    %4 = vector.load %arg3[%c0_5, %c0_6, %c0_7] : memref<2x1x32xf32, #tpu.memory_space<vmem>>, vector<1x1x32xf32>
    %5 = vector.shape_cast %4 : vector<1x1x32xf32> to vector<1x32xf32>
    %c0_8 = arith.constant 0 : index
    %c0_9 = arith.constant 0 : index
    %c0_10 = arith.constant 0 : index
    %6 = vector.load %arg4[%c0_8, %c0_9, %c0_10] : memref<2x1x32xf32, #tpu.memory_space<vmem>>, vector<1x1x32xf32>
    %7 = vector.shape_cast %6 : vector<1x1x32xf32> to vector<1x32xf32>
    %cst = arith.constant dense<0.000000e+00> : vector<38xf32>
    %8 = vector.multi_reduction <add>, %1, %cst [1] : vector<38x32xf32> to vector<38xf32>
    %9 = vector.shape_cast %8 : vector<38xf32> to vector<38x1xf32>
    %cst_11 = arith.constant 3.200000e+01 : f32
    %10 = vector.broadcast %cst_11 : f32 to vector<38x1xf32>
    %11 = arith.divf %9, %10 : vector<38x1xf32>
    %12 = vector.broadcast %11 : vector<38x1xf32> to vector<38x32xf32>
    %13 = arith.subf %1, %12 : vector<38x32xf32>
    %14 = arith.mulf %13, %13 : vector<38x32xf32>
    %cst_12 = arith.constant dense<0.000000e+00> : vector<38xf32>
    %15 = vector.multi_reduction <add>, %14, %cst_12 [1] : vector<38x32xf32> to vector<38xf32>
    %16 = vector.shape_cast %15 : vector<38xf32> to vector<38x1xf32>
    %cst_13 = arith.constant 3.200000e+01 : f32
    %17 = vector.broadcast %cst_13 : f32 to vector<38x1xf32>
    %18 = arith.divf %16, %17 : vector<38x1xf32>
    %19 = vector.broadcast %11 : vector<38x1xf32> to vector<38x32xf32>
    %20 = arith.subf %1, %19 : vector<38x32xf32>
    %cst_14 = arith.constant 9.99999997E-7 : f32
    %21 = vector.broadcast %cst_14 : f32 to vector<38x1xf32>
    %22 = arith.addf %18, %21 : vector<38x1xf32>
    %23 = math.rsqrt %22 : vector<38x1xf32>
    %24 = vector.broadcast %23 : vector<38x1xf32> to vector<38x32xf32>
    %25 = arith.mulf %20, %24 : vector<38x32xf32>
    %26 = vector.broadcast %5 : vector<1x32xf32> to vector<38x32xf32>
    %27 = arith.mulf %25, %26 : vector<38x32xf32>
    %28 = vector.broadcast %7 : vector<1x32xf32> to vector<38x32xf32>
    %29 = arith.addf %27, %28 : vector<38x32xf32>
    %c0_15 = arith.constant 0 : index
    %c0_16 = arith.constant 0 : index
    %c0_17 = arith.constant 0 : index
    %30 = vector.load %arg5[%c0_15, %c0_16, %c0_17] : memref<2x32x96xf32, #tpu.memory_space<vmem>>, vector<1x32x96xf32>
    %31 = vector.shape_cast %30 : vector<1x32x96xf32> to vector<32x96xf32>
    %cst_18 = arith.constant dense<0.000000e+00> : vector<38x96xf32>
    %32 = tpu.matmul %29, %31, %cst_18 {dimension_numbers = #tpu.dot_dimension_numbers<[1], [0], [0], [1], [0, 0, 1, 1], [], []>} : vector<38x32xf32>, vector<32x96xf32>, vector<38x96xf32> -> vector<38x96xf32>
    %c0_19 = arith.constant 0 : index
    %c0_20 = arith.constant 0 : index
    %c0_21 = arith.constant 0 : index
    %33 = vector.load %arg6[%c0_19, %c0_20, %c0_21] : memref<2x1x96xf32, #tpu.memory_space<vmem>>, vector<1x1x96xf32>
    %34 = vector.shape_cast %33 : vector<1x1x96xf32> to vector<1x96xf32>
    %35 = vector.broadcast %34 : vector<1x96xf32> to vector<38x96xf32>
    %36 = arith.addf %32, %35 : vector<38x96xf32>
    %37 = vector.extract_strided_slice %3 {offsets = [0, 0], sizes = [1, 19], strides = [1, 1]} : vector<2x19xf32> to vector<1x19xf32>
    %38 = vector.extract_strided_slice %36 {offsets = [0, 0], sizes = [19, 8], strides = [1, 1]} : vector<38x96xf32> to vector<19x8xf32>
    %cst_22 = arith.constant 0.353553385 : f32
    %39 = vector.broadcast %cst_22 : f32 to vector<19x8xf32>
    %40 = arith.mulf %38, %39 : vector<19x8xf32>
    %41 = vector.extract_strided_slice %36 {offsets = [0, 32], sizes = [19, 8], strides = [1, 1]} : vector<38x96xf32> to vector<19x8xf32>
    %42 = vector.extract_strided_slice %36 {offsets = [0, 64], sizes = [19, 8], strides = [1, 1]} : vector<38x96xf32> to vector<19x8xf32>
    %cst_23 = arith.constant dense<0.000000e+00> : vector<19x19xf32>
    %43 = tpu.matmul %40, %41, %cst_23 {dimension_numbers = #tpu.dot_dimension_numbers<[1], [1], [0], [0], [0, 0, 1, 0], [], []>} : vector<19x8xf32>, vector<19x8xf32>, vector<19x19xf32> -> vector<19x19xf32>
    %44 = vector.broadcast %37 : vector<1x19xf32> to vector<19x19xf32>
    %45 = arith.addf %43, %44 : vector<19x19xf32>
    %cst_24 = arith.constant dense<0xFF800000> : vector<19xf32>
    %46 = vector.multi_reduction <maximumf>, %45, %cst_24 [1] : vector<19x19xf32> to vector<19xf32>
    %47 = vector.shape_cast %46 : vector<19xf32> to vector<19x1xf32>
    %48 = vector.broadcast %47 : vector<19x1xf32> to vector<19x19xf32>
    %49 = arith.subf %45, %48 : vector<19x19xf32>
    %50 = math.exp %49 : vector<19x19xf32>
    %cst_25 = arith.constant dense<0.000000e+00> : vector<19xf32>
    %51 = vector.multi_reduction <add>, %50, %cst_25 [1] : vector<19x19xf32> to vector<19xf32>
    %52 = vector.shape_cast %51 : vector<19xf32> to vector<19x1xf32>
    %53 = tpu.reciprocal %52 {approx = true} : vector<19x1xf32> -> vector<19x1xf32>
    %54 = vector.broadcast %53 : vector<19x1xf32> to vector<19x19xf32>
    %55 = arith.mulf %50, %54 : vector<19x19xf32>
    %cst_26 = arith.constant dense<0.000000e+00> : vector<19x8xf32>
    %56 = tpu.matmul %55, %42, %cst_26 {dimension_numbers = #tpu.dot_dimension_numbers<[1], [0], [0], [1], [0, 0, 1, 1], [], []>} : vector<19x19xf32>, vector<19x8xf32>, vector<19x8xf32> -> vector<19x8xf32>
    %57 = vector.extract_strided_slice %36 {offsets = [0, 8], sizes = [19, 8], strides = [1, 1]} : vector<38x96xf32> to vector<19x8xf32>
    %cst_27 = arith.constant 0.353553385 : f32
    %58 = vector.broadcast %cst_27 : f32 to vector<19x8xf32>
    %59 = arith.mulf %57, %58 : vector<19x8xf32>
    %60 = vector.extract_strided_slice %36 {offsets = [0, 40], sizes = [19, 8], strides = [1, 1]} : vector<38x96xf32> to vector<19x8xf32>
    %61 = vector.extract_strided_slice %36 {offsets = [0, 72], sizes = [19, 8], strides = [1, 1]} : vector<38x96xf32> to vector<19x8xf32>
    %cst_28 = arith.constant dense<0.000000e+00> : vector<19x19xf32>
    %62 = tpu.matmul %59, %60, %cst_28 {dimension_numbers = #tpu.dot_dimension_numbers<[1], [1], [0], [0], [0, 0, 1, 0], [], []>} : vector<19x8xf32>, vector<19x8xf32>, vector<19x19xf32> -> vector<19x19xf32>
    %63 = vector.broadcast %37 : vector<1x19xf32> to vector<19x19xf32>
    %64 = arith.addf %62, %63 : vector<19x19xf32>
    %cst_29 = arith.constant dense<0xFF800000> : vector<19xf32>
    %65 = vector.multi_reduction <maximumf>, %64, %cst_29 [1] : vector<19x19xf32> to vector<19xf32>
    %66 = vector.shape_cast %65 : vector<19xf32> to vector<19x1xf32>
    %67 = vector.broadcast %66 : vector<19x1xf32> to vector<19x19xf32>
    %68 = arith.subf %64, %67 : vector<19x19xf32>
    %69 = math.exp %68 : vector<19x19xf32>
    %cst_30 = arith.constant dense<0.000000e+00> : vector<19xf32>
    %70 = vector.multi_reduction <add>, %69, %cst_30 [1] : vector<19x19xf32> to vector<19xf32>
    %71 = vector.shape_cast %70 : vector<19xf32> to vector<19x1xf32>
    %72 = tpu.reciprocal %71 {approx = true} : vector<19x1xf32> -> vector<19x1xf32>
    %73 = vector.broadcast %72 : vector<19x1xf32> to vector<19x19xf32>
    %74 = arith.mulf %69, %73 : vector<19x19xf32>
    %cst_31 = arith.constant dense<0.000000e+00> : vector<19x8xf32>
    %75 = tpu.matmul %74, %61, %cst_31 {dimension_numbers = #tpu.dot_dimension_numbers<[1], [0], [0], [1], [0, 0, 1, 1], [], []>} : vector<19x19xf32>, vector<19x8xf32>, vector<19x8xf32> -> vector<19x8xf32>
    %76 = vector.extract_strided_slice %36 {offsets = [0, 16], sizes = [19, 8], strides = [1, 1]} : vector<38x96xf32> to vector<19x8xf32>
    %cst_32 = arith.constant 0.353553385 : f32
    %77 = vector.broadcast %cst_32 : f32 to vector<19x8xf32>
    %78 = arith.mulf %76, %77 : vector<19x8xf32>
    %79 = vector.extract_strided_slice %36 {offsets = [0, 48], sizes = [19, 8], strides = [1, 1]} : vector<38x96xf32> to vector<19x8xf32>
    %80 = vector.extract_strided_slice %36 {offsets = [0, 80], sizes = [19, 8], strides = [1, 1]} : vector<38x96xf32> to vector<19x8xf32>
    %cst_33 = arith.constant dense<0.000000e+00> : vector<19x19xf32>
    %81 = tpu.matmul %78, %79, %cst_33 {dimension_numbers = #tpu.dot_dimension_numbers<[1], [1], [0], [0], [0, 0, 1, 0], [], []>} : vector<19x8xf32>, vector<19x8xf32>, vector<19x19xf32> -> vector<19x19xf32>
    %82 = vector.broadcast %37 : vector<1x19xf32> to vector<19x19xf32>
    %83 = arith.addf %81, %82 : vector<19x19xf32>
    %cst_34 = arith.constant dense<0xFF800000> : vector<19xf32>
    %84 = vector.multi_reduction <maximumf>, %83, %cst_34 [1] : vector<19x19xf32> to vector<19xf32>
    %85 = vector.shape_cast %84 : vector<19xf32> to vector<19x1xf32>
    %86 = vector.broadcast %85 : vector<19x1xf32> to vector<19x19xf32>
    %87 = arith.subf %83, %86 : vector<19x19xf32>
    %88 = math.exp %87 : vector<19x19xf32>
    %cst_35 = arith.constant dense<0.000000e+00> : vector<19xf32>
    %89 = vector.multi_reduction <add>, %88, %cst_35 [1] : vector<19x19xf32> to vector<19xf32>
    %90 = vector.shape_cast %89 : vector<19xf32> to vector<19x1xf32>
    %91 = tpu.reciprocal %90 {approx = true} : vector<19x1xf32> -> vector<19x1xf32>
    %92 = vector.broadcast %91 : vector<19x1xf32> to vector<19x19xf32>
    %93 = arith.mulf %88, %92 : vector<19x19xf32>
    %cst_36 = arith.constant dense<0.000000e+00> : vector<19x8xf32>
    %94 = tpu.matmul %93, %80, %cst_36 {dimension_numbers = #tpu.dot_dimension_numbers<[1], [0], [0], [1], [0, 0, 1, 1], [], []>} : vector<19x19xf32>, vector<19x8xf32>, vector<19x8xf32> -> vector<19x8xf32>
    %95 = vector.extract_strided_slice %36 {offsets = [0, 24], sizes = [19, 8], strides = [1, 1]} : vector<38x96xf32> to vector<19x8xf32>
    %cst_37 = arith.constant 0.353553385 : f32
    %96 = vector.broadcast %cst_37 : f32 to vector<19x8xf32>
    %97 = arith.mulf %95, %96 : vector<19x8xf32>
    %98 = vector.extract_strided_slice %36 {offsets = [0, 56], sizes = [19, 8], strides = [1, 1]} : vector<38x96xf32> to vector<19x8xf32>
    %99 = vector.extract_strided_slice %36 {offsets = [0, 88], sizes = [19, 8], strides = [1, 1]} : vector<38x96xf32> to vector<19x8xf32>
    %cst_38 = arith.constant dense<0.000000e+00> : vector<19x19xf32>
    %100 = tpu.matmul %97, %98, %cst_38 {dimension_numbers = #tpu.dot_dimension_numbers<[1], [1], [0], [0], [0, 0, 1, 0], [], []>} : vector<19x8xf32>, vector<19x8xf32>, vector<19x19xf32> -> vector<19x19xf32>
    %101 = vector.broadcast %37 : vector<1x19xf32> to vector<19x19xf32>
    %102 = arith.addf %100, %101 : vector<19x19xf32>
    %cst_39 = arith.constant dense<0xFF800000> : vector<19xf32>
    %103 = vector.multi_reduction <maximumf>, %102, %cst_39 [1] : vector<19x19xf32> to vector<19xf32>
    %104 = vector.shape_cast %103 : vector<19xf32> to vector<19x1xf32>
    %105 = vector.broadcast %104 : vector<19x1xf32> to vector<19x19xf32>
    %106 = arith.subf %102, %105 : vector<19x19xf32>
    %107 = math.exp %106 : vector<19x19xf32>
    %cst_40 = arith.constant dense<0.000000e+00> : vector<19xf32>
    %108 = vector.multi_reduction <add>, %107, %cst_40 [1] : vector<19x19xf32> to vector<19xf32>
    %109 = vector.shape_cast %108 : vector<19xf32> to vector<19x1xf32>
    %110 = tpu.reciprocal %109 {approx = true} : vector<19x1xf32> -> vector<19x1xf32>
    %111 = vector.broadcast %110 : vector<19x1xf32> to vector<19x19xf32>
    %112 = arith.mulf %107, %111 : vector<19x19xf32>
    %cst_41 = arith.constant dense<0.000000e+00> : vector<19x8xf32>
    %113 = tpu.matmul %112, %99, %cst_41 {dimension_numbers = #tpu.dot_dimension_numbers<[1], [0], [0], [1], [0, 0, 1, 1], [], []>} : vector<19x19xf32>, vector<19x8xf32>, vector<19x8xf32> -> vector<19x8xf32>
    %114 = tpu.concatenate %56, %75, %94, %113 in 1 : vector<19x8xf32>, vector<19x8xf32>, vector<19x8xf32>, vector<19x8xf32> -> vector<19x32xf32>
    %115 = vector.extract_strided_slice %3 {offsets = [1, 0], sizes = [1, 19], strides = [1, 1]} : vector<2x19xf32> to vector<1x19xf32>
    %116 = vector.extract_strided_slice %36 {offsets = [19, 0], sizes = [19, 8], strides = [1, 1]} : vector<38x96xf32> to vector<19x8xf32>
    %cst_42 = arith.constant 0.353553385 : f32
    %117 = vector.broadcast %cst_42 : f32 to vector<19x8xf32>
    %118 = arith.mulf %116, %117 : vector<19x8xf32>
    %119 = vector.extract_strided_slice %36 {offsets = [19, 32], sizes = [19, 8], strides = [1, 1]} : vector<38x96xf32> to vector<19x8xf32>
    %120 = vector.extract_strided_slice %36 {offsets = [19, 64], sizes = [19, 8], strides = [1, 1]} : vector<38x96xf32> to vector<19x8xf32>
    %cst_43 = arith.constant dense<0.000000e+00> : vector<19x19xf32>
    %121 = tpu.matmul %118, %119, %cst_43 {dimension_numbers = #tpu.dot_dimension_numbers<[1], [1], [0], [0], [0, 0, 1, 0], [], []>} : vector<19x8xf32>, vector<19x8xf32>, vector<19x19xf32> -> vector<19x19xf32>
    %122 = vector.broadcast %115 : vector<1x19xf32> to vector<19x19xf32>
    %123 = arith.addf %121, %122 : vector<19x19xf32>
    %cst_44 = arith.constant dense<0xFF800000> : vector<19xf32>
    %124 = vector.multi_reduction <maximumf>, %123, %cst_44 [1] : vector<19x19xf32> to vector<19xf32>
    %125 = vector.shape_cast %124 : vector<19xf32> to vector<19x1xf32>
    %126 = vector.broadcast %125 : vector<19x1xf32> to vector<19x19xf32>
    %127 = arith.subf %123, %126 : vector<19x19xf32>
    %128 = math.exp %127 : vector<19x19xf32>
    %cst_45 = arith.constant dense<0.000000e+00> : vector<19xf32>
    %129 = vector.multi_reduction <add>, %128, %cst_45 [1] : vector<19x19xf32> to vector<19xf32>
    %130 = vector.shape_cast %129 : vector<19xf32> to vector<19x1xf32>
    %131 = tpu.reciprocal %130 {approx = true} : vector<19x1xf32> -> vector<19x1xf32>
    %132 = vector.broadcast %131 : vector<19x1xf32> to vector<19x19xf32>
    %133 = arith.mulf %128, %132 : vector<19x19xf32>
    %cst_46 = arith.constant dense<0.000000e+00> : vector<19x8xf32>
    %134 = tpu.matmul %133, %120, %cst_46 {dimension_numbers = #tpu.dot_dimension_numbers<[1], [0], [0], [1], [0, 0, 1, 1], [], []>} : vector<19x19xf32>, vector<19x8xf32>, vector<19x8xf32> -> vector<19x8xf32>
    %135 = vector.extract_strided_slice %36 {offsets = [19, 8], sizes = [19, 8], strides = [1, 1]} : vector<38x96xf32> to vector<19x8xf32>
    %cst_47 = arith.constant 0.353553385 : f32
    %136 = vector.broadcast %cst_47 : f32 to vector<19x8xf32>
    %137 = arith.mulf %135, %136 : vector<19x8xf32>
    %138 = vector.extract_strided_slice %36 {offsets = [19, 40], sizes = [19, 8], strides = [1, 1]} : vector<38x96xf32> to vector<19x8xf32>
    %139 = vector.extract_strided_slice %36 {offsets = [19, 72], sizes = [19, 8], strides = [1, 1]} : vector<38x96xf32> to vector<19x8xf32>
    %cst_48 = arith.constant dense<0.000000e+00> : vector<19x19xf32>
    %140 = tpu.matmul %137, %138, %cst_48 {dimension_numbers = #tpu.dot_dimension_numbers<[1], [1], [0], [0], [0, 0, 1, 0], [], []>} : vector<19x8xf32>, vector<19x8xf32>, vector<19x19xf32> -> vector<19x19xf32>
    %141 = vector.broadcast %115 : vector<1x19xf32> to vector<19x19xf32>
    %142 = arith.addf %140, %141 : vector<19x19xf32>
    %cst_49 = arith.constant dense<0xFF800000> : vector<19xf32>
    %143 = vector.multi_reduction <maximumf>, %142, %cst_49 [1] : vector<19x19xf32> to vector<19xf32>
    %144 = vector.shape_cast %143 : vector<19xf32> to vector<19x1xf32>
    %145 = vector.broadcast %144 : vector<19x1xf32> to vector<19x19xf32>
    %146 = arith.subf %142, %145 : vector<19x19xf32>
    %147 = math.exp %146 : vector<19x19xf32>
    %cst_50 = arith.constant dense<0.000000e+00> : vector<19xf32>
    %148 = vector.multi_reduction <add>, %147, %cst_50 [1] : vector<19x19xf32> to vector<19xf32>
    %149 = vector.shape_cast %148 : vector<19xf32> to vector<19x1xf32>
    %150 = tpu.reciprocal %149 {approx = true} : vector<19x1xf32> -> vector<19x1xf32>
    %151 = vector.broadcast %150 : vector<19x1xf32> to vector<19x19xf32>
    %152 = arith.mulf %147, %151 : vector<19x19xf32>
    %cst_51 = arith.constant dense<0.000000e+00> : vector<19x8xf32>
    %153 = tpu.matmul %152, %139, %cst_51 {dimension_numbers = #tpu.dot_dimension_numbers<[1], [0], [0], [1], [0, 0, 1, 1], [], []>} : vector<19x19xf32>, vector<19x8xf32>, vector<19x8xf32> -> vector<19x8xf32>
    %154 = vector.extract_strided_slice %36 {offsets = [19, 16], sizes = [19, 8], strides = [1, 1]} : vector<38x96xf32> to vector<19x8xf32>
    %cst_52 = arith.constant 0.353553385 : f32
    %155 = vector.broadcast %cst_52 : f32 to vector<19x8xf32>
    %156 = arith.mulf %154, %155 : vector<19x8xf32>
    %157 = vector.extract_strided_slice %36 {offsets = [19, 48], sizes = [19, 8], strides = [1, 1]} : vector<38x96xf32> to vector<19x8xf32>
    %158 = vector.extract_strided_slice %36 {offsets = [19, 80], sizes = [19, 8], strides = [1, 1]} : vector<38x96xf32> to vector<19x8xf32>
    %cst_53 = arith.constant dense<0.000000e+00> : vector<19x19xf32>
    %159 = tpu.matmul %156, %157, %cst_53 {dimension_numbers = #tpu.dot_dimension_numbers<[1], [1], [0], [0], [0, 0, 1, 0], [], []>} : vector<19x8xf32>, vector<19x8xf32>, vector<19x19xf32> -> vector<19x19xf32>
    %160 = vector.broadcast %115 : vector<1x19xf32> to vector<19x19xf32>
    %161 = arith.addf %159, %160 : vector<19x19xf32>
    %cst_54 = arith.constant dense<0xFF800000> : vector<19xf32>
    %162 = vector.multi_reduction <maximumf>, %161, %cst_54 [1] : vector<19x19xf32> to vector<19xf32>
    %163 = vector.shape_cast %162 : vector<19xf32> to vector<19x1xf32>
    %164 = vector.broadcast %163 : vector<19x1xf32> to vector<19x19xf32>
    %165 = arith.subf %161, %164 : vector<19x19xf32>
    %166 = math.exp %165 : vector<19x19xf32>
    %cst_55 = arith.constant dense<0.000000e+00> : vector<19xf32>
    %167 = vector.multi_reduction <add>, %166, %cst_55 [1] : vector<19x19xf32> to vector<19xf32>
    %168 = vector.shape_cast %167 : vector<19xf32> to vector<19x1xf32>
    %169 = tpu.reciprocal %168 {approx = true} : vector<19x1xf32> -> vector<19x1xf32>
    %170 = vector.broadcast %169 : vector<19x1xf32> to vector<19x19xf32>
    %171 = arith.mulf %166, %170 : vector<19x19xf32>
    %cst_56 = arith.constant dense<0.000000e+00> : vector<19x8xf32>
    %172 = tpu.matmul %171, %158, %cst_56 {dimension_numbers = #tpu.dot_dimension_numbers<[1], [0], [0], [1], [0, 0, 1, 1], [], []>} : vector<19x19xf32>, vector<19x8xf32>, vector<19x8xf32> -> vector<19x8xf32>
    %173 = vector.extract_strided_slice %36 {offsets = [19, 24], sizes = [19, 8], strides = [1, 1]} : vector<38x96xf32> to vector<19x8xf32>
    %cst_57 = arith.constant 0.353553385 : f32
    %174 = vector.broadcast %cst_57 : f32 to vector<19x8xf32>
    %175 = arith.mulf %173, %174 : vector<19x8xf32>
    %176 = vector.extract_strided_slice %36 {offsets = [19, 56], sizes = [19, 8], strides = [1, 1]} : vector<38x96xf32> to vector<19x8xf32>
    %177 = vector.extract_strided_slice %36 {offsets = [19, 88], sizes = [19, 8], strides = [1, 1]} : vector<38x96xf32> to vector<19x8xf32>
    %cst_58 = arith.constant dense<0.000000e+00> : vector<19x19xf32>
    %178 = tpu.matmul %175, %176, %cst_58 {dimension_numbers = #tpu.dot_dimension_numbers<[1], [1], [0], [0], [0, 0, 1, 0], [], []>} : vector<19x8xf32>, vector<19x8xf32>, vector<19x19xf32> -> vector<19x19xf32>
    %179 = vector.broadcast %115 : vector<1x19xf32> to vector<19x19xf32>
    %180 = arith.addf %178, %179 : vector<19x19xf32>
    %cst_59 = arith.constant dense<0xFF800000> : vector<19xf32>
    %181 = vector.multi_reduction <maximumf>, %180, %cst_59 [1] : vector<19x19xf32> to vector<19xf32>
    %182 = vector.shape_cast %181 : vector<19xf32> to vector<19x1xf32>
    %183 = vector.broadcast %182 : vector<19x1xf32> to vector<19x19xf32>
    %184 = arith.subf %180, %183 : vector<19x19xf32>
    %185 = math.exp %184 : vector<19x19xf32>
    %cst_60 = arith.constant dense<0.000000e+00> : vector<19xf32>
    %186 = vector.multi_reduction <add>, %185, %cst_60 [1] : vector<19x19xf32> to vector<19xf32>
    %187 = vector.shape_cast %186 : vector<19xf32> to vector<19x1xf32>
    %188 = tpu.reciprocal %187 {approx = true} : vector<19x1xf32> -> vector<19x1xf32>
    %189 = vector.broadcast %188 : vector<19x1xf32> to vector<19x19xf32>
    %190 = arith.mulf %185, %189 : vector<19x19xf32>
    %cst_61 = arith.constant dense<0.000000e+00> : vector<19x8xf32>
    %191 = tpu.matmul %190, %177, %cst_61 {dimension_numbers = #tpu.dot_dimension_numbers<[1], [0], [0], [1], [0, 0, 1, 1], [], []>} : vector<19x19xf32>, vector<19x8xf32>, vector<19x8xf32> -> vector<19x8xf32>
    %192 = tpu.concatenate %134, %153, %172, %191 in 1 : vector<19x8xf32>, vector<19x8xf32>, vector<19x8xf32>, vector<19x8xf32> -> vector<19x32xf32>
    %193 = tpu.concatenate %114, %192 in 0 : vector<19x32xf32>, vector<19x32xf32> -> vector<38x32xf32>
    %c0_62 = arith.constant 0 : index
    %c0_63 = arith.constant 0 : index
    %c0_64 = arith.constant 0 : index
    %194 = vector.load %arg7[%c0_62, %c0_63, %c0_64] : memref<2x32x32xf32, #tpu.memory_space<vmem>>, vector<1x32x32xf32>
    %195 = vector.shape_cast %194 : vector<1x32x32xf32> to vector<32x32xf32>
    %cst_65 = arith.constant dense<0.000000e+00> : vector<38x32xf32>
    %196 = tpu.matmul %193, %195, %cst_65 {dimension_numbers = #tpu.dot_dimension_numbers<[1], [0], [0], [1], [0, 0, 1, 1], [], []>} : vector<38x32xf32>, vector<32x32xf32>, vector<38x32xf32> -> vector<38x32xf32>
    %197 = arith.addf %1, %196 : vector<38x32xf32>
    %c0_66 = arith.constant 0 : index
    %c0_67 = arith.constant 0 : index
    %c0_68 = arith.constant 0 : index
    %198 = vector.load %arg8[%c0_66, %c0_67, %c0_68] : memref<2x1x32xf32, #tpu.memory_space<vmem>>, vector<1x1x32xf32>
    %199 = vector.shape_cast %198 : vector<1x1x32xf32> to vector<1x32xf32>
    %200 = vector.broadcast %199 : vector<1x32xf32> to vector<38x32xf32>
    %201 = arith.addf %197, %200 : vector<38x32xf32>
    %c0_69 = arith.constant 0 : index
    %c0_70 = arith.constant 0 : index
    %c0_71 = arith.constant 0 : index
    %202 = vector.load %arg9[%c0_69, %c0_70, %c0_71] : memref<2x1x32xf32, #tpu.memory_space<vmem>>, vector<1x1x32xf32>
    %203 = vector.shape_cast %202 : vector<1x1x32xf32> to vector<1x32xf32>
    %c0_72 = arith.constant 0 : index
    %c0_73 = arith.constant 0 : index
    %c0_74 = arith.constant 0 : index
    %204 = vector.load %arg10[%c0_72, %c0_73, %c0_74] : memref<2x1x32xf32, #tpu.memory_space<vmem>>, vector<1x1x32xf32>
    %205 = vector.shape_cast %204 : vector<1x1x32xf32> to vector<1x32xf32>
    %cst_75 = arith.constant dense<0.000000e+00> : vector<38xf32>
    %206 = vector.multi_reduction <add>, %201, %cst_75 [1] : vector<38x32xf32> to vector<38xf32>
    %207 = vector.shape_cast %206 : vector<38xf32> to vector<38x1xf32>
    %cst_76 = arith.constant 3.200000e+01 : f32
    %208 = vector.broadcast %cst_76 : f32 to vector<38x1xf32>
    %209 = arith.divf %207, %208 : vector<38x1xf32>
    %210 = vector.broadcast %209 : vector<38x1xf32> to vector<38x32xf32>
    %211 = arith.subf %201, %210 : vector<38x32xf32>
    %212 = arith.mulf %211, %211 : vector<38x32xf32>
    %cst_77 = arith.constant dense<0.000000e+00> : vector<38xf32>
    %213 = vector.multi_reduction <add>, %212, %cst_77 [1] : vector<38x32xf32> to vector<38xf32>
    %214 = vector.shape_cast %213 : vector<38xf32> to vector<38x1xf32>
    %cst_78 = arith.constant 3.200000e+01 : f32
    %215 = vector.broadcast %cst_78 : f32 to vector<38x1xf32>
    %216 = arith.divf %214, %215 : vector<38x1xf32>
    %217 = vector.broadcast %209 : vector<38x1xf32> to vector<38x32xf32>
    %218 = arith.subf %201, %217 : vector<38x32xf32>
    %cst_79 = arith.constant 9.99999997E-7 : f32
    %219 = vector.broadcast %cst_79 : f32 to vector<38x1xf32>
    %220 = arith.addf %216, %219 : vector<38x1xf32>
    %221 = math.rsqrt %220 : vector<38x1xf32>
    %222 = vector.broadcast %221 : vector<38x1xf32> to vector<38x32xf32>
    %223 = arith.mulf %218, %222 : vector<38x32xf32>
    %224 = vector.broadcast %203 : vector<1x32xf32> to vector<38x32xf32>
    %225 = arith.mulf %223, %224 : vector<38x32xf32>
    %226 = vector.broadcast %205 : vector<1x32xf32> to vector<38x32xf32>
    %227 = arith.addf %225, %226 : vector<38x32xf32>
    %c0_80 = arith.constant 0 : index
    %c0_81 = arith.constant 0 : index
    %c0_82 = arith.constant 0 : index
    %228 = vector.load %arg11[%c0_80, %c0_81, %c0_82] : memref<2x32x128xf32, #tpu.memory_space<vmem>>, vector<1x32x128xf32>
    %229 = vector.shape_cast %228 : vector<1x32x128xf32> to vector<32x128xf32>
    %cst_83 = arith.constant dense<0.000000e+00> : vector<38x128xf32>
    %230 = tpu.matmul %227, %229, %cst_83 {dimension_numbers = #tpu.dot_dimension_numbers<[1], [0], [0], [1], [0, 0, 1, 1], [], []>} : vector<38x32xf32>, vector<32x128xf32>, vector<38x128xf32> -> vector<38x128xf32>
    %c0_84 = arith.constant 0 : index
    %c0_85 = arith.constant 0 : index
    %c0_86 = arith.constant 0 : index
    %231 = vector.load %arg12[%c0_84, %c0_85, %c0_86] : memref<2x1x128xf32, #tpu.memory_space<vmem>>, vector<1x1x128xf32>
    %232 = vector.shape_cast %231 : vector<1x1x128xf32> to vector<1x128xf32>
    %233 = vector.broadcast %232 : vector<1x128xf32> to vector<38x128xf32>
    %234 = arith.addf %230, %233 : vector<38x128xf32>
    %cst_87 = arith.constant 5.000000e-01 : f32
    %235 = vector.broadcast %cst_87 : f32 to vector<38x128xf32>
    %236 = arith.mulf %235, %234 : vector<38x128xf32>
    %cst_88 = arith.constant 4.471500e-02 : f32
    %237 = vector.broadcast %cst_88 : f32 to vector<38x128xf32>
    %238 = arith.mulf %237, %234 : vector<38x128xf32>
    %239 = arith.mulf %238, %234 : vector<38x128xf32>
    %240 = arith.mulf %239, %234 : vector<38x128xf32>
    %241 = arith.addf %234, %240 : vector<38x128xf32>
    %cst_89 = arith.constant 0.797884583 : f32
    %242 = vector.broadcast %cst_89 : f32 to vector<38x128xf32>
    %243 = arith.mulf %242, %241 : vector<38x128xf32>
    %244 = math.tanh %243 : vector<38x128xf32>
    %cst_90 = arith.constant 1.000000e+00 : f32
    %245 = vector.broadcast %cst_90 : f32 to vector<38x128xf32>
    %246 = arith.addf %245, %244 : vector<38x128xf32>
    %247 = arith.mulf %236, %246 : vector<38x128xf32>
    %c0_91 = arith.constant 0 : index
    %c0_92 = arith.constant 0 : index
    %c0_93 = arith.constant 0 : index
    %248 = vector.load %arg13[%c0_91, %c0_92, %c0_93] : memref<2x128x32xf32, #tpu.memory_space<vmem>>, vector<1x128x32xf32>
    %249 = vector.shape_cast %248 : vector<1x128x32xf32> to vector<128x32xf32>
    %cst_94 = arith.constant dense<0.000000e+00> : vector<38x32xf32>
    %250 = tpu.matmul %247, %249, %cst_94 {dimension_numbers = #tpu.dot_dimension_numbers<[1], [0], [0], [1], [0, 0, 1, 1], [], []>} : vector<38x128xf32>, vector<128x32xf32>, vector<38x32xf32> -> vector<38x32xf32>
    %c0_95 = arith.constant 0 : index
    %c0_96 = arith.constant 0 : index
    %c0_97 = arith.constant 0 : index
    %251 = vector.load %arg14[%c0_95, %c0_96, %c0_97] : memref<2x1x32xf32, #tpu.memory_space<vmem>>, vector<1x1x32xf32>
    %252 = vector.shape_cast %251 : vector<1x1x32xf32> to vector<1x32xf32>
    %253 = vector.broadcast %252 : vector<1x32xf32> to vector<38x32xf32>
    %254 = arith.addf %250, %253 : vector<38x32xf32>
    %255 = arith.addf %201, %254 : vector<38x32xf32>
    %c1 = arith.constant 1 : index
    %c0_98 = arith.constant 0 : index
    %c0_99 = arith.constant 0 : index
    %256 = vector.load %arg3[%c1, %c0_98, %c0_99] : memref<2x1x32xf32, #tpu.memory_space<vmem>>, vector<1x1x32xf32>
    %257 = vector.shape_cast %256 : vector<1x1x32xf32> to vector<1x32xf32>
    %c1_100 = arith.constant 1 : index
    %c0_101 = arith.constant 0 : index
    %c0_102 = arith.constant 0 : index
    %258 = vector.load %arg4[%c1_100, %c0_101, %c0_102] : memref<2x1x32xf32, #tpu.memory_space<vmem>>, vector<1x1x32xf32>
    %259 = vector.shape_cast %258 : vector<1x1x32xf32> to vector<1x32xf32>
    %cst_103 = arith.constant dense<0.000000e+00> : vector<38xf32>
    %260 = vector.multi_reduction <add>, %255, %cst_103 [1] : vector<38x32xf32> to vector<38xf32>
    %261 = vector.shape_cast %260 : vector<38xf32> to vector<38x1xf32>
    %cst_104 = arith.constant 3.200000e+01 : f32
    %262 = vector.broadcast %cst_104 : f32 to vector<38x1xf32>
    %263 = arith.divf %261, %262 : vector<38x1xf32>
    %264 = vector.broadcast %263 : vector<38x1xf32> to vector<38x32xf32>
    %265 = arith.subf %255, %264 : vector<38x32xf32>
    %266 = arith.mulf %265, %265 : vector<38x32xf32>
    %cst_105 = arith.constant dense<0.000000e+00> : vector<38xf32>
    %267 = vector.multi_reduction <add>, %266, %cst_105 [1] : vector<38x32xf32> to vector<38xf32>
    %268 = vector.shape_cast %267 : vector<38xf32> to vector<38x1xf32>
    %cst_106 = arith.constant 3.200000e+01 : f32
    %269 = vector.broadcast %cst_106 : f32 to vector<38x1xf32>
    %270 = arith.divf %268, %269 : vector<38x1xf32>
    %271 = vector.broadcast %263 : vector<38x1xf32> to vector<38x32xf32>
    %272 = arith.subf %255, %271 : vector<38x32xf32>
    %cst_107 = arith.constant 9.99999997E-7 : f32
    %273 = vector.broadcast %cst_107 : f32 to vector<38x1xf32>
    %274 = arith.addf %270, %273 : vector<38x1xf32>
    %275 = math.rsqrt %274 : vector<38x1xf32>
    %276 = vector.broadcast %275 : vector<38x1xf32> to vector<38x32xf32>
    %277 = arith.mulf %272, %276 : vector<38x32xf32>
    %278 = vector.broadcast %257 : vector<1x32xf32> to vector<38x32xf32>
    %279 = arith.mulf %277, %278 : vector<38x32xf32>
    %280 = vector.broadcast %259 : vector<1x32xf32> to vector<38x32xf32>
    %281 = arith.addf %279, %280 : vector<38x32xf32>
    %c1_108 = arith.constant 1 : index
    %c0_109 = arith.constant 0 : index
    %c0_110 = arith.constant 0 : index
    %282 = vector.load %arg5[%c1_108, %c0_109, %c0_110] : memref<2x32x96xf32, #tpu.memory_space<vmem>>, vector<1x32x96xf32>
    %283 = vector.shape_cast %282 : vector<1x32x96xf32> to vector<32x96xf32>
    %cst_111 = arith.constant dense<0.000000e+00> : vector<38x96xf32>
    %284 = tpu.matmul %281, %283, %cst_111 {dimension_numbers = #tpu.dot_dimension_numbers<[1], [0], [0], [1], [0, 0, 1, 1], [], []>} : vector<38x32xf32>, vector<32x96xf32>, vector<38x96xf32> -> vector<38x96xf32>
    %c1_112 = arith.constant 1 : index
    %c0_113 = arith.constant 0 : index
    %c0_114 = arith.constant 0 : index
    %285 = vector.load %arg6[%c1_112, %c0_113, %c0_114] : memref<2x1x96xf32, #tpu.memory_space<vmem>>, vector<1x1x96xf32>
    %286 = vector.shape_cast %285 : vector<1x1x96xf32> to vector<1x96xf32>
    %287 = vector.broadcast %286 : vector<1x96xf32> to vector<38x96xf32>
    %288 = arith.addf %284, %287 : vector<38x96xf32>
    %289 = vector.extract_strided_slice %3 {offsets = [0, 0], sizes = [1, 19], strides = [1, 1]} : vector<2x19xf32> to vector<1x19xf32>
    %290 = vector.extract_strided_slice %288 {offsets = [0, 0], sizes = [19, 8], strides = [1, 1]} : vector<38x96xf32> to vector<19x8xf32>
    %cst_115 = arith.constant 0.353553385 : f32
    %291 = vector.broadcast %cst_115 : f32 to vector<19x8xf32>
    %292 = arith.mulf %290, %291 : vector<19x8xf32>
    %293 = vector.extract_strided_slice %288 {offsets = [0, 32], sizes = [19, 8], strides = [1, 1]} : vector<38x96xf32> to vector<19x8xf32>
    %294 = vector.extract_strided_slice %288 {offsets = [0, 64], sizes = [19, 8], strides = [1, 1]} : vector<38x96xf32> to vector<19x8xf32>
    %cst_116 = arith.constant dense<0.000000e+00> : vector<19x19xf32>
    %295 = tpu.matmul %292, %293, %cst_116 {dimension_numbers = #tpu.dot_dimension_numbers<[1], [1], [0], [0], [0, 0, 1, 0], [], []>} : vector<19x8xf32>, vector<19x8xf32>, vector<19x19xf32> -> vector<19x19xf32>
    %296 = vector.broadcast %289 : vector<1x19xf32> to vector<19x19xf32>
    %297 = arith.addf %295, %296 : vector<19x19xf32>
    %cst_117 = arith.constant dense<0xFF800000> : vector<19xf32>
    %298 = vector.multi_reduction <maximumf>, %297, %cst_117 [1] : vector<19x19xf32> to vector<19xf32>
    %299 = vector.shape_cast %298 : vector<19xf32> to vector<19x1xf32>
    %300 = vector.broadcast %299 : vector<19x1xf32> to vector<19x19xf32>
    %301 = arith.subf %297, %300 : vector<19x19xf32>
    %302 = math.exp %301 : vector<19x19xf32>
    %cst_118 = arith.constant dense<0.000000e+00> : vector<19xf32>
    %303 = vector.multi_reduction <add>, %302, %cst_118 [1] : vector<19x19xf32> to vector<19xf32>
    %304 = vector.shape_cast %303 : vector<19xf32> to vector<19x1xf32>
    %305 = tpu.reciprocal %304 {approx = true} : vector<19x1xf32> -> vector<19x1xf32>
    %306 = vector.broadcast %305 : vector<19x1xf32> to vector<19x19xf32>
    %307 = arith.mulf %302, %306 : vector<19x19xf32>
    %cst_119 = arith.constant dense<0.000000e+00> : vector<19x8xf32>
    %308 = tpu.matmul %307, %294, %cst_119 {dimension_numbers = #tpu.dot_dimension_numbers<[1], [0], [0], [1], [0, 0, 1, 1], [], []>} : vector<19x19xf32>, vector<19x8xf32>, vector<19x8xf32> -> vector<19x8xf32>
    %309 = vector.extract_strided_slice %288 {offsets = [0, 8], sizes = [19, 8], strides = [1, 1]} : vector<38x96xf32> to vector<19x8xf32>
    %cst_120 = arith.constant 0.353553385 : f32
    %310 = vector.broadcast %cst_120 : f32 to vector<19x8xf32>
    %311 = arith.mulf %309, %310 : vector<19x8xf32>
    %312 = vector.extract_strided_slice %288 {offsets = [0, 40], sizes = [19, 8], strides = [1, 1]} : vector<38x96xf32> to vector<19x8xf32>
    %313 = vector.extract_strided_slice %288 {offsets = [0, 72], sizes = [19, 8], strides = [1, 1]} : vector<38x96xf32> to vector<19x8xf32>
    %cst_121 = arith.constant dense<0.000000e+00> : vector<19x19xf32>
    %314 = tpu.matmul %311, %312, %cst_121 {dimension_numbers = #tpu.dot_dimension_numbers<[1], [1], [0], [0], [0, 0, 1, 0], [], []>} : vector<19x8xf32>, vector<19x8xf32>, vector<19x19xf32> -> vector<19x19xf32>
    %315 = vector.broadcast %289 : vector<1x19xf32> to vector<19x19xf32>
    %316 = arith.addf %314, %315 : vector<19x19xf32>
    %cst_122 = arith.constant dense<0xFF800000> : vector<19xf32>
    %317 = vector.multi_reduction <maximumf>, %316, %cst_122 [1] : vector<19x19xf32> to vector<19xf32>
    %318 = vector.shape_cast %317 : vector<19xf32> to vector<19x1xf32>
    %319 = vector.broadcast %318 : vector<19x1xf32> to vector<19x19xf32>
    %320 = arith.subf %316, %319 : vector<19x19xf32>
    %321 = math.exp %320 : vector<19x19xf32>
    %cst_123 = arith.constant dense<0.000000e+00> : vector<19xf32>
    %322 = vector.multi_reduction <add>, %321, %cst_123 [1] : vector<19x19xf32> to vector<19xf32>
    %323 = vector.shape_cast %322 : vector<19xf32> to vector<19x1xf32>
    %324 = tpu.reciprocal %323 {approx = true} : vector<19x1xf32> -> vector<19x1xf32>
    %325 = vector.broadcast %324 : vector<19x1xf32> to vector<19x19xf32>
    %326 = arith.mulf %321, %325 : vector<19x19xf32>
    %cst_124 = arith.constant dense<0.000000e+00> : vector<19x8xf32>
    %327 = tpu.matmul %326, %313, %cst_124 {dimension_numbers = #tpu.dot_dimension_numbers<[1], [0], [0], [1], [0, 0, 1, 1], [], []>} : vector<19x19xf32>, vector<19x8xf32>, vector<19x8xf32> -> vector<19x8xf32>
    %328 = vector.extract_strided_slice %288 {offsets = [0, 16], sizes = [19, 8], strides = [1, 1]} : vector<38x96xf32> to vector<19x8xf32>
    %cst_125 = arith.constant 0.353553385 : f32
    %329 = vector.broadcast %cst_125 : f32 to vector<19x8xf32>
    %330 = arith.mulf %328, %329 : vector<19x8xf32>
    %331 = vector.extract_strided_slice %288 {offsets = [0, 48], sizes = [19, 8], strides = [1, 1]} : vector<38x96xf32> to vector<19x8xf32>
    %332 = vector.extract_strided_slice %288 {offsets = [0, 80], sizes = [19, 8], strides = [1, 1]} : vector<38x96xf32> to vector<19x8xf32>
    %cst_126 = arith.constant dense<0.000000e+00> : vector<19x19xf32>
    %333 = tpu.matmul %330, %331, %cst_126 {dimension_numbers = #tpu.dot_dimension_numbers<[1], [1], [0], [0], [0, 0, 1, 0], [], []>} : vector<19x8xf32>, vector<19x8xf32>, vector<19x19xf32> -> vector<19x19xf32>
    %334 = vector.broadcast %289 : vector<1x19xf32> to vector<19x19xf32>
    %335 = arith.addf %333, %334 : vector<19x19xf32>
    %cst_127 = arith.constant dense<0xFF800000> : vector<19xf32>
    %336 = vector.multi_reduction <maximumf>, %335, %cst_127 [1] : vector<19x19xf32> to vector<19xf32>
    %337 = vector.shape_cast %336 : vector<19xf32> to vector<19x1xf32>
    %338 = vector.broadcast %337 : vector<19x1xf32> to vector<19x19xf32>
    %339 = arith.subf %335, %338 : vector<19x19xf32>
    %340 = math.exp %339 : vector<19x19xf32>
    %cst_128 = arith.constant dense<0.000000e+00> : vector<19xf32>
    %341 = vector.multi_reduction <add>, %340, %cst_128 [1] : vector<19x19xf32> to vector<19xf32>
    %342 = vector.shape_cast %341 : vector<19xf32> to vector<19x1xf32>
    %343 = tpu.reciprocal %342 {approx = true} : vector<19x1xf32> -> vector<19x1xf32>
    %344 = vector.broadcast %343 : vector<19x1xf32> to vector<19x19xf32>
    %345 = arith.mulf %340, %344 : vector<19x19xf32>
    %cst_129 = arith.constant dense<0.000000e+00> : vector<19x8xf32>
    %346 = tpu.matmul %345, %332, %cst_129 {dimension_numbers = #tpu.dot_dimension_numbers<[1], [0], [0], [1], [0, 0, 1, 1], [], []>} : vector<19x19xf32>, vector<19x8xf32>, vector<19x8xf32> -> vector<19x8xf32>
    %347 = vector.extract_strided_slice %288 {offsets = [0, 24], sizes = [19, 8], strides = [1, 1]} : vector<38x96xf32> to vector<19x8xf32>
    %cst_130 = arith.constant 0.353553385 : f32
    %348 = vector.broadcast %cst_130 : f32 to vector<19x8xf32>
    %349 = arith.mulf %347, %348 : vector<19x8xf32>
    %350 = vector.extract_strided_slice %288 {offsets = [0, 56], sizes = [19, 8], strides = [1, 1]} : vector<38x96xf32> to vector<19x8xf32>
    %351 = vector.extract_strided_slice %288 {offsets = [0, 88], sizes = [19, 8], strides = [1, 1]} : vector<38x96xf32> to vector<19x8xf32>
    %cst_131 = arith.constant dense<0.000000e+00> : vector<19x19xf32>
    %352 = tpu.matmul %349, %350, %cst_131 {dimension_numbers = #tpu.dot_dimension_numbers<[1], [1], [0], [0], [0, 0, 1, 0], [], []>} : vector<19x8xf32>, vector<19x8xf32>, vector<19x19xf32> -> vector<19x19xf32>
    %353 = vector.broadcast %289 : vector<1x19xf32> to vector<19x19xf32>
    %354 = arith.addf %352, %353 : vector<19x19xf32>
    %cst_132 = arith.constant dense<0xFF800000> : vector<19xf32>
    %355 = vector.multi_reduction <maximumf>, %354, %cst_132 [1] : vector<19x19xf32> to vector<19xf32>
    %356 = vector.shape_cast %355 : vector<19xf32> to vector<19x1xf32>
    %357 = vector.broadcast %356 : vector<19x1xf32> to vector<19x19xf32>
    %358 = arith.subf %354, %357 : vector<19x19xf32>
    %359 = math.exp %358 : vector<19x19xf32>
    %cst_133 = arith.constant dense<0.000000e+00> : vector<19xf32>
    %360 = vector.multi_reduction <add>, %359, %cst_133 [1] : vector<19x19xf32> to vector<19xf32>
    %361 = vector.shape_cast %360 : vector<19xf32> to vector<19x1xf32>
    %362 = tpu.reciprocal %361 {approx = true} : vector<19x1xf32> -> vector<19x1xf32>
    %363 = vector.broadcast %362 : vector<19x1xf32> to vector<19x19xf32>
    %364 = arith.mulf %359, %363 : vector<19x19xf32>
    %cst_134 = arith.constant dense<0.000000e+00> : vector<19x8xf32>
    %365 = tpu.matmul %364, %351, %cst_134 {dimension_numbers = #tpu.dot_dimension_numbers<[1], [0], [0], [1], [0, 0, 1, 1], [], []>} : vector<19x19xf32>, vector<19x8xf32>, vector<19x8xf32> -> vector<19x8xf32>
    %366 = tpu.concatenate %308, %327, %346, %365 in 1 : vector<19x8xf32>, vector<19x8xf32>, vector<19x8xf32>, vector<19x8xf32> -> vector<19x32xf32>
    %367 = vector.extract_strided_slice %3 {offsets = [1, 0], sizes = [1, 19], strides = [1, 1]} : vector<2x19xf32> to vector<1x19xf32>
    %368 = vector.extract_strided_slice %288 {offsets = [19, 0], sizes = [19, 8], strides = [1, 1]} : vector<38x96xf32> to vector<19x8xf32>
    %cst_135 = arith.constant 0.353553385 : f32
    %369 = vector.broadcast %cst_135 : f32 to vector<19x8xf32>
    %370 = arith.mulf %368, %369 : vector<19x8xf32>
    %371 = vector.extract_strided_slice %288 {offsets = [19, 32], sizes = [19, 8], strides = [1, 1]} : vector<38x96xf32> to vector<19x8xf32>
    %372 = vector.extract_strided_slice %288 {offsets = [19, 64], sizes = [19, 8], strides = [1, 1]} : vector<38x96xf32> to vector<19x8xf32>
    %cst_136 = arith.constant dense<0.000000e+00> : vector<19x19xf32>
    %373 = tpu.matmul %370, %371, %cst_136 {dimension_numbers = #tpu.dot_dimension_numbers<[1], [1], [0], [0], [0, 0, 1, 0], [], []>} : vector<19x8xf32>, vector<19x8xf32>, vector<19x19xf32> -> vector<19x19xf32>
    %374 = vector.broadcast %367 : vector<1x19xf32> to vector<19x19xf32>
    %375 = arith.addf %373, %374 : vector<19x19xf32>
    %cst_137 = arith.constant dense<0xFF800000> : vector<19xf32>
    %376 = vector.multi_reduction <maximumf>, %375, %cst_137 [1] : vector<19x19xf32> to vector<19xf32>
    %377 = vector.shape_cast %376 : vector<19xf32> to vector<19x1xf32>
    %378 = vector.broadcast %377 : vector<19x1xf32> to vector<19x19xf32>
    %379 = arith.subf %375, %378 : vector<19x19xf32>
    %380 = math.exp %379 : vector<19x19xf32>
    %cst_138 = arith.constant dense<0.000000e+00> : vector<19xf32>
    %381 = vector.multi_reduction <add>, %380, %cst_138 [1] : vector<19x19xf32> to vector<19xf32>
    %382 = vector.shape_cast %381 : vector<19xf32> to vector<19x1xf32>
    %383 = tpu.reciprocal %382 {approx = true} : vector<19x1xf32> -> vector<19x1xf32>
    %384 = vector.broadcast %383 : vector<19x1xf32> to vector<19x19xf32>
    %385 = arith.mulf %380, %384 : vector<19x19xf32>
    %cst_139 = arith.constant dense<0.000000e+00> : vector<19x8xf32>
    %386 = tpu.matmul %385, %372, %cst_139 {dimension_numbers = #tpu.dot_dimension_numbers<[1], [0], [0], [1], [0, 0, 1, 1], [], []>} : vector<19x19xf32>, vector<19x8xf32>, vector<19x8xf32> -> vector<19x8xf32>
    %387 = vector.extract_strided_slice %288 {offsets = [19, 8], sizes = [19, 8], strides = [1, 1]} : vector<38x96xf32> to vector<19x8xf32>
    %cst_140 = arith.constant 0.353553385 : f32
    %388 = vector.broadcast %cst_140 : f32 to vector<19x8xf32>
    %389 = arith.mulf %387, %388 : vector<19x8xf32>
    %390 = vector.extract_strided_slice %288 {offsets = [19, 40], sizes = [19, 8], strides = [1, 1]} : vector<38x96xf32> to vector<19x8xf32>
    %391 = vector.extract_strided_slice %288 {offsets = [19, 72], sizes = [19, 8], strides = [1, 1]} : vector<38x96xf32> to vector<19x8xf32>
    %cst_141 = arith.constant dense<0.000000e+00> : vector<19x19xf32>
    %392 = tpu.matmul %389, %390, %cst_141 {dimension_numbers = #tpu.dot_dimension_numbers<[1], [1], [0], [0], [0, 0, 1, 0], [], []>} : vector<19x8xf32>, vector<19x8xf32>, vector<19x19xf32> -> vector<19x19xf32>
    %393 = vector.broadcast %367 : vector<1x19xf32> to vector<19x19xf32>
    %394 = arith.addf %392, %393 : vector<19x19xf32>
    %cst_142 = arith.constant dense<0xFF800000> : vector<19xf32>
    %395 = vector.multi_reduction <maximumf>, %394, %cst_142 [1] : vector<19x19xf32> to vector<19xf32>
    %396 = vector.shape_cast %395 : vector<19xf32> to vector<19x1xf32>
    %397 = vector.broadcast %396 : vector<19x1xf32> to vector<19x19xf32>
    %398 = arith.subf %394, %397 : vector<19x19xf32>
    %399 = math.exp %398 : vector<19x19xf32>
    %cst_143 = arith.constant dense<0.000000e+00> : vector<19xf32>
    %400 = vector.multi_reduction <add>, %399, %cst_143 [1] : vector<19x19xf32> to vector<19xf32>
    %401 = vector.shape_cast %400 : vector<19xf32> to vector<19x1xf32>
    %402 = tpu.reciprocal %401 {approx = true} : vector<19x1xf32> -> vector<19x1xf32>
    %403 = vector.broadcast %402 : vector<19x1xf32> to vector<19x19xf32>
    %404 = arith.mulf %399, %403 : vector<19x19xf32>
    %cst_144 = arith.constant dense<0.000000e+00> : vector<19x8xf32>
    %405 = tpu.matmul %404, %391, %cst_144 {dimension_numbers = #tpu.dot_dimension_numbers<[1], [0], [0], [1], [0, 0, 1, 1], [], []>} : vector<19x19xf32>, vector<19x8xf32>, vector<19x8xf32> -> vector<19x8xf32>
    %406 = vector.extract_strided_slice %288 {offsets = [19, 16], sizes = [19, 8], strides = [1, 1]} : vector<38x96xf32> to vector<19x8xf32>
    %cst_145 = arith.constant 0.353553385 : f32
    %407 = vector.broadcast %cst_145 : f32 to vector<19x8xf32>
    %408 = arith.mulf %406, %407 : vector<19x8xf32>
    %409 = vector.extract_strided_slice %288 {offsets = [19, 48], sizes = [19, 8], strides = [1, 1]} : vector<38x96xf32> to vector<19x8xf32>
    %410 = vector.extract_strided_slice %288 {offsets = [19, 80], sizes = [19, 8], strides = [1, 1]} : vector<38x96xf32> to vector<19x8xf32>
    %cst_146 = arith.constant dense<0.000000e+00> : vector<19x19xf32>
    %411 = tpu.matmul %408, %409, %cst_146 {dimension_numbers = #tpu.dot_dimension_numbers<[1], [1], [0], [0], [0, 0, 1, 0], [], []>} : vector<19x8xf32>, vector<19x8xf32>, vector<19x19xf32> -> vector<19x19xf32>
    %412 = vector.broadcast %367 : vector<1x19xf32> to vector<19x19xf32>
    %413 = arith.addf %411, %412 : vector<19x19xf32>
    %cst_147 = arith.constant dense<0xFF800000> : vector<19xf32>
    %414 = vector.multi_reduction <maximumf>, %413, %cst_147 [1] : vector<19x19xf32> to vector<19xf32>
    %415 = vector.shape_cast %414 : vector<19xf32> to vector<19x1xf32>
    %416 = vector.broadcast %415 : vector<19x1xf32> to vector<19x19xf32>
    %417 = arith.subf %413, %416 : vector<19x19xf32>
    %418 = math.exp %417 : vector<19x19xf32>
    %cst_148 = arith.constant dense<0.000000e+00> : vector<19xf32>
    %419 = vector.multi_reduction <add>, %418, %cst_148 [1] : vector<19x19xf32> to vector<19xf32>
    %420 = vector.shape_cast %419 : vector<19xf32> to vector<19x1xf32>
    %421 = tpu.reciprocal %420 {approx = true} : vector<19x1xf32> -> vector<19x1xf32>
    %422 = vector.broadcast %421 : vector<19x1xf32> to vector<19x19xf32>
    %423 = arith.mulf %418, %422 : vector<19x19xf32>
    %cst_149 = arith.constant dense<0.000000e+00> : vector<19x8xf32>
    %424 = tpu.matmul %423, %410, %cst_149 {dimension_numbers = #tpu.dot_dimension_numbers<[1], [0], [0], [1], [0, 0, 1, 1], [], []>} : vector<19x19xf32>, vector<19x8xf32>, vector<19x8xf32> -> vector<19x8xf32>
    %425 = vector.extract_strided_slice %288 {offsets = [19, 24], sizes = [19, 8], strides = [1, 1]} : vector<38x96xf32> to vector<19x8xf32>
    %cst_150 = arith.constant 0.353553385 : f32
    %426 = vector.broadcast %cst_150 : f32 to vector<19x8xf32>
    %427 = arith.mulf %425, %426 : vector<19x8xf32>
    %428 = vector.extract_strided_slice %288 {offsets = [19, 56], sizes = [19, 8], strides = [1, 1]} : vector<38x96xf32> to vector<19x8xf32>
    %429 = vector.extract_strided_slice %288 {offsets = [19, 88], sizes = [19, 8], strides = [1, 1]} : vector<38x96xf32> to vector<19x8xf32>
    %cst_151 = arith.constant dense<0.000000e+00> : vector<19x19xf32>
    %430 = tpu.matmul %427, %428, %cst_151 {dimension_numbers = #tpu.dot_dimension_numbers<[1], [1], [0], [0], [0, 0, 1, 0], [], []>} : vector<19x8xf32>, vector<19x8xf32>, vector<19x19xf32> -> vector<19x19xf32>
    %431 = vector.broadcast %367 : vector<1x19xf32> to vector<19x19xf32>
    %432 = arith.addf %430, %431 : vector<19x19xf32>
    %cst_152 = arith.constant dense<0xFF800000> : vector<19xf32>
    %433 = vector.multi_reduction <maximumf>, %432, %cst_152 [1] : vector<19x19xf32> to vector<19xf32>
    %434 = vector.shape_cast %433 : vector<19xf32> to vector<19x1xf32>
    %435 = vector.broadcast %434 : vector<19x1xf32> to vector<19x19xf32>
    %436 = arith.subf %432, %435 : vector<19x19xf32>
    %437 = math.exp %436 : vector<19x19xf32>
    %cst_153 = arith.constant dense<0.000000e+00> : vector<19xf32>
    %438 = vector.multi_reduction <add>, %437, %cst_153 [1] : vector<19x19xf32> to vector<19xf32>
    %439 = vector.shape_cast %438 : vector<19xf32> to vector<19x1xf32>
    %440 = tpu.reciprocal %439 {approx = true} : vector<19x1xf32> -> vector<19x1xf32>
    %441 = vector.broadcast %440 : vector<19x1xf32> to vector<19x19xf32>
    %442 = arith.mulf %437, %441 : vector<19x19xf32>
    %cst_154 = arith.constant dense<0.000000e+00> : vector<19x8xf32>
    %443 = tpu.matmul %442, %429, %cst_154 {dimension_numbers = #tpu.dot_dimension_numbers<[1], [0], [0], [1], [0, 0, 1, 1], [], []>} : vector<19x19xf32>, vector<19x8xf32>, vector<19x8xf32> -> vector<19x8xf32>
    %444 = tpu.concatenate %386, %405, %424, %443 in 1 : vector<19x8xf32>, vector<19x8xf32>, vector<19x8xf32>, vector<19x8xf32> -> vector<19x32xf32>
    %445 = tpu.concatenate %366, %444 in 0 : vector<19x32xf32>, vector<19x32xf32> -> vector<38x32xf32>
    %c1_155 = arith.constant 1 : index
    %c0_156 = arith.constant 0 : index
    %c0_157 = arith.constant 0 : index
    %446 = vector.load %arg7[%c1_155, %c0_156, %c0_157] : memref<2x32x32xf32, #tpu.memory_space<vmem>>, vector<1x32x32xf32>
    %447 = vector.shape_cast %446 : vector<1x32x32xf32> to vector<32x32xf32>
    %cst_158 = arith.constant dense<0.000000e+00> : vector<38x32xf32>
    %448 = tpu.matmul %445, %447, %cst_158 {dimension_numbers = #tpu.dot_dimension_numbers<[1], [0], [0], [1], [0, 0, 1, 1], [], []>} : vector<38x32xf32>, vector<32x32xf32>, vector<38x32xf32> -> vector<38x32xf32>
    %449 = arith.addf %255, %448 : vector<38x32xf32>
    %c1_159 = arith.constant 1 : index
    %c0_160 = arith.constant 0 : index
    %c0_161 = arith.constant 0 : index
    %450 = vector.load %arg8[%c1_159, %c0_160, %c0_161] : memref<2x1x32xf32, #tpu.memory_space<vmem>>, vector<1x1x32xf32>
    %451 = vector.shape_cast %450 : vector<1x1x32xf32> to vector<1x32xf32>
    %452 = vector.broadcast %451 : vector<1x32xf32> to vector<38x32xf32>
    %453 = arith.addf %449, %452 : vector<38x32xf32>
    %c1_162 = arith.constant 1 : index
    %c0_163 = arith.constant 0 : index
    %c0_164 = arith.constant 0 : index
    %454 = vector.load %arg9[%c1_162, %c0_163, %c0_164] : memref<2x1x32xf32, #tpu.memory_space<vmem>>, vector<1x1x32xf32>
    %455 = vector.shape_cast %454 : vector<1x1x32xf32> to vector<1x32xf32>
    %c1_165 = arith.constant 1 : index
    %c0_166 = arith.constant 0 : index
    %c0_167 = arith.constant 0 : index
    %456 = vector.load %arg10[%c1_165, %c0_166, %c0_167] : memref<2x1x32xf32, #tpu.memory_space<vmem>>, vector<1x1x32xf32>
    %457 = vector.shape_cast %456 : vector<1x1x32xf32> to vector<1x32xf32>
    %cst_168 = arith.constant dense<0.000000e+00> : vector<38xf32>
    %458 = vector.multi_reduction <add>, %453, %cst_168 [1] : vector<38x32xf32> to vector<38xf32>
    %459 = vector.shape_cast %458 : vector<38xf32> to vector<38x1xf32>
    %cst_169 = arith.constant 3.200000e+01 : f32
    %460 = vector.broadcast %cst_169 : f32 to vector<38x1xf32>
    %461 = arith.divf %459, %460 : vector<38x1xf32>
    %462 = vector.broadcast %461 : vector<38x1xf32> to vector<38x32xf32>
    %463 = arith.subf %453, %462 : vector<38x32xf32>
    %464 = arith.mulf %463, %463 : vector<38x32xf32>
    %cst_170 = arith.constant dense<0.000000e+00> : vector<38xf32>
    %465 = vector.multi_reduction <add>, %464, %cst_170 [1] : vector<38x32xf32> to vector<38xf32>
    %466 = vector.shape_cast %465 : vector<38xf32> to vector<38x1xf32>
    %cst_171 = arith.constant 3.200000e+01 : f32
    %467 = vector.broadcast %cst_171 : f32 to vector<38x1xf32>
    %468 = arith.divf %466, %467 : vector<38x1xf32>
    %469 = vector.broadcast %461 : vector<38x1xf32> to vector<38x32xf32>
    %470 = arith.subf %453, %469 : vector<38x32xf32>
    %cst_172 = arith.constant 9.99999997E-7 : f32
    %471 = vector.broadcast %cst_172 : f32 to vector<38x1xf32>
    %472 = arith.addf %468, %471 : vector<38x1xf32>
    %473 = math.rsqrt %472 : vector<38x1xf32>
    %474 = vector.broadcast %473 : vector<38x1xf32> to vector<38x32xf32>
    %475 = arith.mulf %470, %474 : vector<38x32xf32>
    %476 = vector.broadcast %455 : vector<1x32xf32> to vector<38x32xf32>
    %477 = arith.mulf %475, %476 : vector<38x32xf32>
    %478 = vector.broadcast %457 : vector<1x32xf32> to vector<38x32xf32>
    %479 = arith.addf %477, %478 : vector<38x32xf32>
    %c1_173 = arith.constant 1 : index
    %c0_174 = arith.constant 0 : index
    %c0_175 = arith.constant 0 : index
    %480 = vector.load %arg11[%c1_173, %c0_174, %c0_175] : memref<2x32x128xf32, #tpu.memory_space<vmem>>, vector<1x32x128xf32>
    %481 = vector.shape_cast %480 : vector<1x32x128xf32> to vector<32x128xf32>
    %cst_176 = arith.constant dense<0.000000e+00> : vector<38x128xf32>
    %482 = tpu.matmul %479, %481, %cst_176 {dimension_numbers = #tpu.dot_dimension_numbers<[1], [0], [0], [1], [0, 0, 1, 1], [], []>} : vector<38x32xf32>, vector<32x128xf32>, vector<38x128xf32> -> vector<38x128xf32>
    %c1_177 = arith.constant 1 : index
    %c0_178 = arith.constant 0 : index
    %c0_179 = arith.constant 0 : index
    %483 = vector.load %arg12[%c1_177, %c0_178, %c0_179] : memref<2x1x128xf32, #tpu.memory_space<vmem>>, vector<1x1x128xf32>
    %484 = vector.shape_cast %483 : vector<1x1x128xf32> to vector<1x128xf32>
    %485 = vector.broadcast %484 : vector<1x128xf32> to vector<38x128xf32>
    %486 = arith.addf %482, %485 : vector<38x128xf32>
    %cst_180 = arith.constant 5.000000e-01 : f32
    %487 = vector.broadcast %cst_180 : f32 to vector<38x128xf32>
    %488 = arith.mulf %487, %486 : vector<38x128xf32>
    %cst_181 = arith.constant 4.471500e-02 : f32
    %489 = vector.broadcast %cst_181 : f32 to vector<38x128xf32>
    %490 = arith.mulf %489, %486 : vector<38x128xf32>
    %491 = arith.mulf %490, %486 : vector<38x128xf32>
    %492 = arith.mulf %491, %486 : vector<38x128xf32>
    %493 = arith.addf %486, %492 : vector<38x128xf32>
    %cst_182 = arith.constant 0.797884583 : f32
    %494 = vector.broadcast %cst_182 : f32 to vector<38x128xf32>
    %495 = arith.mulf %494, %493 : vector<38x128xf32>
    %496 = math.tanh %495 : vector<38x128xf32>
    %cst_183 = arith.constant 1.000000e+00 : f32
    %497 = vector.broadcast %cst_183 : f32 to vector<38x128xf32>
    %498 = arith.addf %497, %496 : vector<38x128xf32>
    %499 = arith.mulf %488, %498 : vector<38x128xf32>
    %c1_184 = arith.constant 1 : index
    %c0_185 = arith.constant 0 : index
    %c0_186 = arith.constant 0 : index
    %500 = vector.load %arg13[%c1_184, %c0_185, %c0_186] : memref<2x128x32xf32, #tpu.memory_space<vmem>>, vector<1x128x32xf32>
    %501 = vector.shape_cast %500 : vector<1x128x32xf32> to vector<128x32xf32>
    %cst_187 = arith.constant dense<0.000000e+00> : vector<38x32xf32>
    %502 = tpu.matmul %499, %501, %cst_187 {dimension_numbers = #tpu.dot_dimension_numbers<[1], [0], [0], [1], [0, 0, 1, 1], [], []>} : vector<38x128xf32>, vector<128x32xf32>, vector<38x32xf32> -> vector<38x32xf32>
    %c1_188 = arith.constant 1 : index
    %c0_189 = arith.constant 0 : index
    %c0_190 = arith.constant 0 : index
    %503 = vector.load %arg14[%c1_188, %c0_189, %c0_190] : memref<2x1x32xf32, #tpu.memory_space<vmem>>, vector<1x1x32xf32>
    %504 = vector.shape_cast %503 : vector<1x1x32xf32> to vector<1x32xf32>
    %505 = vector.broadcast %504 : vector<1x32xf32> to vector<38x32xf32>
    %506 = arith.addf %502, %505 : vector<38x32xf32>
    %507 = arith.addf %453, %506 : vector<38x32xf32>
    %508 = vector.extract_strided_slice %507 {offsets = [17, 0], sizes = [2, 32], strides = [1, 1]} : vector<38x32xf32> to vector<2x32xf32>
    %509 = vector.extract_strided_slice %507 {offsets = [36, 0], sizes = [2, 32], strides = [1, 1]} : vector<38x32xf32> to vector<2x32xf32>
    %510 = tpu.concatenate %508, %509 in 0 : vector<2x32xf32>, vector<2x32xf32> -> vector<4x32xf32>
    %c0_191 = arith.constant 0 : index
    %c0_192 = arith.constant 0 : index
    %511 = vector.load %arg15[%c0_191, %c0_192] : memref<1x32xf32, #tpu.memory_space<vmem>>, vector<1x32xf32>
    %c0_193 = arith.constant 0 : index
    %c0_194 = arith.constant 0 : index
    %512 = vector.load %arg16[%c0_193, %c0_194] : memref<1x32xf32, #tpu.memory_space<vmem>>, vector<1x32xf32>
    %cst_195 = arith.constant dense<0.000000e+00> : vector<4xf32>
    %513 = vector.multi_reduction <add>, %510, %cst_195 [1] : vector<4x32xf32> to vector<4xf32>
    %514 = vector.shape_cast %513 : vector<4xf32> to vector<4x1xf32>
    %cst_196 = arith.constant 3.200000e+01 : f32
    %515 = vector.broadcast %cst_196 : f32 to vector<4x1xf32>
    %516 = arith.divf %514, %515 : vector<4x1xf32>
    %517 = vector.broadcast %516 : vector<4x1xf32> to vector<4x32xf32>
    %518 = arith.subf %510, %517 : vector<4x32xf32>
    %519 = arith.mulf %518, %518 : vector<4x32xf32>
    %cst_197 = arith.constant dense<0.000000e+00> : vector<4xf32>
    %520 = vector.multi_reduction <add>, %519, %cst_197 [1] : vector<4x32xf32> to vector<4xf32>
    %521 = vector.shape_cast %520 : vector<4xf32> to vector<4x1xf32>
    %cst_198 = arith.constant 3.200000e+01 : f32
    %522 = vector.broadcast %cst_198 : f32 to vector<4x1xf32>
    %523 = arith.divf %521, %522 : vector<4x1xf32>
    %524 = vector.broadcast %516 : vector<4x1xf32> to vector<4x32xf32>
    %525 = arith.subf %510, %524 : vector<4x32xf32>
    %cst_199 = arith.constant 9.99999997E-7 : f32
    %526 = vector.broadcast %cst_199 : f32 to vector<4x1xf32>
    %527 = arith.addf %523, %526 : vector<4x1xf32>
    %528 = math.rsqrt %527 : vector<4x1xf32>
    %529 = vector.broadcast %528 : vector<4x1xf32> to vector<4x32xf32>
    %530 = arith.mulf %525, %529 : vector<4x32xf32>
    %531 = vector.broadcast %511 : vector<1x32xf32> to vector<4x32xf32>
    %532 = arith.mulf %530, %531 : vector<4x32xf32>
    %533 = vector.broadcast %512 : vector<1x32xf32> to vector<4x32xf32>
    %534 = arith.addf %532, %533 : vector<4x32xf32>
    %c0_200 = arith.constant 0 : index
    %c0_201 = arith.constant 0 : index
    %535 = vector.load %arg17[%c0_200, %c0_201] : memref<32x128xf32, #tpu.memory_space<vmem>>, vector<32x128xf32>
    %cst_202 = arith.constant dense<0.000000e+00> : vector<4x128xf32>
    %536 = tpu.matmul %534, %535, %cst_202 {dimension_numbers = #tpu.dot_dimension_numbers<[1], [0], [0], [1], [0, 0, 1, 1], [], []>} : vector<4x32xf32>, vector<32x128xf32>, vector<4x128xf32> -> vector<4x128xf32>
    %c0_203 = arith.constant 0 : index
    %c0_204 = arith.constant 0 : index
    %537 = vector.load %arg18[%c0_203, %c0_204] : memref<1x128xf32, #tpu.memory_space<vmem>>, vector<1x128xf32>
    %538 = vector.broadcast %537 : vector<1x128xf32> to vector<4x128xf32>
    %539 = arith.addf %536, %538 : vector<4x128xf32>
    %c0_205 = arith.constant 0 : index
    %c0_206 = arith.constant 0 : index
    %c0_207 = arith.constant 0 : index
    %540 = vector.load %arg19[%c0_205, %c0_206, %c0_207] : memref<1x4x128xf32, #tpu.memory_space<vmem>>, vector<1x4x128xf32>
    %541 = vector.shape_cast %540 : vector<1x4x128xf32> to vector<4x128xf32>
    %542 = vector.shape_cast %539 : vector<4x128xf32> to vector<1x4x128xf32>
    tpu.vector_store %arg19[%c0_205, %c0_206, %c0_207], %542 {strides = array<i32>} : memref<1x4x128xf32, #tpu.memory_space<vmem>>, vector<1x4x128xf32>,
    return
  }
  func.func @transform_0(%arg0: i32) -> (i32, i32, i32) {
    %c0_i32 = arith.constant 0 : i32
    %c0_i32_0 = arith.constant 0 : i32
    %c0_i32_1 = arith.constant 0 : i32
    return %arg0, %c0_i32, %c0_i32_0 : i32, i32, i32
  }
  func.func @transform_1(%arg0: i32) -> (i32, i32, i32) {
    %c0_i32 = arith.constant 0 : i32
    %c0_i32_0 = arith.constant 0 : i32
    %c0_i32_1 = arith.constant 0 : i32
    return %arg0, %c0_i32, %c0_i32_0 : i32, i32, i32
  }
  func.func @transform_2(%arg0: i32) -> (i32, i32, i32) {
    %c0_i32 = arith.constant 0 : i32
    %c0_i32_0 = arith.constant 0 : i32
    %c0_i32_1 = arith.constant 0 : i32
    %c0_i32_2 = arith.constant 0 : i32
    return %c0_i32, %c0_i32_0, %c0_i32_1 : i32, i32, i32
  }
  func.func @transform_3(%arg0: i32) -> (i32, i32, i32) {
    %c0_i32 = arith.constant 0 : i32
    %c0_i32_0 = arith.constant 0 : i32
    %c0_i32_1 = arith.constant 0 : i32
    %c0_i32_2 = arith.constant 0 : i32
    return %c0_i32, %c0_i32_0, %c0_i32_1 : i32, i32, i32
  }
  func.func @transform_4(%arg0: i32) -> (i32, i32, i32) {
    %c0_i32 = arith.constant 0 : i32
    %c0_i32_0 = arith.constant 0 : i32
    %c0_i32_1 = arith.constant 0 : i32
    %c0_i32_2 = arith.constant 0 : i32
    return %c0_i32, %c0_i32_0, %c0_i32_1 : i32, i32, i32
  }
  func.func @transform_5(%arg0: i32) -> (i32, i32, i32) {
    %c0_i32 = arith.constant 0 : i32
    %c0_i32_0 = arith.constant 0 : i32
    %c0_i32_1 = arith.constant 0 : i32
    %c0_i32_2 = arith.constant 0 : i32
    return %c0_i32, %c0_i32_0, %c0_i32_1 : i32, i32, i32
  }
  func.func @transform_6(%arg0: i32) -> (i32, i32, i32) {
    %c0_i32 = arith.constant 0 : i32
    %c0_i32_0 = arith.constant 0 : i32
    %c0_i32_1 = arith.constant 0 : i32
    %c0_i32_2 = arith.constant 0 : i32
    return %c0_i32, %c0_i32_0, %c0_i32_1 : i32, i32, i32
  }
  func.func @transform_7(%arg0: i32) -> (i32, i32, i32) {
    %c0_i32 = arith.constant 0 : i32
    %c0_i32_0 = arith.constant 0 : i32
    %c0_i32_1 = arith.constant 0 : i32
    %c0_i32_2 = arith.constant 0 : i32
    return %c0_i32, %c0_i32_0, %c0_i32_1 : i32, i32, i32
  }
  func.func @transform_8(%arg0: i32) -> (i32, i32, i32) {
    %c0_i32 = arith.constant 0 : i32
    %c0_i32_0 = arith.constant 0 : i32
    %c0_i32_1 = arith.constant 0 : i32
    %c0_i32_2 = arith.constant 0 : i32
    return %c0_i32, %c0_i32_0, %c0_i32_1 : i32, i32, i32
  }
  func.func @transform_9(%arg0: i32) -> (i32, i32, i32) {
    %c0_i32 = arith.constant 0 : i32
    %c0_i32_0 = arith.constant 0 : i32
    %c0_i32_1 = arith.constant 0 : i32
    %c0_i32_2 = arith.constant 0 : i32
    return %c0_i32, %c0_i32_0, %c0_i32_1 : i32, i32, i32
  }
  func.func @transform_10(%arg0: i32) -> (i32, i32, i32) {
    %c0_i32 = arith.constant 0 : i32
    %c0_i32_0 = arith.constant 0 : i32
    %c0_i32_1 = arith.constant 0 : i32
    %c0_i32_2 = arith.constant 0 : i32
    return %c0_i32, %c0_i32_0, %c0_i32_1 : i32, i32, i32
  }
  func.func @transform_11(%arg0: i32) -> (i32, i32, i32) {
    %c0_i32 = arith.constant 0 : i32
    %c0_i32_0 = arith.constant 0 : i32
    %c0_i32_1 = arith.constant 0 : i32
    %c0_i32_2 = arith.constant 0 : i32
    return %c0_i32, %c0_i32_0, %c0_i32_1 : i32, i32, i32
  }
  func.func @transform_12(%arg0: i32) -> (i32, i32, i32) {
    %c0_i32 = arith.constant 0 : i32
    %c0_i32_0 = arith.constant 0 : i32
    %c0_i32_1 = arith.constant 0 : i32
    %c0_i32_2 = arith.constant 0 : i32
    return %c0_i32, %c0_i32_0, %c0_i32_1 : i32, i32, i32
  }
  func.func @transform_13(%arg0: i32) -> (i32, i32, i32) {
    %c0_i32 = arith.constant 0 : i32
    %c0_i32_0 = arith.constant 0 : i32
    %c0_i32_1 = arith.constant 0 : i32
    %c0_i32_2 = arith.constant 0 : i32
    return %c0_i32, %c0_i32_0, %c0_i32_1 : i32, i32, i32
  }
  func.func @transform_14(%arg0: i32) -> (i32, i32) {
    %c0_i32 = arith.constant 0 : i32
    %c0_i32_0 = arith.constant 0 : i32
    %c0_i32_1 = arith.constant 0 : i32
    return %c0_i32, %c0_i32_0 : i32, i32
  }
  func.func @transform_15(%arg0: i32) -> (i32, i32) {
    %c0_i32 = arith.constant 0 : i32
    %c0_i32_0 = arith.constant 0 : i32
    %c0_i32_1 = arith.constant 0 : i32
    return %c0_i32, %c0_i32_0 : i32, i32
  }
  func.func @transform_16(%arg0: i32) -> (i32, i32) {
    %c0_i32 = arith.constant 0 : i32
    %c0_i32_0 = arith.constant 0 : i32
    %c0_i32_1 = arith.constant 0 : i32
    return %c0_i32, %c0_i32_0 : i32, i32
  }
  func.func @transform_17(%arg0: i32) -> (i32, i32) {
    %c0_i32 = arith.constant 0 : i32
    %c0_i32_0 = arith.constant 0 : i32
    %c0_i32_1 = arith.constant 0 : i32
    return %c0_i32, %c0_i32_0 : i32, i32
  }
  func.func @transform_18(%arg0: i32) -> (i32, i32, i32) {
    %c0_i32 = arith.constant 0 : i32
    %c0_i32_0 = arith.constant 0 : i32
    %c0_i32_1 = arith.constant 0 : i32
    return %arg0, %c0_i32, %c0_i32_0 : i32, i32, i32
  }
}

</mosaic_0001>

<bundles_post_ra>
// kernel: forward_logits.1
= control target key start
LH: loop header
LB: loop body
LE: loop exit
PB: predicated region body
PF: predicated region fallthrough
CT: control target
= control target key end

     0   :  { %s9644_s0 = inlined_call_operand.vmem [shape: f32[1,38,32], index: 0, kind: input, shape index: {}]   ;;  %s9645_s1 = inlined_call_operand.vmem [shape: f32[1,2,19], index: 1, kind: input, shape index: {}]   ;;  %s9646_s2 = inlined_call_operand.vmem [shape: f32[2,1,32], index: 2, kind: input, shape index: {}]   ;;  %s9647_s3 = inlined_call_operand.vmem [shape: f32[2,1,32], index: 3, kind: input, shape index: {}]   ;;  %s9648_s4 = inlined_call_operand.vmem [shape: f32[2,32,96], index: 4, kind: input, shape index: {}]   ;;  %s9649_s5 = inlined_call_operand.vmem [shape: f32[2,1,96], index: 5, kind: input, shape index: {}]   ;;  %s9650_s6 = inlined_call_operand.vmem [shape: f32[2,32,32], index: 6, kind: input, shape index: {}]   ;;  %s9651_s7 = inlined_call_operand.vmem [shape: f32[2,1,32], index: 7, kind: input, shape index: {}]   ;;  %s9652_s8 = inlined_call_operand.vmem [shape: f32[2,1,32], index: 8, kind: input, shape index: {}]   ;;  %s9653_s9 = inlined_call_operand.vmem [shape: f32[2,1,32], index: 9, kind: input, shape index: {}]   ;;  %s9654_s10 = inlined_call_operand.vmem [shape: f32[2,32,128], index: 10, kind: input, shape index: {}]   ;;  %s9655_s11 = inlined_call_operand.vmem [shape: f32[2,1,128], index: 11, kind: input, shape index: {}]   ;;  %s9656_s12 = inlined_call_operand.vmem [shape: f32[2,128,32], index: 12, kind: input, shape index: {}]   ;;  %s9657_s13 = inlined_call_operand.vmem [shape: f32[2,1,32], index: 13, kind: input, shape index: {}]   ;;  %s9658_s14 = inlined_call_operand.vmem [shape: f32[1,32], index: 14, kind: input, shape index: {}]   ;;  %s9659_s15 = inlined_call_operand.vmem [shape: f32[1,32], index: 15, kind: input, shape index: {}]   ;;  %s9660_s16 = inlined_call_operand.vmem [shape: f32[32,128], index: 16, kind: input, shape index: {}]   ;;  %s9661_s17 = inlined_call_operand.vmem [shape: f32[1,128], index: 17, kind: input, shape index: {}]   ;;  %s9662_s18 = inlined_call_operand.hbm [shape: f32[1,4,128], index: 18, kind: output, shape index: {}]  }
   0x1   :  { %9683 = sst [smem:[#allocation5_spill]] %s9644_s0 }
   0x2   :  { %9684 = sst [smem:[#allocation6_spill]] %s9645_s1 }
   0x3   :  { %9685 = sst [smem:[#allocation7_spill]] %s9646_s2 }
   0x4   :  { %s9686_s29 = sld [smem:[#allocation5_spill]]  ;;  %vm68_vm0 = vcmask 261120  }
   0xa   :  { %v60_v0 = vld [vmem:[%s9686_s29] sm:$0xff]  ;;  %v62_v1 = vld [vmem:[%s9686_s29 + $0x10] sm:$0xff]  ;;  %v61_v2 = vld [vmem:[%s9686_s29 + $0x8] sm:$0xff] }
   0xb   :  { %v69_v3 = vsel %vm68_vm0, %v60_v0, 0.0  ;;  %v75_v4 = vsel %vm68_vm0, %v62_v1, 0.0  ;;  %v63_v5 = vld [vmem:[%s9686_s29 + $0x18] sm:$0xff] }
   0xc   :  { %70 = vadd.xlane.f32.xlu0 %v69_v3  ;;  %76 = vadd.xlane.f32.xlu1 %v75_v4 }
   0xd   :  { %23 = vsyncpa [#allocation3], 0  ;;  %v72_v6 = vsel %vm68_vm0, %v61_v2, 0.0  ;;  %v78_v7 = vsel %vm68_vm0, %v63_v5, 0.0  ;;  %v64_v8 = vld [vmem:[%s9686_s29 + $0x20] sm:$0x3f] }
   0xe   :  { %vm81_vm1 = vcmask 259072   ;;  %v158_v35 = vld [vmem:[%s9648_s4] sm:$0xff]  ;;  %v159_v36 = vld [vmem:[%s9648_s4 + $0x8] sm:$0xff]  ;;  %v160_v38 = vld [vmem:[%s9648_s4 + $0x10] sm:$0xff]  ;;  %v7548_v40 = vmov 0.0|0.0   ;;  %vm7549_vm2 = vmmov 0  }
   0xf   :  { %v82_v9 = vsel %vm81_vm1, %v64_v8, 0.0  ;;  %v6886_v37 = vpack.c.bf16 %v159_v36, %v158_v35  ;;  %v161_v39 = vld [vmem:[%s9648_s4 + $0x18] sm:$0xff]  ;;  %6885 = vmatprep.subr.bf16.mxu0 %v7548_v40  ;;  %v7550_v41 = vmov 0.0   ;;  %6895 = vmatprep.subr.bf16.mxu1 %v7548_v40  ;;  %s9687_s20 = sld [smem:[#allocation7_spill]]  ;;  %v5624_v61 = vld [vmem:[%s9647_s3] ss:$0 sm:$0xff] }
  0x10   :  { %73 = vadd.xlane.f32.xlu0 %v72_v6  ;;  %79 = vadd.xlane.f32.xlu1 %v78_v7  ;;  %v6889_v42 = vpack.c.bf16 %v161_v39, %v160_v38  ;;  %s7551_s24 = smov 96   ;;  %s7552_s25 = smov 80   ;;  %vm1284_vm3 = vcmask 1044480   ;;  %vm290_vm4 = vcmask 64512   ;;  %vm438_vm6 = vcmask 1042432  }
  0x11   :  { %6170 = vmatprep.mubr.msk.f32.mxu0 %vm7549_vm2, %v7550_v41  ;;  %6887 = vmatpush3.bf16.msra.mxu0 %v6886_v37  ;;  %s7553_s26 = smov 88   ;;  %s7554_s27 = smov 120   ;;  %vm7870_vm5 = vmpackc.low %vm290_vm4, %vm290_vm4  ;;  %vm386_vm7 = vcmask 154624   ;;  %vm393_vm8 = vcmask 149504   ;;  %vm1268_vm9 = vcmask 130048   ;;  %vm1272_vm10 = vcmask 195584  }
  0x12   :  { %6888 = vmatprep.subr.bf16.mxu0 %v7548_v40  ;;  %6206 = vmatprep.mubr.msk.f32.mxu1 %vm7549_vm2, %v7550_v41  ;;  %s9675_s28 = smov 112   ;;  %s7556_s30 = smov 72   ;;  %vm5492_vm11 = vcmask 1041408   ;;  %vm5496_vm12 = vcmask 257024  }
  0x13   :  { %s9665_s0 = smov 104   ;;  %s9673_s19 = smov 64  }
  0x14   :  { %83 = vadd.xlane.f32.xlu0 %v82_v9  ;;  %s9671_s1 = smov 56   ;;  %s9669_s21 = smov 48  }
  0x15   :  { %6890 = vmatpush3.bf16.msra.mxu0 %v6889_v42  ;;  %v5623_v59 = vld [vmem:[%s9687_s20] ss:$0 sm:$0xff]  ;;  %s9667_s22 = smov 40   ;;  %s9698_s2 = smov 16  }
  0x16   :  { %6891 = vmatprep.subr.bf16.mxu0 %v7548_v40 }
  0x99   :  { %v71_v10 = vpop.xlane.xlu0 %70  ;;  %v77_v11 = vpop.xlane.xlu1 %76 }
  0x9a   :  { %v86_v12 = vmul.f32 0.03125, %v71_v10  ;;  %v88_v13 = vmul.f32 0.03125, %v77_v11 }
  0x9c   :  { %v7681_v14 = vsub.f32 %v60_v0, %v86_v12  ;;  %v7683_v15 = vsub.f32 %v62_v1, %v88_v13 }
  0x9d   :  { %v74_v16 = vpop.xlane.xlu0 %73  ;;  %v80_v17 = vpop.xlane.xlu1 %79 }
  0x9e   :  { %v87_v18 = vmul.f32 0.03125, %v74_v16  ;;  %v89_v19 = vmul.f32 0.03125, %v80_v17  ;;  %v96_v20 = vmul.f32 %v7681_v14, %v7681_v14  ;;  %v98_v21 = vmul.f32 %v7683_v15, %v7683_v15 }
  0xa0   :  { %v7689_v22 = vsub.f32 %v61_v2, %v87_v18  ;;  %v7691_v23 = vsub.f32 %v63_v5, %v89_v19  ;;  %v101_v24 = vsel %vm68_vm0, %v96_v20, 0.0  ;;  %v107_v27 = vsel %vm68_vm0, %v98_v21, 0.0  ;;  %v5625_v18 = vld [vmem:[%s9649_s5] ss:$0 sm:$0xff] }
  0xa1   :  { %102 = vadd.xlane.f32.xlu1 %v101_v24  ;;  %v84_v25 = vpop.xlane.xlu0 %83 }
  0xa2   :  { %v90_v26 = vmul.f32 0.03125, %v84_v25  ;;  %v97_v28 = vmul.f32 %v7689_v22, %v7689_v22  ;;  %v99_v29 = vmul.f32 %v7691_v23, %v7691_v23 }
  0xa4   :  { %v7699_v30 = vsub.f32 %v64_v8, %v90_v26  ;;  %v104_v31 = vsel %vm68_vm0, %v97_v28, 0.0  ;;  %v110_v32 = vsel %vm68_vm0, %v99_v29, 0.0 }
  0xa5   :  { %108 = vadd.xlane.f32.xlu1 %v107_v27  ;;  %105 = vadd.xlane.f32.xlu0 %v104_v31 }
  0xa6   :  { %v100_v33 = vmul.f32 %v7699_v30, %v7699_v30 }
  0xa8   :  { %v113_v34 = vsel %vm81_vm1, %v100_v33, 0.0 }
  0xa9   :  { %111 = vadd.xlane.f32.xlu0 %v110_v32  ;;  %114 = vadd.xlane.f32.xlu1 %v113_v34 }
 0x12e   :  { %v103_v43 = vpop.xlane.xlu1 %102 }
 0x12f   :  { %v116_v44 = vmul.f32 0.03125, %v103_v43 }
 0x131   :  { %v121_v45 = vadd.f32 1e-06, %v116_v44 }
 0x132   :  { %v109_v46 = vpop.xlane.xlu1 %108  ;;  %v106_v47 = vpop.xlane.xlu0 %105 }
 0x133   :  { %7265 = vrsqrt.f32 %v121_v45  ;;  %v118_v48 = vmul.f32 0.03125, %v109_v46  ;;  %v117_v49 = vmul.f32 0.03125, %v106_v47 }
 0x135   :  { %v123_v50 = vadd.f32 1e-06, %v118_v48  ;;  %v122_v51 = vadd.f32 1e-06, %v117_v49 }
 0x136   :  { %v115_v52 = vpop.xlane.xlu1 %114  ;;  %v112_v53 = vpop.xlane.xlu0 %111 }
 0x137   :  { %7267 = vrsqrt.f32 %v123_v50  ;;  %v120_v54 = vmul.f32 0.03125, %v115_v52  ;;  %v119_v55 = vmul.f32 0.03125, %v112_v53 }
 0x138   :  { %7269 = vrsqrt.f32 %v122_v51 }
 0x139   :  { %v124_v56 = vadd.f32 1e-06, %v119_v55  ;;  %v125_v57 = vadd.f32 1e-06, %v120_v54 }
 0x13b   :  { %7271 = vrsqrt.f32 %v124_v56 }
 0x13c   :  { %7273 = vrsqrt.f32 %v125_v57 }
 0x13d   :  { %v7266_v58 = vpop.eup %7265 }
 0x13e   :  { %v131_v60 = vmul.f32 %v7266_v58, %v7681_v14 }
 0x140   :  { %v142_v62 = vmul.f32 %v5623_v59, %v131_v60 }
 0x141   :  { %v7268_v63 = vpop.eup %7267 }
 0x142   :  { %v7270_v0 = vpop.eup %7269  ;;  %v153_v1 = vadd.f32 %v5624_v61, %v142_v62  ;;  %v133_v3 = vmul.f32 %v7268_v63, %v7683_v15 }
 0x143   :  { %v132_v2 = vmul.f32 %v7270_v0, %v7689_v22 }
 0x144   :  { %6171 = vmatmul.mubr.msk.f32.vlgmr.msra.gmra.mrb[0].mxu0 %vm68_vm0, %v153_v1  ;;  %v144_v7 = vmul.f32 %v5623_v59, %v133_v3 }
 0x145   :  { %6173 = vmatprep.mubr.msk.f32.mxu0 %vm7549_vm2, %v7550_v41  ;;  %v143_v4 = vmul.f32 %v5623_v59, %v132_v2  ;;  %v7272_v5 = vpop.eup %7271 }
 0x146   :  { %v134_v8 = vmul.f32 %v7272_v5, %v7691_v23  ;;  %v7274_v9 = vpop.eup %7273  ;;  %v155_v10 = vadd.f32 %v5624_v61, %v144_v7 }
 0x147   :  { %v154_v6 = vadd.f32 %v5624_v61, %v143_v4  ;;  %v135_v12 = vmul.f32 %v7274_v9, %v7699_v30 }
 0x148   :  { %v145_v11 = vmul.f32 %v5623_v59, %v134_v8 }
 0x149   :  { %6174 = vmatmul.mubr.msk.f32.gmra.mrb[2].mxu0 %vm68_vm0, %v154_v6  ;;  %v146_v14 = vmul.f32 %v5623_v59, %v135_v12 }
 0x14a   :  { %6176 = vmatprep.mubr.msk.f32.mxu0 %vm7549_vm2, %v7550_v41  ;;  %v156_v13 = vadd.f32 %v5624_v61, %v145_v11 }
 0x14b   :  { %v157_v15 = vadd.f32 %v5624_v61, %v146_v14 }
 0x14d   :  { %6177 = vmatmul.mubr.msk.f32.gmra.mrb[4].mxu0 %vm68_vm0, %v155_v10 }
 0x14e   :  { %6179 = vmatprep.mubr.msk.f32.mxu0 %vm7549_vm2, %v7550_v41 }
 0x151   :  { %6180 = vmatmul.mubr.msk.f32.gmra.mrb[6].mxu0 %vm68_vm0, %v156_v13 }
 0x152   :  { %6182 = vmatprep.mubr.msk.f32.mxu0 %vm7549_vm2, %v7550_v41 }
 0x155   :  { %6183 = vmatmul.mubr.msk.f32.gmra.mrb[8].mxu0 %vm68_vm0, %v157_v15 }
 0x156   :  { %6191 = vmatprep.mubr.msk.f32.mxu0 %vm7549_vm2, %v7550_v41 }
 0x217   :  { %v250_v16 = vpop.f32.mrb[0].mxu0 }
 0x218   :  { %v6172_v17 = vpop.f32.mrb[1].mxu0  ;;  %v251_v20 = vadd.f32 %v5625_v18, %v250_v16 }
 0x21a   :  { %v7778_v37 = vmul.f32 0.35355338, %v251_v20 }
 0x21c   :  { %v255_v19 = vpop.f32.mrb[2].mxu0 }
 0x21d   :  { %v256_v21 = vadd.f32 %v5625_v18, %v255_v19  ;;  %v6175_v22 = vpop.f32.mrb[3].mxu0 }
 0x21f   :  { %v7755_v23 = vpack.i.bf16 %v256_v21, %v251_v20  ;;  %v7767_v30 = vmul.f32 0.35355338, %v256_v21 }
 0x220   :  { %v260_v24 = vpop.f32.mrb[4].mxu0 }
 0x221   :  { %v7757_v25 = vadd.f32 %v5625_v18, %v260_v24  ;;  %7106 = vrot.lane.b32.xlu0 %v7755_v23, %s7551_s24  ;;  %v6178_v26 = vpop.f32.mrb[5].mxu0 }
 0x223   :  { %288 = vrot.lane.b32.xlu1 %v7757_v25, %s7551_s24  ;;  %v1292_v36 = vrot.slane %v7757_v25, 3  ;;  %v7790_v43 = vmul.f32 0.35355338, %v7757_v25 }
 0x224   :  { %v265_v27 = vpop.f32.mrb[6].mxu0 }
 0x225   :  { %7116 = vrot.lane.b32.xlu0 %v7755_v23, %s7552_s25  ;;  %v6181_v28 = vpop.f32.mrb[7].mxu0  ;;  %v266_v29 = vadd.f32 %v5625_v18, %v265_v27  ;;  %v1285_v46 = vrot.slane %v7790_v43, 3 }
 0x227   :  { %7111 = vrot.lane.b32.xlu1 %v7755_v23, %s7553_s26  ;;  %v1293_v34 = vrot.slane %v266_v29, 3  ;;  %v1276_v44 = vmul.f32 0.35355338, %v266_v29 }
 0x228   :  { %v270_v31 = vpop.f32.mrb[8].mxu0 }
 0x229   :  { %v271_v32 = vadd.f32 %v5625_v18, %v270_v31  ;;  %523 = vrot.lane.b32.xlu0 %v7767_v30, %s7554_s27  ;;  %v6184_v33 = vpop.f32.mrb[9].mxu0  ;;  %v1294_v39 = vsel %vm1284_vm3, %v1292_v36, %v1293_v34  ;;  %v1286_v45 = vrot.slane %v1276_v44, 3 }
 0x22b   :  { %v7771_v35 = vrot.slane %v271_v32, 3  ;;  %531 = vrot.lane.b32.xlu1 %v7757_v25, %s7553_s26  ;;  %v1277_v47 = vmul.f32 0.35355338, %v271_v32  ;;  %v7816_v48 = vsel %vm1284_vm3, %v1285_v46, %v1286_v45 }
 0x22d   :  { %767 = vrot.lane.b32.xlu0 %v7757_v25, %s7552_s25  ;;  %v1296_v38 = vsel %vm1284_vm3, %v1293_v34, %v7771_v35  ;;  %v7820_v49 = vrot.slane %v1277_v47, 3 }
 0x22e   :  { %v7785_v42 = vpack.i.bf16 %v1296_v38, %v1294_v39 }
 0x22f   :  { %521 = vrot.lane.b32.xlu1 %v7778_v37, %s7554_s27  ;;  %v7832_v50 = vsel %vm1284_vm3, %v1286_v45, %v7820_v49 }
 0x231   :  { %757 = vrot.lane.b32.xlu0 %v7778_v37, %s9675_s28 }
 0x233   :  { %525 = vrot.lane.b32.xlu1 %v7790_v43, %s7554_s27 }
 0x235   :  { %761 = vrot.lane.b32.xlu0 %v7790_v43, %s9675_s28 }
 0x237   :  { %7121 = vrot.lane.b32.xlu1 %v7755_v23, %s7556_s30 }
 0x239   :  { %7126 = vrot.lane.b32.xlu0 %v7785_v42, %s7551_s24 }
 0x23b   :  { %759 = vrot.lane.b32.xlu1 %v7767_v30, %s9675_s28 }
 0x23d   :  { %995 = vrot.lane.b32.xlu0 %v7767_v30, %s9665_s0 }
 0x23f   :  { %1003 = vrot.lane.b32.xlu1 %v7757_v25, %s7556_s30 }
 0x241   :  { %1301 = vrot.lane.b32.xlu0 %v7771_v35, %s7551_s24 }
 0x243   :  { %993 = vrot.lane.b32.xlu1 %v7778_v37, %s9665_s0 }
 0x245   :  { %1537 = vrot.lane.b32.xlu0 %v7771_v35, %s7553_s26 }
 0x247   :  { %997 = vrot.lane.b32.xlu1 %v7790_v43, %s9665_s0 }
 0x249   :  { %1527 = vrot.lane.b32.xlu0 %v7816_v48, %s7554_s27 }
 0x24b   :  { %7131 = vrot.lane.b32.xlu1 %v7785_v42, %s7553_s26 }
 0x24d   :  { %1531 = vrot.lane.b32.xlu0 %v7820_v49, %s7554_s27 }
 0x24f   :  { %7136 = vrot.lane.b32.xlu1 %v7785_v42, %s7552_s25 }
 0x251   :  { %7141 = vrot.lane.b32.xlu0 %v7785_v42, %s7556_s30 }
 0x253   :  { %1529 = vrot.lane.b32.xlu1 %v7832_v50, %s7554_s27 }
 0x255   :  { %1765 = vrot.lane.b32.xlu0 %v7832_v50, %s9675_s28 }
 0x257   :  { %1773 = vrot.lane.b32.xlu1 %v7771_v35, %s7552_s25 }
 0x259   :  { %2009 = vrot.lane.b32.xlu0 %v7771_v35, %s7556_s30 }
 0x25b   :  { %1763 = vrot.lane.b32.xlu1 %v7816_v48, %s9675_s28 }
 0x25d   :  { %2001 = vrot.lane.b32.xlu0 %v7832_v50, %s9665_s0 }
 0x25f   :  { %1767 = vrot.lane.b32.xlu1 %v7820_v49, %s9675_s28 }
 0x261   :  { %425 = vrot.lane.b32.xlu0 %v7757_v25, %s9673_s19 }
 0x263   :  { %1999 = vrot.lane.b32.xlu1 %v7816_v48, %s9665_s0 }
 0x265   :  { %662 = vrot.lane.b32.xlu0 %v7757_v25, %s9671_s1 }
 0x267   :  { %2003 = vrot.lane.b32.xlu1 %v7820_v49, %s9665_s0  ;;  %s9690_s0 = sld [smem:[#allocation6_spill]] }
 0x269   :  { %7156 = vrot.lane.b32.xlu0 %v7755_v23, %s9669_s21 }
 0x26b   :  { %7146 = vrot.lane.b32.xlu1 %v7755_v23, %s9673_s19 }
 0x26d   :  { %1134 = vrot.lane.b32.xlu0 %v7757_v25, %s9667_s22 }
 0x26f   :  { %7151 = vrot.lane.b32.xlu1 %v7755_v23, %s9671_s1 }
 0x273   :  { %898 = vrot.lane.b32.xlu1 %v7757_v25, %s9669_s21 }
 0x277   :  { %7161 = vrot.lane.b32.xlu1 %v7755_v23, %s9667_s22 }
 0x293   :  { %v7107_v51 = vpop.permute.xlu0 %7106 }
 0x294   :  { %v7109_v52 = vunpack.i.h.bf16 %v7107_v51  ;;  %v7108_v53 = vunpack.i.l.bf16 %v7107_v51 }
 0x295   :  { %v289_v54 = vpop.permute.xlu1 %288 }
 0x296   :  { %v6892_v56 = vpack.c.bf16 %v7109_v52, %v7108_v53 }
 0x297   :  { %v7117_v57 = vpop.permute.xlu0 %7116 }
 0x298   :  { %6894 = vmatpush3.bf16.xpose.msk.msra.mxu0 %vm7870_vm5, %v6892_v56  ;;  %v7119_v6 = vunpack.i.h.bf16 %v7117_v57  ;;  %v7118_v7 = vunpack.i.l.bf16 %v7117_v57  ;;  %v277_v56 = vlaneseq }
 0x299   :  { %v7112_v58 = vpop.permute.xlu1 %7111  ;;  %6189 = vmatprep.subr.mxu0 %v7550_v41 }
 0x29a   :  { %v7114_v61 = vunpack.i.h.bf16 %v7112_v58  ;;  %v7113_v62 = vunpack.i.l.bf16 %v7112_v58  ;;  %v6906_v10 = vpack.c.bf16 %v7119_v6, %v7118_v7  ;;  %v7995_v57 = vshrl.u32 %v277_v56, 7 }
 0x29b   :  { %v524_v59 = vpop.permute.xlu0 %523 }
 0x29c   :  { %v6899_v1 = vpack.c.bf16 %v7114_v61, %v7113_v62  ;;  %v279_v58 = vsub.s32 0, %v7995_v57 }
 0x29d   :  { %v532_v60 = vpop.permute.xlu1 %531 }
 0x29f   :  { %v768_v63 = vpop.permute.xlu0 %767 }
 0x2a0   :  { %6190 = vmatpush3.xpose.msk.msra.mxu0 %vm290_vm4, %v289_v54 }
 0x2a1   :  { %v522_v0 = vpop.permute.xlu1 %521  ;;  %6898 = vmatprep.subr.bf16.mxu0 %v7548_v40 }
 0x2a3   :  { %v758_v2 = vpop.permute.xlu0 %757  ;;  %6192 = vmatmul.mubr.msk.f32.vlgmr.msra.gmra.mrb[10].mxu0 %vm290_vm4, %v7778_v37 }
 0x2a4   :  { %6901 = vmatpush3.bf16.xpose.msk.msra.mxu0 %vm7870_vm5, %v6899_v1  ;;  %6194 = vmatprep.mubr.msk.f32.mxu0 %vm7549_vm2, %v7550_v41 }
 0x2a5   :  { %v526_v3 = vpop.permute.xlu1 %525  ;;  %6219 = vmatprep.subr.mxu0 %v7550_v41 }
 0x2a7   :  { %v762_v4 = vpop.permute.xlu0 %761  ;;  %6195 = vmatmul.mubr.msk.f32.gmra.mrb[12].mxu0 %vm290_vm4, %v7767_v30 }
 0x2a8   :  { %6197 = vmatprep.mubr.msk.f32.mxu0 %vm7549_vm2, %v7550_v41 }
 0x2a9   :  { %v7122_v5 = vpop.permute.xlu1 %7121 }
 0x2aa   :  { %v7124_v15 = vunpack.i.h.bf16 %v7122_v5  ;;  %v7123_v16 = vunpack.i.l.bf16 %v7122_v5 }
 0x2ab   :  { %v7127_v8 = vpop.permute.xlu0 %7126  ;;  %6198 = vmatmul.mubr.msk.f32.gmra.mrb[14].mxu0 %vm290_vm4, %v7790_v43 }
 0x2ac   :  { %6220 = vmatpush3.xpose.msk.msra.mxu0 %vm290_vm4, %v532_v60  ;;  %6221 = vmatprep.mubr.msk.f32.mxu0 %vm7549_vm2, %v7550_v41  ;;  %v6913_v18 = vpack.c.bf16 %v7124_v15, %v7123_v16  ;;  %v7129_v23 = vunpack.i.h.bf16 %v7127_v8  ;;  %v7128_v24 = vunpack.i.l.bf16 %v7127_v8 }
 0x2ad   :  { %v760_v9 = vpop.permute.xlu1 %759  ;;  %6905 = vmatprep.subr.bf16.mxu0 %v7548_v40 }
 0x2ae   :  { %v6920_v26 = vpack.c.bf16 %v7129_v23, %v7128_v24 }
 0x2af   :  { %v996_v11 = vpop.permute.xlu0 %995  ;;  %6222 = vmatmul.mubr.msk.f32.vlgmr.msra.gmra.mrb[16].mxu0 %vm290_vm4, %v522_v0 }
 0x2b0   :  { %6908 = vmatpush3.bf16.xpose.msk.msra.mxu0 %vm7870_vm5, %v6906_v10  ;;  %6224 = vmatprep.mubr.msk.f32.mxu0 %vm7549_vm2, %v7550_v41 }
 0x2b1   :  { %v1004_v12 = vpop.permute.xlu1 %1003  ;;  %6249 = vmatprep.subr.mxu0 %v7550_v41 }
 0x2b3   :  { %6225 = vmatmul.mubr.msk.f32.gmra.mrb[18].mxu0 %vm290_vm4, %v524_v59  ;;  %v1302_v13 = vpop.permute.xlu0 %1301  ;;  %v8001_v59 = vld [vmem:[%s9690_s0] sm:$0x3]  ;;  %s9681_s0 = smov 8  }
 0x2b4   :  { %6227 = vmatprep.mubr.msk.f32.mxu0 %vm7549_vm2, %v7550_v41  ;;  %v8004_v60 = vrot.slane %v8001_v59, %v279_v58 }
 0x2b5   :  { %v994_v14 = vpop.permute.xlu1 %993 }
 0x2b7   :  { %6228 = vmatmul.mubr.msk.f32.gmra.mrb[20].mxu0 %vm290_vm4, %v526_v3  ;;  %v1538_v19 = vpop.permute.xlu0 %1537 }
 0x2b8   :  { %6250 = vmatpush3.xpose.msk.msra.mxu0 %vm290_vm4, %v768_v63  ;;  %6251 = vmatprep.mubr.msk.f32.mxu0 %vm7549_vm2, %v7550_v41 }
 0x2b9   :  { %v998_v17 = vpop.permute.xlu1 %997  ;;  %6912 = vmatprep.subr.bf16.mxu0 %v7548_v40 }
 0x2bb   :  { %6252 = vmatmul.mubr.msk.f32.vlgmr.msra.gmra.mrb[22].mxu0 %vm290_vm4, %v758_v2  ;;  %v1528_v21 = vpop.permute.xlu0 %1527 }
 0x2bc   :  { %6915 = vmatpush3.bf16.xpose.msk.msra.mxu0 %vm7870_vm5, %v6913_v18  ;;  %6254 = vmatprep.mubr.msk.f32.mxu0 %vm7549_vm2, %v7550_v41 }
 0x2bd   :  { %v7132_v20 = vpop.permute.xlu1 %7131  ;;  %6279 = vmatprep.subr.mxu0 %v7550_v41 }
 0x2be   :  { %v7134_v31 = vunpack.i.h.bf16 %v7132_v20  ;;  %v7133_v32 = vunpack.i.l.bf16 %v7132_v20 }
 0x2bf   :  { %6255 = vmatmul.mubr.msk.f32.gmra.mrb[24].mxu0 %vm290_vm4, %v760_v9  ;;  %v1532_v27 = vpop.permute.xlu0 %1531 }
 0x2c0   :  { %6257 = vmatprep.mubr.msk.f32.mxu0 %vm7549_vm2, %v7550_v41  ;;  %v6927_v34 = vpack.c.bf16 %v7134_v31, %v7133_v32 }
 0x2c1   :  { %v7137_v22 = vpop.permute.xlu1 %7136 }
 0x2c2   :  { %v7139_v43 = vunpack.i.h.bf16 %v7137_v22  ;;  %v7138_v44 = vunpack.i.l.bf16 %v7137_v22 }
 0x2c3   :  { %6258 = vmatmul.mubr.msk.f32.gmra.mrb[26].mxu0 %vm290_vm4, %v762_v4  ;;  %v7142_v29 = vpop.permute.xlu0 %7141 }
 0x2c4   :  { %6280 = vmatpush3.xpose.msk.msra.mxu0 %vm290_vm4, %v1004_v12  ;;  %6281 = vmatprep.mubr.msk.f32.mxu0 %vm7549_vm2, %v7550_v41  ;;  %v6934_v46 = vpack.c.bf16 %v7139_v43, %v7138_v44  ;;  %v7144_v52 = vunpack.i.h.bf16 %v7142_v29  ;;  %v7143_v53 = vunpack.i.l.bf16 %v7142_v29 }
 0x2c5   :  { %v1530_v25 = vpop.permute.xlu1 %1529  ;;  %6919 = vmatprep.subr.bf16.mxu0 %v7548_v40 }
 0x2c6   :  { %v6941_v54 = vpack.c.bf16 %v7144_v52, %v7143_v53 }
 0x2c7   :  { %6282 = vmatmul.mubr.msk.f32.vlgmr.msra.gmra.mrb[28].mxu0 %vm290_vm4, %v994_v14  ;;  %v1766_v36 = vpop.permute.xlu0 %1765 }
 0x2c8   :  { %6922 = vmatpush3.bf16.xpose.msk.msra.mxu0 %vm7870_vm5, %v6920_v26  ;;  %6284 = vmatprep.mubr.msk.f32.mxu0 %vm7549_vm2, %v7550_v41 }
 0x2c9   :  { %v1774_v28 = vpop.permute.xlu1 %1773  ;;  %6309 = vmatprep.subr.mxu0 %v7550_v41 }
 0x2cb   :  { %6285 = vmatmul.mubr.msk.f32.gmra.mrb[30].mxu0 %vm290_vm4, %v996_v11  ;;  %v2010_v38 = vpop.permute.xlu0 %2009 }
 0x2cc   :  { %6287 = vmatprep.mubr.msk.f32.mxu0 %vm7549_vm2, %v7550_v41 }
 0x2cd   :  { %v1764_v30 = vpop.permute.xlu1 %1763 }
 0x2cf   :  { %6288 = vmatmul.mubr.msk.f32.gmra.mrb[32].mxu0 %vm290_vm4, %v998_v17 }
 0x2d0   :  { %6310 = vmatpush3.xpose.msk.msra.mxu0 %vm290_vm4, %v1302_v13  ;;  %6311 = vmatprep.mubr.msk.f32.mxu0 %vm7549_vm2, %v7550_v41 }
 0x2d1   :  { %v1768_v33 = vpop.permute.xlu1 %1767  ;;  %6926 = vmatprep.subr.bf16.mxu0 %v7548_v40 }
 0x2d3   :  { %6312 = vmatmul.mubr.msk.f32.vlgmr.msra.gmra.mrb[34].mxu0 %vm290_vm4, %v7816_v48 }
 0x2d4   :  { %6929 = vmatpush3.bf16.xpose.msk.msra.mxu0 %vm7870_vm5, %v6927_v34  ;;  %6314 = vmatprep.mubr.msk.f32.mxu0 %vm7549_vm2, %v7550_v41 }
 0x2d5   :  { %v2000_v37 = vpop.permute.xlu1 %1999  ;;  %6339 = vmatprep.subr.mxu0 %v7550_v41 }
 0x2d7   :  { %6315 = vmatmul.mubr.msk.f32.gmra.mrb[36].mxu0 %vm290_vm4, %v7832_v50  ;;  %v2002_v50 = vpop.permute.xlu0 %2001 }
 0x2d8   :  { %6317 = vmatprep.mubr.msk.f32.mxu0 %vm7549_vm2, %v7550_v41 }
 0x2d9   :  { %v2004_v39 = vpop.permute.xlu1 %2003 }
 0x2db   :  { %6318 = vmatmul.mubr.msk.f32.gmra.mrb[38].mxu0 %vm290_vm4, %v7820_v49  ;;  %v426_v49 = vpop.permute.xlu0 %425 }
 0x2dc   :  { %6340 = vmatpush3.xpose.msk.msra.mxu0 %vm290_vm4, %v1538_v19  ;;  %6341 = vmatprep.mubr.msk.f32.mxu0 %vm7549_vm2, %v7550_v41 }
 0x2dd   :  { %v7147_v45 = vpop.permute.xlu1 %7146  ;;  %6933 = vmatprep.subr.bf16.mxu0 %v7548_v40 }
 0x2de   :  { %v7149_v47 = vunpack.i.h.bf16 %v7147_v45  ;;  %v7148_v48 = vunpack.i.l.bf16 %v7147_v45 }
 0x2df   :  { %6342 = vmatmul.mubr.msk.f32.vlgmr.msra.gmra.mrb[40].mxu0 %vm290_vm4, %v1528_v21 }
 0x2e0   :  { %6936 = vmatpush3.bf16.xpose.msk.msra.mxu0 %vm7870_vm5, %v6934_v46  ;;  %v6896_v51 = vpack.c.bf16 %v7149_v47, %v7148_v48  ;;  %6344 = vmatprep.mubr.msk.f32.mxu0 %vm7549_vm2, %v7550_v41 }
 0x2e1   :  { %6369 = vmatprep.subr.mxu0 %v7550_v41 }
 0x2e2   :  { %6897 = vmatpush3.bf16.msra.mxu1 %v6896_v51 }
 0x2e3   :  { %6345 = vmatmul.mubr.msk.f32.gmra.mrb[42].mxu0 %vm290_vm4, %v1530_v25  ;;  %6204 = vmatprep.subr.mxu1 %v7550_v41 }
 0x2e4   :  { %6347 = vmatprep.mubr.msk.f32.mxu0 %vm7549_vm2, %v7550_v41 }
 0x2e6   :  { %6205 = vmatpush3.msk.msra.mxu1 %vm438_vm6, %v426_v49 }
 0x2e7   :  { %6348 = vmatmul.mubr.msk.f32.gmra.mrb[44].mxu0 %vm290_vm4, %v1532_v27  ;;  %6902 = vmatprep.subr.bf16.mxu1 %v7548_v40 }
 0x2e8   :  { %6370 = vmatpush3.xpose.msk.msra.mxu0 %vm290_vm4, %v1774_v28  ;;  %6371 = vmatprep.mubr.msk.f32.mxu0 %vm7549_vm2, %v7550_v41 }
 0x2e9   :  { %6940 = vmatprep.subr.bf16.mxu0 %v7548_v40 }
 0x2eb   :  { %6372 = vmatmul.mubr.msk.f32.vlgmr.msra.gmra.mrb[46].mxu0 %vm290_vm4, %v1764_v30 }
 0x2ec   :  { %6943 = vmatpush3.bf16.xpose.msk.msra.mxu0 %vm7870_vm5, %v6941_v54  ;;  %6374 = vmatprep.mubr.msk.f32.mxu0 %vm7549_vm2, %v7550_v41 }
 0x2ed   :  { %6399 = vmatprep.subr.mxu0 %v7550_v41 }
 0x2ef   :  { %6375 = vmatmul.mubr.msk.f32.gmra.mrb[48].mxu0 %vm290_vm4, %v1766_v36 }
 0x2f0   :  { %6377 = vmatprep.mubr.msk.f32.mxu0 %vm7549_vm2, %v7550_v41 }
 0x2f3   :  { %6378 = vmatmul.mubr.msk.f32.gmra.mrb[50].mxu0 %vm290_vm4, %v1768_v33 }
 0x2f4   :  { %6400 = vmatpush3.xpose.msk.msra.mxu0 %vm290_vm4, %v2010_v38  ;;  %6401 = vmatprep.mubr.msk.f32.mxu0 %vm7549_vm2, %v7550_v41 }
 0x2f5   :  { %6947 = vmatprep.subr.bf16.mxu0 %v7548_v40 }
 0x2f7   :  { %6402 = vmatmul.mubr.msk.f32.vlgmr.msra.gmra.mrb[52].mxu0 %vm290_vm4, %v2000_v37 }
 0x2f8   :  { %6404 = vmatprep.mubr.msk.f32.mxu0 %vm7549_vm2, %v7550_v41 }
 0x2fb   :  { %6405 = vmatmul.mubr.msk.f32.gmra.mrb[54].mxu0 %vm290_vm4, %v2002_v50 }
 0x2fc   :  { %6407 = vmatprep.mubr.msk.f32.mxu0 %vm7549_vm2, %v7550_v41 }
 0x2ff   :  { %6408 = vmatmul.mubr.msk.f32.gmra.mrb[56].mxu0 %vm290_vm4, %v2004_v39 }
 0x300   :  { %6433 = vmatprep.mubr.msk.f32.mxu0 %vm7549_vm2, %v7550_v41 }
 0x376   :  { %v372_v61 = vpop.f32.mrb[10].mxu0 }
 0x377   :  { %v8007_v62 = vadd.f32 %v372_v61, %v8004_v60  ;;  %v6193_v63 = vpop.f32.mrb[11].mxu0 }
 0x379   :  { %v387_v0 = vsel %vm386_vm7, %v8007_v62, -inf }
 0x37a   :  { %388 = vmax.xlane.f32.xlu0 %v387_v0  ;;  %v377_v1 = vpop.f32.mrb[12].mxu0 }
 0x37b   :  { %v8012_v2 = vadd.f32 %v377_v1, %v8004_v60  ;;  %v6196_v3 = vpop.f32.mrb[13].mxu0 }
 0x37d   :  { %v390_v4 = vsel %vm386_vm7, %v8012_v2, -inf }
 0x37e   :  { %391 = vmax.xlane.f32.xlu1 %v390_v4  ;;  %v382_v5 = vpop.f32.mrb[14].mxu0 }
 0x37f   :  { %v8017_v6 = vadd.f32 %v382_v5, %v8004_v60  ;;  %v6199_v7 = vpop.f32.mrb[15].mxu0 }
 0x381   :  { %v394_v8 = vsel %vm393_vm8, %v8017_v6, -inf }
 0x382   :  { %395 = vmax.xlane.f32.xlu0 %v394_v8  ;;  %v611_v9 = vpop.f32.mrb[16].mxu0 }
 0x383   :  { %v8022_v10 = vadd.f32 %v611_v9, %v8004_v60  ;;  %v6223_v11 = vpop.f32.mrb[17].mxu0 }
 0x384   :  { %v1280_v11 = vsub.s32 1, %v7995_v57 }
 0x385   :  { %v625_v12 = vsel %vm386_vm7, %v8022_v10, -inf }
 0x386   :  { %626 = vmax.xlane.f32.xlu0 %v625_v12  ;;  %v616_v13 = vpop.f32.mrb[18].mxu0 }
 0x387   :  { %v8027_v14 = vadd.f32 %v616_v13, %v8004_v60  ;;  %v6226_v15 = vpop.f32.mrb[19].mxu0 }
 0x388   :  { %v8072_v15 = vrot.slane %v8001_v59, %v1280_v11 }
 0x389   :  { %v628_v16 = vsel %vm386_vm7, %v8027_v14, -inf }
 0x38a   :  { %629 = vmax.xlane.f32.xlu0 %v628_v16  ;;  %v621_v17 = vpop.f32.mrb[20].mxu0 }
 0x38b   :  { %v8032_v18 = vadd.f32 %v621_v17, %v8004_v60  ;;  %v6229_v19 = vpop.f32.mrb[21].mxu0 }
 0x38d   :  { %v631_v20 = vsel %vm393_vm8, %v8032_v18, -inf }
 0x38e   :  { %632 = vmax.xlane.f32.xlu1 %v631_v20  ;;  %v847_v21 = vpop.f32.mrb[22].mxu0 }
 0x38f   :  { %v8037_v22 = vadd.f32 %v847_v21, %v8004_v60  ;;  %v6253_v23 = vpop.f32.mrb[23].mxu0 }
 0x391   :  { %v861_v24 = vsel %vm386_vm7, %v8037_v22, -inf }
 0x392   :  { %862 = vmax.xlane.f32.xlu0 %v861_v24  ;;  %v852_v25 = vpop.f32.mrb[24].mxu0 }
 0x393   :  { %v8042_v26 = vadd.f32 %v852_v25, %v8004_v60  ;;  %v6256_v27 = vpop.f32.mrb[25].mxu0 }
 0x395   :  { %v864_v28 = vsel %vm386_vm7, %v8042_v26, -inf }
 0x396   :  { %865 = vmax.xlane.f32.xlu1 %v864_v28  ;;  %v857_v29 = vpop.f32.mrb[26].mxu0 }
 0x397   :  { %v8047_v30 = vadd.f32 %v857_v29, %v8004_v60  ;;  %v6259_v31 = vpop.f32.mrb[27].mxu0 }
 0x399   :  { %v867_v32 = vsel %vm393_vm8, %v8047_v30, -inf }
 0x39a   :  { %868 = vmax.xlane.f32.xlu0 %v867_v32  ;;  %v1083_v33 = vpop.f32.mrb[28].mxu0 }
 0x39b   :  { %v8052_v34 = vadd.f32 %v1083_v33, %v8004_v60  ;;  %v6283_v36 = vpop.f32.mrb[29].mxu0 }
 0x39d   :  { %v1097_v37 = vsel %vm386_vm7, %v8052_v34, -inf }
 0x39e   :  { %1098 = vmax.xlane.f32.xlu1 %v1097_v37  ;;  %v1088_v38 = vpop.f32.mrb[30].mxu0 }
 0x39f   :  { %v8057_v39 = vadd.f32 %v1088_v38, %v8004_v60  ;;  %v6286_v43 = vpop.f32.mrb[31].mxu0 }
 0x3a1   :  { %v1100_v44 = vsel %vm386_vm7, %v8057_v39, -inf }
 0x3a2   :  { %1101 = vmax.xlane.f32.xlu0 %v1100_v44  ;;  %v1093_v45 = vpop.f32.mrb[32].mxu0 }
 0x3a3   :  { %v8062_v46 = vadd.f32 %v1093_v45, %v8004_v60  ;;  %v6289_v47 = vpop.f32.mrb[33].mxu0 }
 0x3a5   :  { %v1103_v48 = vsel %vm393_vm8, %v8062_v46, -inf }
 0x3a6   :  { %1104 = vmax.xlane.f32.xlu1 %v1103_v48  ;;  %v1381_v50 = vpop.f32.mrb[34].mxu0 }
 0x3a7   :  { %v6313_v51 = vpop.f32.mrb[35].mxu0  ;;  %v8075_v19 = vadd.f32 %v1381_v50, %v8072_v15 }
 0x3a9   :  { %v1395_v57 = vsel %vm386_vm7, %v8075_v19, -inf }
 0x3aa   :  { %v1386_v49 = vpop.f32.mrb[36].mxu0 }
 0x3ab   :  { %v6316_v52 = vpop.f32.mrb[37].mxu0  ;;  %v8078_v23 = vadd.f32 %v1386_v49, %v8072_v15 }
 0x3ad   :  { %v1398_v27 = vsel %vm386_vm7, %v8078_v23, -inf }
 0x3ae   :  { %v1391_v53 = vpop.f32.mrb[38].mxu0 }
 0x3af   :  { %v6319_v54 = vpop.f32.mrb[39].mxu0  ;;  %v8081_v24 = vadd.f32 %v1391_v53, %v8072_v15  ;;  %v8134_v53 = vpop.permute.xlu0 %662 }
 0x3b0   :  { %v8136_v54 = vpop.permute.xlu1 %7151 }
 0x3b1   :  { %v1401_v28 = vsel %vm393_vm8, %v8081_v24, -inf }
 0x3b2   :  { %v1617_v56 = vpop.f32.mrb[40].mxu0 }
 0x3b3   :  { %v6343_v58 = vpop.f32.mrb[41].mxu0  ;;  %v8086_v59 = vadd.f32 %v1617_v56, %v8072_v15  ;;  %v8138_v56 = vpop.permute.xlu0 %7156 }
 0x3b4   :  { %v8140_v58 = vpop.permute.xlu1 %898 }
 0x3b5   :  { %v1631_v32 = vsel %vm386_vm7, %v8086_v59, -inf }
 0x3b6   :  { %v1622_v61 = vpop.f32.mrb[42].mxu0 }
 0x3b7   :  { %7166 = vrot.lane.b32.xlu1 %v7785_v42, %s9673_s19  ;;  %v6346_v63 = vpop.f32.mrb[43].mxu0  ;;  %v8089_v25 = vadd.f32 %v1622_v61, %v8072_v15  ;;  %v8142_v61 = vpop.permute.xlu0 %1134 }
 0x3b8   :  { %1432 = vrot.lane.b32.xlu0 %v7771_v35, %s9673_s19  ;;  %v8144_v63 = vpop.permute.xlu1 %7161  ;;  %s9677_s19 = smov 24  }
 0x3b9   :  { %v1634_v33 = vsel %vm386_vm7, %v8089_v25, -inf }
 0x3ba   :  { %v1627_v0 = vpop.f32.mrb[44].mxu0 }
 0x3bb   :  { %v6349_v1 = vpop.f32.mrb[45].mxu0  ;;  %v8096_v29 = vadd.f32 %v1627_v0, %v8072_v15 }
 0x3bd   :  { %v1637_v38 = vsel %vm393_vm8, %v8096_v29, -inf }
 0x3be   :  { %v1853_v3 = vpop.f32.mrb[46].mxu0 }
 0x3bf   :  { %v6373_v4 = vpop.f32.mrb[47].mxu0  ;;  %v8099_v31 = vadd.f32 %v1853_v3, %v8072_v15 }
 0x3c1   :  { %v1867_v43 = vsel %vm386_vm7, %v8099_v31, -inf }
 0x3c2   :  { %v1858_v5 = vpop.f32.mrb[48].mxu0 }
 0x3c3   :  { %v6376_v7 = vpop.f32.mrb[49].mxu0  ;;  %v8106_v36 = vadd.f32 %v1858_v5, %v8072_v15 }
 0x3c5   :  { %v1870_v45 = vsel %vm386_vm7, %v8106_v36, -inf }
 0x3c6   :  { %v1863_v8 = vpop.f32.mrb[50].mxu0 }
 0x3c7   :  { %v6379_v9 = vpop.f32.mrb[51].mxu0  ;;  %v8109_v37 = vadd.f32 %v1863_v8, %v8072_v15 }
 0x3c9   :  { %v1873_v47 = vsel %vm393_vm8, %v8109_v37, -inf }
 0x3ca   :  { %v2089_v12 = vpop.f32.mrb[52].mxu0 }
 0x3cb   :  { %v6403_v13 = vpop.f32.mrb[53].mxu0  ;;  %v8116_v44 = vadd.f32 %v2089_v12, %v8072_v15 }
 0x3cd   :  { %v2103_v50 = vsel %vm386_vm7, %v8116_v44, -inf }
 0x3ce   :  { %v2094_v16 = vpop.f32.mrb[54].mxu0 }
 0x3cf   :  { %v6406_v17 = vpop.f32.mrb[55].mxu0  ;;  %v8123_v48 = vadd.f32 %v2094_v16, %v8072_v15 }
 0x3d1   :  { %v2106_v49 = vsel %vm386_vm7, %v8123_v48, -inf }
 0x3d2   :  { %v2099_v20 = vpop.f32.mrb[56].mxu0 }
 0x3d3   :  { %v6409_v21 = vpop.f32.mrb[57].mxu0  ;;  %v8128_v51 = vadd.f32 %v2099_v20, %v8072_v15 }
 0x3d5   :  { %v2109_v52 = vsel %vm393_vm8, %v8128_v51, -inf }
 0x3d7   :  { %1396 = vmax.xlane.f32.xlu0 %v1395_v57 }
 0x3db   :  { %1399 = vmax.xlane.f32.xlu1 %v1398_v27  ;;  %1402 = vmax.xlane.f32.xlu0 %v1401_v28 }
 0x3df   :  { %1632 = vmax.xlane.f32.xlu1 %v1631_v32  ;;  %1635 = vmax.xlane.f32.xlu0 %v1634_v33 }
 0x3e3   :  { %1638 = vmax.xlane.f32.xlu1 %v1637_v38  ;;  %1868 = vmax.xlane.f32.xlu0 %v1867_v43 }
 0x3e7   :  { %1871 = vmax.xlane.f32.xlu1 %v1870_v45  ;;  %1874 = vmax.xlane.f32.xlu0 %v1873_v47 }
 0x3eb   :  { %2104 = vmax.xlane.f32.xlu1 %v2103_v50 }
 0x3ef   :  { %2107 = vmax.xlane.f32.xlu1 %v2106_v49 }
 0x3f3   :  { %2110 = vmax.xlane.f32.xlu1 %v2109_v52 }
 0x407   :  { %v389_v0 = vpop.xlane.xlu0 %388 }
 0x408   :  { %v397_v1 = vsub.f32 %v8007_v62, %v389_v0 }
 0x40a   :  { %v400_v3 = vmul.f32 1.442695, %v397_v1 }
 0x40b   :  { %v392_v4 = vpop.xlane.xlu1 %391 }
 0x40c   :  { %7275 = vpow2.f32 %v400_v3  ;;  %v398_v5 = vsub.f32 %v8012_v2, %v392_v4 }
 0x40e   :  { %v402_v7 = vmul.f32 1.442695, %v398_v5 }
 0x40f   :  { %v396_v8 = vpop.xlane.xlu0 %395 }
 0x410   :  { %7277 = vpow2.f32 %v402_v7  ;;  %v399_v9 = vsub.f32 %v8017_v6, %v396_v8 }
 0x412   :  { %v404_v11 = vmul.f32 1.442695, %v399_v9 }
 0x413   :  { %v627_v12 = vpop.xlane.xlu0 %626 }
 0x414   :  { %7279 = vpow2.f32 %v404_v11  ;;  %v634_v13 = vsub.f32 %v8022_v10, %v627_v12 }
 0x416   :  { %v8150_v16 = vpop.eup %7275  ;;  %v637_v17 = vmul.f32 1.442695, %v634_v13 }
 0x417   :  { %v630_v20 = vpop.xlane.xlu0 %629  ;;  %v406_v62 = vsel %vm386_vm7, %v8150_v16, 0.0 }
 0x418   :  { %7281 = vpow2.f32 %v637_v17  ;;  %v635_v2 = vsub.f32 %v8027_v14, %v630_v20  ;;  %407 = vadd.xlane.f32.xlu0 %v406_v62 }
 0x41a   :  { %v8155_v21 = vpop.eup %7277  ;;  %v639_v57 = vmul.f32 1.442695, %v635_v2 }
 0x41b   :  { %v633_v6 = vpop.xlane.xlu1 %632  ;;  %v409_v27 = vsel %vm386_vm7, %v8155_v21, 0.0 }
 0x41c   :  { %7283 = vpow2.f32 %v639_v57  ;;  %v636_v10 = vsub.f32 %v8032_v18, %v633_v6  ;;  %410 = vadd.xlane.f32.xlu1 %v409_v27 }
 0x41e   :  { %v8160_v28 = vpop.eup %7279  ;;  %v641_v32 = vmul.f32 1.442695, %v636_v10 }
 0x41f   :  { %v863_v33 = vpop.xlane.xlu0 %862  ;;  %v412_v38 = vsel %vm393_vm8, %v8160_v28, 0.0 }
 0x420   :  { %7285 = vpow2.f32 %v641_v32  ;;  %v870_v14 = vsub.f32 %v8037_v22, %v863_v33  ;;  %413 = vadd.xlane.f32.xlu0 %v412_v38 }
 0x422   :  { %v8165_v43 = vpop.eup %7281  ;;  %v873_v45 = vmul.f32 1.442695, %v870_v14 }
 0x423   :  { %v866_v47 = vpop.xlane.xlu1 %865  ;;  %v643_v50 = vsel %vm386_vm7, %v8165_v43, 0.0 }
 0x424   :  { %7287 = vpow2.f32 %v873_v45  ;;  %v871_v18 = vsub.f32 %v8042_v26, %v866_v47  ;;  %644 = vadd.xlane.f32.xlu1 %v643_v50 }
 0x426   :  { %v8170_v49 = vpop.eup %7283  ;;  %v875_v52 = vmul.f32 1.442695, %v871_v18 }
 0x427   :  { %v869_v0 = vpop.xlane.xlu0 %868  ;;  %v646_v1 = vsel %vm386_vm7, %v8170_v49, 0.0 }
 0x428   :  { %7289 = vpow2.f32 %v875_v52  ;;  %v872_v22 = vsub.f32 %v8047_v30, %v869_v0  ;;  %647 = vadd.xlane.f32.xlu0 %v646_v1 }
 0x42a   :  { %v8175_v3 = vpop.eup %7285  ;;  %v877_v4 = vmul.f32 1.442695, %v872_v22 }
 0x42b   :  { %v1099_v5 = vpop.xlane.xlu1 %1098  ;;  %v649_v7 = vsel %vm393_vm8, %v8175_v3, 0.0 }
 0x42c   :  { %7291 = vpow2.f32 %v877_v4  ;;  %v1106_v26 = vsub.f32 %v8052_v34, %v1099_v5  ;;  %650 = vadd.xlane.f32.xlu0 %v649_v7 }
 0x42e   :  { %v8180_v8 = vpop.eup %7287  ;;  %v1109_v9 = vmul.f32 1.442695, %v1106_v26 }
 0x42f   :  { %v1102_v11 = vpop.xlane.xlu0 %1101  ;;  %v879_v12 = vsel %vm386_vm7, %v8180_v8, 0.0 }
 0x430   :  { %7293 = vpow2.f32 %v1109_v9  ;;  %v1107_v30 = vsub.f32 %v8057_v39, %v1102_v11  ;;  %880 = vadd.xlane.f32.xlu0 %v879_v12 }
 0x432   :  { %v8185_v13 = vpop.eup %7289  ;;  %v1111_v17 = vmul.f32 1.442695, %v1107_v30 }
 0x433   :  { %v1105_v20 = vpop.xlane.xlu1 %1104  ;;  %v882_v62 = vsel %vm386_vm7, %v8185_v13, 0.0  ;;  %v8210_v38 = vpop.permute.xlu0 %1432 }
 0x434   :  { %7295 = vpow2.f32 %v1111_v17  ;;  %v1108_v34 = vsub.f32 %v8062_v46, %v1105_v20  ;;  %883 = vadd.xlane.f32.xlu0 %v882_v62 }
 0x436   :  { %v8190_v2 = vpop.eup %7291  ;;  %v1113_v57 = vmul.f32 1.442695, %v1108_v34 }
 0x437   :  { %v885_v6 = vsel %vm393_vm8, %v8190_v2, 0.0  ;;  %v8212_v14 = vpop.permute.xlu1 %7166 }
 0x438   :  { %7297 = vpow2.f32 %v1113_v57  ;;  %886 = vadd.xlane.f32.xlu0 %v885_v6 }
 0x43a   :  { %v8194_v39 = vpop.eup %7293 }
 0x43b   :  { %v1115_v27 = vsel %vm386_vm7, %v8194_v39, 0.0 }
 0x43c   :  { %1116 = vadd.xlane.f32.xlu0 %v1115_v27 }
 0x43e   :  { %v8198_v10 = vpop.eup %7295 }
 0x43f   :  { %v1118_v46 = vsel %vm386_vm7, %v8198_v10, 0.0 }
 0x440   :  { %1119 = vadd.xlane.f32.xlu1 %v1118_v46 }
 0x442   :  { %v8202_v32 = vpop.eup %7297 }
 0x443   :  { %v1121_v33 = vsel %vm393_vm8, %v8202_v32, 0.0 }
 0x444   :  { %1122 = vadd.xlane.f32.xlu0 %v1121_v33 }
 0x45a   :  { %1668 = vrot.lane.b32.xlu0 %v7771_v35, %s9671_s1 }
 0x45e   :  { %7176 = vrot.lane.b32.xlu0 %v7785_v42, %s9669_s21 }
 0x464   :  { %v1397_v45 = vpop.xlane.xlu0 %1396 }
 0x465   :  { %v1404_v47 = vsub.f32 %v8075_v19, %v1397_v45 }
 0x467   :  { %v1407_v50 = vmul.f32 1.442695, %v1404_v47 }
 0x468   :  { %v1400_v18 = vpop.xlane.xlu1 %1399  ;;  %v1403_v52 = vpop.xlane.xlu0 %1402 }
 0x469   :  { %7299 = vpow2.f32 %v1407_v50  ;;  %v1405_v0 = vsub.f32 %v8078_v23, %v1400_v18  ;;  %v1406_v22 = vsub.f32 %v8081_v24, %v1403_v52 }
 0x46b   :  { %v1409_v1 = vmul.f32 1.442695, %v1405_v0  ;;  %v1411_v7 = vmul.f32 1.442695, %v1406_v22 }
 0x46c   :  { %v1633_v4 = vpop.xlane.xlu1 %1632  ;;  %v1636_v5 = vpop.xlane.xlu0 %1635 }
 0x46d   :  { %7301 = vpow2.f32 %v1409_v1  ;;  %v1641_v26 = vsub.f32 %v8089_v25, %v1636_v5  ;;  %v1640_v47 = vsub.f32 %v8086_v59, %v1633_v4 }
 0x46e   :  { %7303 = vpow2.f32 %v1411_v7 }
 0x46f   :  { %v1645_v19 = vmul.f32 1.442695, %v1641_v26  ;;  %v1643_v50 = vmul.f32 1.442695, %v1640_v47 }
 0x470   :  { %v1639_v9 = vpop.xlane.xlu1 %1638  ;;  %v1869_v11 = vpop.xlane.xlu0 %1868 }
 0x471   :  { %v1876_v30 = vsub.f32 %v8099_v31, %v1869_v11  ;;  %7305 = vpow2.f32 %v1645_v19  ;;  %v1642_v18 = vsub.f32 %v8096_v29, %v1639_v9 }
 0x473   :  { %v8218_v12 = vpop.eup %7299  ;;  %v1879_v24 = vmul.f32 1.442695, %v1876_v30  ;;  %v1647_v1 = vmul.f32 1.442695, %v1642_v18  ;;  %v7158_v18 = vunpack.i.l.bf16 %v8138_v56 }
 0x474   :  { %v1872_v17 = vpop.xlane.xlu1 %1871  ;;  %v1413_v23 = vsel %vm386_vm7, %v8218_v12, 0.0  ;;  %v1875_v52 = vpop.xlane.xlu0 %1874 }
 0x475   :  { %1414 = vadd.xlane.f32.xlu1 %v1413_v23  ;;  %v1877_v20 = vsub.f32 %v8106_v36, %v1872_v17  ;;  %7307 = vpow2.f32 %v1879_v24  ;;  %v1878_v22 = vsub.f32 %v8109_v37, %v1875_v52  ;;  %v7154_v17 = vunpack.i.h.bf16 %v8136_v54 }
 0x476   :  { %v7153_v23 = vunpack.i.l.bf16 %v8136_v54 }
 0x477   :  { %v8224_v62 = vpop.eup %7301  ;;  %v1881_v25 = vmul.f32 1.442695, %v1877_v20  ;;  %v1883_v7 = vmul.f32 1.442695, %v1878_v22 }
 0x478   :  { %v1416_v34 = vsel %vm386_vm7, %v8224_v62, 0.0  ;;  %v8228_v57 = vpop.eup %7303  ;;  %v2105_v0 = vpop.xlane.xlu1 %2104 }
 0x479   :  { %7309 = vpow2.f32 %v1881_v25  ;;  %v1419_v31 = vsel %vm393_vm8, %v8228_v57, 0.0  ;;  %v2112_v37 = vsub.f32 %v8116_v44, %v2105_v0 }
 0x47a   :  { %7311 = vpow2.f32 %v1643_v50  ;;  %v7159_v50 = vunpack.i.h.bf16 %v8138_v56 }
 0x47b   :  { %v8232_v6 = vpop.eup %7305  ;;  %7313 = vpow2.f32 %v1647_v1  ;;  %v2115_v20 = vmul.f32 1.442695, %v2112_v37 }
 0x47c   :  { %v1652_v36 = vsel %vm386_vm7, %v8232_v6, 0.0  ;;  %v8249_v5 = vpop.xlane.xlu1 %2107  ;;  %7315 = vpow2.f32 %v1883_v7  ;;  %v6910_v1 = vpack.c.bf16 %v7159_v50, %v7158_v18 }
 0x47d   :  { %1417 = vadd.xlane.f32.xlu0 %v1416_v34 }
 0x47f   :  { %v8236_v27 = vpop.eup %7307 }
 0x480   :  { %v1885_v46 = vsel %vm386_vm7, %v8236_v27, 0.0  ;;  %v8253_v26 = vpop.xlane.xlu1 %2110 }
 0x481   :  { %1420 = vadd.xlane.f32.xlu0 %v1419_v31  ;;  %v6903_v31 = vpack.c.bf16 %v7154_v17, %v7153_v23 }
 0x483   :  { %v8242_v33 = vpop.eup %7309 }
 0x484   :  { %v1888_v45 = vsel %vm386_vm7, %v8242_v33, 0.0  ;;  %v8255_v4 = vpop.eup %7311 }
 0x485   :  { %1653 = vadd.xlane.f32.xlu0 %v1652_v36  ;;  %v1649_v9 = vsel %vm386_vm7, %v8255_v4, 0.0  ;;  %v8259_v11 = vpop.eup %7313 }
 0x486   :  { %7171 = vrot.lane.b32.xlu1 %v7785_v42, %s9671_s1  ;;  %v8264_v30 = vpop.eup %7315 }
 0x487   :  { %v1891_v34 = vsel %vm393_vm8, %v8264_v30, 0.0 }
 0x489   :  { %1886 = vadd.xlane.f32.xlu0 %v1885_v46 }
 0x48d   :  { %1889 = vadd.xlane.f32.xlu0 %v1888_v45 }
 0x4a3   :  { %7181 = vrot.lane.b32.xlu0 %v7785_v42, %s9667_s22  ;;  %v1655_v42 = vsel %vm393_vm8, %v8259_v11, 0.0 }
 0x4a5   :  { %v408_v59 = vpop.xlane.xlu0 %407 }
 0x4a6   :  { %7317 = vrcp.f32 %v408_v59 }
 0x4a9   :  { %v411_v29 = vpop.xlane.xlu1 %410 }
 0x4aa   :  { %7319 = vrcp.f32 %v411_v29  ;;  %1650 = vadd.xlane.f32.xlu1 %v1649_v9  ;;  %v7163_v9 = vunpack.i.l.bf16 %v8144_v63 }
 0x4ad   :  { %v414_v19 = vpop.xlane.xlu0 %413 }
 0x4ae   :  { %7321 = vrcp.f32 %v414_v19  ;;  %1656 = vadd.xlane.f32.xlu1 %v1655_v42 }
 0x4b0   :  { %v7318_v24 = vpop.eup %7317 }
 0x4b1   :  { %v645_v25 = vpop.xlane.xlu1 %644  ;;  %v418_v44 = vmul.f32 %v7318_v24, %v8150_v16 }
 0x4b2   :  { %7323 = vrcp.f32 %v645_v25  ;;  %1892 = vadd.xlane.f32.xlu1 %v1891_v34  ;;  %v7168_v25 = vunpack.i.l.bf16 %v8212_v14 }
 0x4b3   :  { %6207 = vmatmul.mubr.msk.f32.vlgmr.msra.gmra.mrb[0].mxu1 %vm386_vm7, %v418_v44  ;;  %7325 = vpow2.f32 %v2115_v20 }
 0x4b4   :  { %v7320_v36 = vpop.eup %7319  ;;  %6904 = vmatpush3.bf16.msra.mxu1 %v6903_v31  ;;  %6209 = vmatprep.mubr.msk.f32.mxu1 %vm7549_vm2, %v7550_v41 }
 0x4b5   :  { %v648_v54 = vpop.xlane.xlu0 %647  ;;  %6234 = vmatprep.subr.mxu1 %v7550_v41  ;;  %v419_v46 = vmul.f32 %v7320_v36, %v8155_v21 }
 0x4b6   :  { %7327 = vrcp.f32 %v648_v54 }
 0x4b7   :  { %6210 = vmatmul.mubr.msk.f32.gmra.mrb[2].mxu1 %vm386_vm7, %v419_v46 }
 0x4b8   :  { %v7322_v16 = vpop.eup %7321  ;;  %6235 = vmatpush3.msk.msra.mxu1 %vm438_vm6, %v8134_v53  ;;  %6212 = vmatprep.mubr.msk.f32.mxu1 %vm7549_vm2, %v7550_v41 }
 0x4b9   :  { %v651_v45 = vpop.xlane.xlu0 %650  ;;  %v420_v47 = vmul.f32 %v7322_v16, %v8160_v28  ;;  %6909 = vmatprep.subr.bf16.mxu1 %v7548_v40 }
 0x4ba   :  { %7329 = vrcp.f32 %v651_v45 }
 0x4bb   :  { %6213 = vmatmul.mubr.msk.f32.gmra.mrb[4].mxu1 %vm386_vm7, %v420_v47 }
 0x4bc   :  { %v7324_v21 = vpop.eup %7323  ;;  %6236 = vmatprep.mubr.msk.f32.mxu1 %vm7549_vm2, %v7550_v41 }
 0x4bd   :  { %v655_v53 = vmul.f32 %v7324_v21, %v8165_v43  ;;  %v881_v52 = vpop.xlane.xlu0 %880  ;;  %v8289_v0 = vpop.eup %7325 }
 0x4be   :  { %7331 = vrcp.f32 %v881_v52  ;;  %v2121_v22 = vsel %vm386_vm7, %v8289_v0, 0.0 }
 0x4bf   :  { %6237 = vmatmul.mubr.msk.f32.vlgmr.msra.gmra.mrb[6].mxu1 %vm386_vm7, %v655_v53 }
 0x4c0   :  { %v7328_v28 = vpop.eup %7327  ;;  %6911 = vmatpush3.bf16.msra.mxu1 %v6910_v1  ;;  %6239 = vmatprep.mubr.msk.f32.mxu1 %vm7549_vm2, %v7550_v41 }
 0x4c1   :  { %v884_v56 = vpop.xlane.xlu0 %883  ;;  %6264 = vmatprep.subr.mxu1 %v7550_v41  ;;  %v656_v43 = vmul.f32 %v7328_v28, %v8170_v49  ;;  %v7164_v49 = vunpack.i.h.bf16 %v8144_v63 }
 0x4c2   :  { %7333 = vrcp.f32 %v884_v56  ;;  %2122 = vadd.xlane.f32.xlu0 %v2121_v22 }
 0x4c3   :  { %1904 = vrot.lane.b32.xlu1 %v7771_v35, %s9669_s21  ;;  %6240 = vmatmul.mubr.msk.f32.gmra.mrb[8].mxu1 %vm386_vm7, %v656_v43  ;;  %v6917_v42 = vpack.c.bf16 %v7164_v49, %v7163_v9  ;;  %s9679_s21 = smov 16  }
 0x4c4   :  { %v7330_v7 = vpop.eup %7329  ;;  %6265 = vmatpush3.msk.msra.mxu1 %vm438_vm6, %v8140_v58  ;;  %6242 = vmatprep.mubr.msk.f32.mxu1 %vm7549_vm2, %v7550_v41 }
 0x4c5   :  { %v887_v59 = vpop.xlane.xlu0 %886  ;;  %v657_v29 = vmul.f32 %v7330_v7, %v8175_v3  ;;  %6916 = vmatprep.subr.bf16.mxu1 %v7548_v40 }
 0x4c6   :  { %7335 = vrcp.f32 %v887_v59 }
 0x4c7   :  { %6243 = vmatmul.mubr.msk.f32.gmra.mrb[10].mxu1 %vm386_vm7, %v657_v29 }
 0x4c8   :  { %v7332_v37 = vpop.eup %7331  ;;  %6266 = vmatprep.mubr.msk.f32.mxu1 %vm7549_vm2, %v7550_v41 }
 0x4c9   :  { %v891_v58 = vmul.f32 %v7332_v37, %v8180_v8  ;;  %v1117_v19 = vpop.xlane.xlu0 %1116  ;;  %v2114_v8 = vsub.f32 %v8128_v51, %v8253_v26 }
 0x4ca   :  { %7337 = vrcp.f32 %v1117_v19 }
 0x4cb   :  { %6267 = vmatmul.mubr.msk.f32.vlgmr.msra.gmra.mrb[12].mxu1 %vm386_vm7, %v891_v58 }
 0x4cc   :  { %v7334_v3 = vpop.eup %7333  ;;  %6918 = vmatpush3.bf16.msra.mxu1 %v6917_v42  ;;  %6269 = vmatprep.mubr.msk.f32.mxu1 %vm7549_vm2, %v7550_v41 }
 0x4cd   :  { %v1120_v63 = vpop.xlane.xlu1 %1119  ;;  %6294 = vmatprep.subr.mxu1 %v7550_v41  ;;  %v892_v17 = vmul.f32 %v7334_v3, %v8185_v13  ;;  %v7169_v13 = vunpack.i.h.bf16 %v8212_v14 }
 0x4ce   :  { %7339 = vrcp.f32 %v1120_v63 }
 0x4cf   :  { %6270 = vmatmul.mubr.msk.f32.gmra.mrb[14].mxu1 %vm386_vm7, %v892_v17  ;;  %v6924_v51 = vpack.c.bf16 %v7169_v13, %v7168_v25 }
 0x4d0   :  { %v7336_v23 = vpop.eup %7335  ;;  %6295 = vmatpush3.msk.msra.mxu1 %vm438_vm6, %v8142_v61  ;;  %6272 = vmatprep.mubr.msk.f32.mxu1 %vm7549_vm2, %v7550_v41  ;;  %v2119_v61 = vmul.f32 1.442695, %v2114_v8 }
 0x4d1   :  { %v1123_v24 = vpop.xlane.xlu0 %1122  ;;  %v893_v20 = vmul.f32 %v7336_v23, %v8190_v2  ;;  %6923 = vmatprep.subr.bf16.mxu1 %v7548_v40 }
 0x4d2   :  { %7341 = vrcp.f32 %v1123_v24 }
 0x4d3   :  { %6273 = vmatmul.mubr.msk.f32.gmra.mrb[16].mxu1 %vm386_vm7, %v893_v20  ;;  %7343 = vpow2.f32 %v2119_v61 }
 0x4d4   :  { %v7338_v34 = vpop.eup %7337  ;;  %6296 = vmatprep.mubr.msk.f32.mxu1 %vm7549_vm2, %v7550_v41 }
 0x4d5   :  { %v1127_v44 = vmul.f32 %v7338_v34, %v8194_v39  ;;  %v1669_v54 = vpop.permute.xlu0 %1668 }
 0x4d7   :  { %6297 = vmatmul.mubr.msk.f32.vlgmr.msra.gmra.mrb[18].mxu1 %vm386_vm7, %v1127_v44 }
 0x4d8   :  { %v7340_v2 = vpop.eup %7339  ;;  %6925 = vmatpush3.bf16.msra.mxu1 %v6924_v51  ;;  %2140 = vrot.lane.b32.xlu0 %v7771_v35, %s9667_s22  ;;  %v2113_v35 = vsub.f32 %v8123_v48, %v8249_v5 }
 0x4d9   :  { %6299 = vmatprep.mubr.msk.f32.mxu1 %vm7549_vm2, %v7550_v41  ;;  %6324 = vmatprep.subr.mxu1 %v7550_v41  ;;  %v1128_v14 = vmul.f32 %v7340_v2, %v8198_v10  ;;  %v7177_v16 = vpop.permute.xlu0 %7176 }
 0x4da   :  { %v2117_v31 = vmul.f32 1.442695, %v2113_v35  ;;  %v7179_v7 = vunpack.i.h.bf16 %v7177_v16  ;;  %v7178_v59 = vunpack.i.l.bf16 %v7177_v16 }
 0x4db   :  { %6300 = vmatmul.mubr.msk.f32.gmra.mrb[20].mxu1 %vm386_vm7, %v1128_v14 }
 0x4dc   :  { %v7342_v26 = vpop.eup %7341  ;;  %6325 = vmatpush3.msk.msra.mxu1 %vm438_vm6, %v8210_v38  ;;  %6302 = vmatprep.mubr.msk.f32.mxu1 %vm7549_vm2, %v7550_v41  ;;  %7345 = vpow2.f32 %v2117_v31  ;;  %v6938_v58 = vpack.c.bf16 %v7179_v7, %v7178_v59 }
 0x4dd   :  { %v1129_v39 = vmul.f32 %v7342_v26, %v8202_v32  ;;  %6930 = vmatprep.subr.bf16.mxu1 %v7548_v40  ;;  %v8352_v10 = vpop.eup %7343 }
 0x4de   :  { %v2127_v38 = vsel %vm393_vm8, %v8352_v10, 0.0 }
 0x4df   :  { %6303 = vmatmul.mubr.msk.f32.gmra.mrb[22].mxu1 %vm386_vm7, %v1129_v39 }
 0x4e0   :  { %6326 = vmatprep.mubr.msk.f32.mxu1 %vm7549_vm2, %v7550_v41 }
 0x4e6   :  { %v8356_v36 = vpop.eup %7345 }
 0x4e7   :  { %2128 = vadd.xlane.f32.xlu1 %v2127_v38  ;;  %v2124_v32 = vsel %vm386_vm7, %v8356_v36, 0.0 }
 0x4f7   :  { %2125 = vadd.xlane.f32.xlu0 %v2124_v32 }
 0x502   :  { %v1415_v46 = vpop.xlane.xlu1 %1414 }
 0x503   :  { %7347 = vrcp.f32 %v1415_v46 }
 0x506   :  { %v7172_v45 = vpop.permute.xlu1 %7171 }
 0x507   :  { %v7174_v5 = vunpack.i.h.bf16 %v7172_v45  ;;  %v7173_v47 = vunpack.i.l.bf16 %v7172_v45 }
 0x509   :  { %v6931_v53 = vpack.c.bf16 %v7174_v5, %v7173_v47 }
 0x50a   :  { %v1418_v48 = vpop.xlane.xlu0 %1417 }
 0x50b   :  { %7349 = vrcp.f32 %v1418_v48  ;;  %v2291_v48 = vld [vmem:[%s9650_s6 + $0x8] sm:$0xff] }
 0x50d   :  { %v7348_v50 = vpop.eup %7347 }
 0x50e   :  { %v1425_v18 = vmul.f32 %v7348_v50, %v8218_v12  ;;  %v1421_v21 = vpop.xlane.xlu0 %1420  ;;  %v2292_v50 = vld [vmem:[%s9650_s6 + $0x10] sm:$0xff] }
 0x50f   :  { %7351 = vrcp.f32 %v1421_v21 }
 0x510   :  { %6327 = vmatmul.mubr.msk.f32.vlgmr.msra.gmra.mrb[24].mxu1 %vm386_vm7, %v1425_v18  ;;  %v2293_v18 = vld [vmem:[%s9650_s6 + $0x18] sm:$0xff] }
 0x511   :  { %6932 = vmatpush3.bf16.msra.mxu1 %v6931_v53  ;;  %6329 = vmatprep.mubr.msk.f32.mxu1 %vm7549_vm2, %v7550_v41  ;;  %v6951_v21 = vpack.c.bf16 %v2293_v18, %v2292_v50 }
 0x512   :  { %6354 = vmatprep.subr.mxu1 %v7550_v41  ;;  %v1654_v56 = vpop.xlane.xlu0 %1653 }
 0x515   :  { %v7350_v52 = vpop.eup %7349  ;;  %6355 = vmatpush3.msk.msra.mxu1 %vm438_vm6, %v1669_v54 }
 0x516   :  { %v1426_v1 = vmul.f32 %v7350_v52, %v8224_v62  ;;  %6937 = vmatprep.subr.bf16.mxu1 %v7548_v40  ;;  %v1887_v43 = vpop.xlane.xlu0 %1886 }
 0x518   :  { %6330 = vmatmul.mubr.msk.f32.gmra.mrb[26].mxu1 %vm386_vm7, %v1426_v1 }
 0x519   :  { %v7352_v12 = vpop.eup %7351  ;;  %6332 = vmatprep.mubr.msk.f32.mxu1 %vm7549_vm2, %v7550_v41 }
 0x51a   :  { %v1427_v28 = vmul.f32 %v7352_v12, %v8228_v57  ;;  %v1890_v49 = vpop.xlane.xlu0 %1889 }
 0x51c   :  { %6333 = vmatmul.mubr.msk.f32.gmra.mrb[28].mxu1 %vm386_vm7, %v1427_v28 }
 0x51d   :  { %6356 = vmatprep.mubr.msk.f32.mxu1 %vm7549_vm2, %v7550_v41 }
 0x51e   :  { %v7182_v3 = vpop.permute.xlu0 %7181 }
 0x51f   :  { %v7184_v23 = vunpack.i.h.bf16 %v7182_v3  ;;  %v7183_v8 = vunpack.i.l.bf16 %v7182_v3 }
 0x521   :  { %v6945_v13 = vpack.c.bf16 %v7184_v23, %v7183_v8 }
 0x537   :  { %v1651_v22 = vpop.xlane.xlu1 %1650 }
 0x538   :  { %7353 = vrcp.f32 %v1651_v22 }
 0x539   :  { %7355 = vrcp.f32 %v1654_v56 }
 0x53b   :  { %v1657_v62 = vpop.xlane.xlu1 %1656 }
 0x53c   :  { %7357 = vrcp.f32 %v1657_v62 }
 0x53d   :  { %7359 = vrcp.f32 %v1887_v43 }
 0x53e   :  { %7361 = vrcp.f32 %v1890_v49 }
 0x53f   :  { %v1893_v57 = vpop.xlane.xlu1 %1892 }
 0x540   :  { %7363 = vrcp.f32 %v1893_v57 }
 0x542   :  { %v7354_v29 = vpop.eup %7353 }
 0x543   :  { %v1661_v9 = vmul.f32 %v7354_v29, %v8255_v4  ;;  %v7356_v37 = vpop.eup %7355  ;;  %v1905_v63 = vpop.permute.xlu1 %1904 }
 0x544   :  { %v1662_v19 = vmul.f32 %v7356_v37, %v8232_v6 }
 0x545   :  { %6357 = vmatmul.mubr.msk.f32.vlgmr.msra.gmra.mrb[30].mxu1 %vm386_vm7, %v1661_v9 }
 0x546   :  { %6939 = vmatpush3.bf16.msra.mxu1 %v6938_v58  ;;  %6359 = vmatprep.mubr.msk.f32.mxu1 %vm7549_vm2, %v7550_v41  ;;  %v7358_v42 = vpop.eup %7357 }
 0x547   :  { %6384 = vmatprep.subr.mxu1 %v7550_v41  ;;  %v1663_v4 = vmul.f32 %v7358_v42, %v8259_v11  ;;  %v7360_v17 = vpop.eup %7359 }
 0x548   :  { %v1897_v6 = vmul.f32 %v7360_v17, %v8236_v27  ;;  %v7362_v20 = vpop.eup %7361 }
 0x549   :  { %6360 = vmatmul.mubr.msk.f32.gmra.mrb[32].mxu1 %vm386_vm7, %v1662_v19  ;;  %v1898_v25 = vmul.f32 %v7362_v20, %v8242_v33 }
 0x54a   :  { %6385 = vmatpush3.msk.msra.mxu1 %vm438_vm6, %v1905_v63  ;;  %6362 = vmatprep.mubr.msk.f32.mxu1 %vm7549_vm2, %v7550_v41  ;;  %v7364_v34 = vpop.eup %7363 }
 0x54b   :  { %6944 = vmatprep.subr.bf16.mxu1 %v7548_v40  ;;  %v1899_v27 = vmul.f32 %v7364_v34, %v8264_v30 }
 0x54d   :  { %6363 = vmatmul.mubr.msk.f32.gmra.mrb[34].mxu1 %vm386_vm7, %v1663_v4 }
 0x54e   :  { %6386 = vmatprep.mubr.msk.f32.mxu1 %vm7549_vm2, %v7550_v41 }
 0x54f   :  { %v2123_v24 = vpop.xlane.xlu0 %2122 }
 0x550   :  { %7365 = vrcp.f32 %v2123_v24 }
 0x551   :  { %6387 = vmatmul.mubr.msk.f32.vlgmr.msra.gmra.mrb[36].mxu1 %vm386_vm7, %v1897_v6 }
 0x552   :  { %6946 = vmatpush3.bf16.msra.mxu1 %v6945_v13  ;;  %6389 = vmatprep.mubr.msk.f32.mxu1 %vm7549_vm2, %v7550_v41 }
 0x553   :  { %v2141_v11 = vpop.permute.xlu0 %2140  ;;  %6414 = vmatprep.subr.mxu1 %v7550_v41 }
 0x555   :  { %6390 = vmatmul.mubr.msk.f32.gmra.mrb[38].mxu1 %vm386_vm7, %v1898_v25 }
 0x556   :  { %6415 = vmatpush3.msk.msra.mxu1 %vm438_vm6, %v2141_v11  ;;  %6392 = vmatprep.mubr.msk.f32.mxu1 %vm7549_vm2, %v7550_v41 }
 0x557   :  { %6953 = vmatprep.subr.bf16.mxu1 %v7548_v40 }
 0x559   :  { %6393 = vmatmul.mubr.msk.f32.gmra.mrb[40].mxu1 %vm386_vm7, %v1899_v27 }
 0x55a   :  { %v7366_v61 = vpop.eup %7365  ;;  %6416 = vmatprep.mubr.msk.f32.mxu1 %vm7549_vm2, %v7550_v41 }
 0x55b   :  { %v2133_v33 = vmul.f32 %v7366_v61, %v8289_v0 }
 0x55d   :  { %6417 = vmatmul.mubr.msk.f32.vlgmr.msra.gmra.mrb[42].mxu1 %vm386_vm7, %v2133_v33 }
 0x55e   :  { %6419 = vmatprep.mubr.msk.f32.mxu1 %vm7549_vm2, %v7550_v41 }
 0x574   :  { %v2129_v44 = vpop.xlane.xlu1 %2128 }
 0x584   :  { %v2126_v51 = vpop.xlane.xlu0 %2125 }
 0x585   :  { %7367 = vrcp.f32 %v2126_v51 }
 0x586   :  { %v8409_v2 = vpop.f32.mrb[0].mxu1  ;;  %7369 = vrcp.f32 %v2129_v44 }
 0x587   :  { %v6208_v30 = vpop.f32.mrb[1].mxu1 }
 0x58a   :  { %v8411_v14 = vpop.f32.mrb[2].mxu1 }
 0x58b   :  { %v6211_v26 = vpop.f32.mrb[3].mxu1 }
 0x58e   :  { %v8413_v39 = vpop.f32.mrb[4].mxu1 }
 0x58f   :  { %v7368_v35 = vpop.eup %7367  ;;  %v6214_v31 = vpop.f32.mrb[5].mxu1 }
 0x590   :  { %v2134_v0 = vmul.f32 %v7368_v35, %v8356_v36  ;;  %v7370_v38 = vpop.eup %7369  ;;  %v2290_v36 = vld [vmem:[%s9650_s6] sm:$0xff] }
 0x591   :  { %v2135_v46 = vmul.f32 %v7370_v38, %v8352_v10  ;;  %v6948_v5 = vpack.c.bf16 %v2291_v48, %v2290_v36 }
 0x592   :  { %v743_v32 = vpop.f32.mrb[6].mxu1  ;;  %6420 = vmatmul.mubr.msk.f32.gmra.mrb[44].mxu1 %vm386_vm7, %v2134_v0 }
 0x593   :  { %1232 = vrot.lane.b32.xlu0 %v743_v32, %s9681_s0  ;;  %v6238_v54 = vpop.f32.mrb[7].mxu1  ;;  %6422 = vmatprep.mubr.msk.f32.mxu1 %vm7549_vm2, %v7550_v41 }
 0x594   :  { %6949 = vmatpush3.bf16.msra.mxu0 %v6948_v5 }
 0x595   :  { %6950 = vmatprep.subr.bf16.mxu0 %v7548_v40 }
 0x596   :  { %v748_v16 = vpop.f32.mrb[8].mxu1  ;;  %6423 = vmatmul.mubr.msk.f32.gmra.mrb[46].mxu1 %vm386_vm7, %v2135_v46 }
 0x597   :  { %1234 = vrot.lane.b32.xlu0 %v748_v16, %s9681_s0  ;;  %v6241_v45 = vpop.f32.mrb[9].mxu1  ;;  %6456 = vmatprep.mubr.msk.f32.mxu1 %vm7549_vm2, %v7550_v41 }
 0x598   :  { %6952 = vmatpush3.bf16.msra.mxu0 %v6951_v21 }
 0x599   :  { %6959 = vmatprep.subr.bf16.mxu0 %v7548_v40 }
 0x59a   :  { %v753_v47 = vpop.f32.mrb[10].mxu1 }
 0x59b   :  { %v6244_v10 = vpop.f32.mrb[11].mxu1 }
 0x59e   :  { %v979_v53 = vpop.f32.mrb[12].mxu1 }
 0x59f   :  { %1244 = vrot.lane.b32.xlu1 %v979_v53, %s9679_s21  ;;  %v6268_v52 = vpop.f32.mrb[13].mxu1 }
 0x5a2   :  { %v984_v1 = vpop.f32.mrb[14].mxu1 }
 0x5a3   :  { %1246 = vrot.lane.b32.xlu0 %v984_v1, %s9679_s21  ;;  %v6271_v12 = vpop.f32.mrb[15].mxu1 }
 0x5a6   :  { %v989_v28 = vpop.f32.mrb[16].mxu1 }
 0x5a7   :  { %v6274_v56 = vpop.f32.mrb[17].mxu1 }
 0x5aa   :  { %v1215_v22 = vpop.f32.mrb[18].mxu1 }
 0x5ab   :  { %1256 = vrot.lane.b32.xlu0 %v1215_v22, %s9677_s19  ;;  %v6298_v62 = vpop.f32.mrb[19].mxu1 }
 0x5ae   :  { %v1220_v43 = vpop.f32.mrb[20].mxu1 }
 0x5af   :  { %1236 = vrot.lane.b32.xlu0 %v753_v47, %s9681_s0  ;;  %1258 = vrot.lane.b32.xlu1 %v1220_v43, %s9677_s19  ;;  %v6301_v7 = vpop.f32.mrb[21].mxu1 }
 0x5b2   :  { %v1225_v59 = vpop.f32.mrb[22].mxu1 }
 0x5b3   :  { %v6304_v29 = vpop.f32.mrb[23].mxu1 }
 0x5e3   :  { %v1513_v49 = vpop.f32.mrb[24].mxu1 }
 0x5e4   :  { %v6328_v9 = vpop.f32.mrb[25].mxu1 }
 0x5eb   :  { %v8444_v57 = vpop.f32.mrb[26].mxu1 }
 0x5ec   :  { %v6331_v37 = vpop.f32.mrb[27].mxu1 }
 0x5ef   :  { %v8446_v58 = vpop.f32.mrb[28].mxu1 }
 0x5f0   :  { %v6334_v19 = vpop.f32.mrb[29].mxu1 }
 0x605   :  { %v1233_v42 = vpop.permute.xlu0 %1232 }
 0x606   :  { %v1265_v8 = vsel %vm290_vm4, %v8409_v2, %v1233_v42 }
 0x609   :  { %v1235_v3 = vpop.permute.xlu0 %1234 }
 0x60a   :  { %v1266_v25 = vsel %vm290_vm4, %v8411_v14, %v1235_v3 }
 0x611   :  { %v1245_v23 = vpop.permute.xlu1 %1244 }
 0x612   :  { %v1269_v24 = vsel %vm1268_vm9, %v1265_v8, %v1245_v23 }
 0x615   :  { %v1247_v4 = vpop.permute.xlu0 %1246 }
 0x616   :  { %v1270_v27 = vsel %vm1268_vm9, %v1266_v25, %v1247_v4  ;;  %v7519_v4 = vld [vmem:[%s9686_s29] sm:$0xff] }
 0x618   :  { %v1749_v63 = vpop.f32.mrb[30].mxu1 }
 0x619   :  { %2238 = vrot.lane.b32.xlu0 %v1749_v63, %s9681_s0  ;;  %v6358_v17 = vpop.f32.mrb[31].mxu1  ;;  %v5716_v63 = vld [vmem:[%s9651_s7] ss:$0 sm:$0xff] }
 0x61c   :  { %v1754_v6 = vpop.f32.mrb[32].mxu1 }
 0x61d   :  { %v1257_v20 = vpop.permute.xlu0 %1256  ;;  %1248 = vrot.lane.b32.xlu0 %v989_v28, %s9679_s21  ;;  %v6361_v13 = vpop.f32.mrb[33].mxu1 }
 0x61e   :  { %v1273_v11 = vsel %vm1272_vm10, %v1269_v24, %v1257_v20  ;;  %v7520_v24 = vld [vmem:[%s9686_s29 + $0x8] sm:$0xff] }
 0x61f   :  { %6434 = vmatmul.mubr.msk.f32.vlgmr.msra.gmra.mrb[58].mxu0 %vm68_vm0, %v1273_v11 }
 0x620   :  { %v1759_v34 = vpop.f32.mrb[34].mxu1  ;;  %6436 = vmatprep.mubr.msk.f32.mxu0 %vm7549_vm2, %v7550_v41 }
 0x621   :  { %v1259_v61 = vpop.permute.xlu1 %1258  ;;  %2240 = vrot.lane.b32.xlu0 %v1754_v6, %s9681_s0  ;;  %v6364_v44 = vpop.f32.mrb[35].mxu1 }
 0x622   :  { %v1274_v33 = vsel %vm1272_vm10, %v1270_v27, %v1259_v61  ;;  %v1237_v16 = vpop.permute.xlu0 %1236  ;;  %v7521_v61 = vld [vmem:[%s9686_s29 + $0x10] sm:$0xff] }
 0x623   :  { %6437 = vmatmul.mubr.msk.f32.gmra.mrb[60].mxu0 %vm68_vm0, %v1274_v33  ;;  %v1267_v18 = vsel %vm290_vm4, %v8413_v39, %v1237_v16 }
 0x624   :  { %v1985_v51 = vpop.f32.mrb[36].mxu1  ;;  %6439 = vmatprep.mubr.msk.f32.mxu0 %vm7549_vm2, %v7550_v41 }
 0x625   :  { %2250 = vrot.lane.b32.xlu1 %v1985_v51, %s9679_s21  ;;  %v6388_v2 = vpop.f32.mrb[37].mxu1 }
 0x628   :  { %v1990_v30 = vpop.f32.mrb[38].mxu1 }
 0x629   :  { %v6391_v14 = vpop.f32.mrb[39].mxu1 }
 0x62c   :  { %v1995_v26 = vpop.f32.mrb[40].mxu1 }
 0x62d   :  { %v6394_v35 = vpop.f32.mrb[41].mxu1 }
 0x630   :  { %v2221_v31 = vpop.f32.mrb[42].mxu1 }
 0x631   :  { %2262 = vrot.lane.b32.xlu1 %v2221_v31, %s9677_s19  ;;  %v6418_v0 = vpop.f32.mrb[43].mxu1 }
 0x632   :  { %v7522_v0 = vld [vmem:[%s9686_s29 + $0x18] sm:$0xff] }
 0x635   :  { %1260 = vrot.lane.b32.xlu1 %v1225_v59, %s9677_s19 }
 0x639   :  { %2252 = vrot.lane.b32.xlu1 %v1990_v30, %s9679_s21 }
 0x63d   :  { %2242 = vrot.lane.b32.xlu1 %v1759_v34, %s9681_s0 }
 0x665   :  { %v2226_v38 = vpop.f32.mrb[44].mxu1 }
 0x666   :  { %2264 = vrot.lane.b32.xlu0 %v2226_v38, %s9677_s19  ;;  %v6421_v32 = vpop.f32.mrb[45].mxu1 }
 0x669   :  { %v2231_v54 = vpop.f32.mrb[46].mxu1 }
 0x66a   :  { %2254 = vrot.lane.b32.xlu0 %v1995_v26, %s9679_s21  ;;  %2266 = vrot.lane.b32.xlu1 %v2231_v54, %s9677_s19  ;;  %v6424_v46 = vpop.f32.mrb[47].mxu1  ;;  %s9692_s21 = smov 104  }
 0x68b   :  { %v2239_v45 = vpop.permute.xlu0 %2238 }
 0x68c   :  { %v2271_v48 = vsel %vm290_vm4, %v1513_v49, %v2239_v45 }
 0x68f   :  { %v1249_v10 = vpop.permute.xlu0 %1248 }
 0x690   :  { %v1271_v21 = vsel %vm1268_vm9, %v1267_v18, %v1249_v10 }
 0x693   :  { %v2241_v56 = vpop.permute.xlu0 %2240 }
 0x694   :  { %v2272_v22 = vsel %vm290_vm4, %v8444_v57, %v2241_v56  ;;  %v2505_v56 = vld [vmem:[%s9654_s10 + $0x10] sm:$0xff] }
 0x697   :  { %v2251_v36 = vpop.permute.xlu1 %2250 }
 0x698   :  { %v2274_v5 = vsel %vm1268_vm9, %v2271_v48, %v2251_v36 }
 0x6a3   :  { %v2263_v47 = vpop.permute.xlu1 %2262 }
 0x6a4   :  { %v2277_v50 = vsel %vm1272_vm10, %v2274_v5, %v2263_v47  ;;  %v7523_v5 = vld [vmem:[%s9686_s29 + $0x20] sm:$0x3f]  ;;  %s7565_s29 = smov [#allocation2]  }
 0x6a5   :  { %v2283_v53 = vrot.slane %v2277_v50, 5  ;;  %s5615_s19 = sshll.u32 %s7565_s29, 4  ;;  %s5616_s19 = int_to_ptr.vmem [resolvable:$true] %s5615_s19 }
 0x6a6   :  { %p7529_p1 = scmp.lt.s32.totalorder %s5616_s19, %s5616_s19 }
 0x6a7   :  { %v1261_v52 = vpop.permute.xlu1 %1260 }
 0x6a8   :  { %v1275_v1 = vsel %vm1272_vm10, %v1271_v21, %v1261_v52 }
 0x6a9   :  { %v2289_v12 = vsel %vm438_vm6, %v1275_v1, %v2283_v53  ;;  %v2503_v1 = vld [vmem:[%s9654_s10] sm:$0xff] }
 0x6aa   :  { %6440 = vmatmul.mubr.msk.f32.gmra.mrb[62].mxu0 %vm68_vm0, %v2289_v12  ;;  %v2504_v12 = vld [vmem:[%s9654_s10 + $0x8] sm:$0xff] }
 0x6ab   :  { %6442 = vmatprep.mubr.msk.f32.mxu0 %vm7549_vm2, %v7550_v41  ;;  %v2253_v28 = vpop.permute.xlu1 %2252 }
 0x6ac   :  { %v2275_v39 = vsel %vm1268_vm9, %v2272_v22, %v2253_v28  ;;  %v6954_v28 = vpack.c.bf16 %v2504_v12, %v2503_v1  ;;  %v2506_v22 = vld [vmem:[%s9654_s10 + $0x18] sm:$0xff] }
 0x6ae   :  { %6955 = vmatpush3.bf16.msra.mxu1 %v6954_v28  ;;  %v2672_v28 = vld [vmem:[%s9656_s12 + $0x40] sm:$0xff] }
 0x6af   :  { %v2243_v62 = vpop.permute.xlu1 %2242  ;;  %6956 = vmatprep.subr.bf16.mxu1 %v7548_v40 }
 0x6b0   :  { %v2273_v29 = vsel %vm290_vm4, %v8446_v58, %v2243_v62 }
 0x6d8   :  { %v2265_v43 = vpop.permute.xlu0 %2264 }
 0x6d9   :  { %v2278_v7 = vsel %vm1272_vm10, %v2275_v39, %v2265_v43  ;;  %v6957_v39 = vpack.c.bf16 %v2506_v22, %v2505_v56  ;;  %v2673_v56 = vld [vmem:[%s9656_s12 + $0x48] sm:$0xff] }
 0x6da   :  { %v2284_v59 = vrot.slane %v2278_v7, 5  ;;  %v6972_v22 = vpack.c.bf16 %v2673_v56, %v2672_v28 }
 0x6db   :  { %6958 = vmatpush3.bf16.msra.mxu1 %v6957_v39  ;;  %v2674_v39 = vld [vmem:[%s9656_s12 + $0x50] sm:$0xff] }
 0x6dc   :  { %v2255_v49 = vpop.permute.xlu0 %2254  ;;  %v2267_v9 = vpop.permute.xlu1 %2266  ;;  %v2285_v37 = vsel %vm438_vm6, %v2283_v53, %v2284_v59  ;;  %6983 = vmatprep.subr.bf16.mxu1 %v7548_v40 }
 0x6dd   :  { %v2276_v19 = vsel %vm1268_vm9, %v2273_v29, %v2255_v49  ;;  %6443 = vmatmul.mubr.msk.f32.gmra.mrb[64].mxu0 %vm68_vm0, %v2285_v37 }
 0x6de   :  { %v2279_v57 = vsel %vm1272_vm10, %v2276_v19, %v2267_v9  ;;  %6445 = vmatprep.mubr.msk.f32.mxu0 %vm7549_vm2, %v7550_v41 }
 0x6df   :  { %v2286_v42 = vrot.slane %v2279_v57, 5 }
 0x6e1   :  { %v2287_v3 = vsel %vm438_vm6, %v2284_v59, %v2286_v42 }
 0x6e2   :  { %6446 = vmatmul.mubr.msk.f32.gmra.mrb[66].mxu0 %vm68_vm0, %v2287_v3 }
 0x6e3   :  { %6503 = vmatprep.mubr.msk.f32.mxu0 %vm7549_vm2, %v7550_v41 }
 0x6f2   :  { %v2373_v58 = vpop.f32.mrb[58].mxu0 }
 0x6f3   :  { %v2397_v17 = vadd.f32 %v7519_v4, %v2373_v58  ;;  %v6435_v23 = vpop.f32.mrb[59].mxu0 }
 0x6f5   :  { %v8506_v8 = vadd.f32 %v5716_v63, %v2397_v17 }
 0x6f6   :  { %v2378_v6 = vpop.f32.mrb[60].mxu0 }
 0x6f7   :  { %v2398_v20 = vadd.f32 %v7520_v24, %v2378_v6  ;;  %v6438_v13 = vpop.f32.mrb[61].mxu0  ;;  %v2416_v11 = vsel %vm68_vm0, %v8506_v8, 0.0 }
 0x6f8   :  { %2417 = vadd.xlane.f32.xlu0 %v2416_v11 }
 0x6f9   :  { %v8513_v25 = vadd.f32 %v5716_v63, %v2398_v20 }
 0x6fb   :  { %v2419_v34 = vsel %vm68_vm0, %v8513_v25, 0.0 }
 0x6fc   :  { %2420 = vadd.xlane.f32.xlu1 %v2419_v34  ;;  %v8573_v34 = vld [vmem:[%s9652_s8] ss:$0 sm:$0xff] }
 0x77d   :  { %v2383_v27 = vpop.f32.mrb[62].mxu0 }
 0x77e   :  { %v2399_v33 = vadd.f32 %v7521_v61, %v2383_v27  ;;  %v6441_v44 = vpop.f32.mrb[63].mxu0  ;;  %v8578_v61 = vld [vmem:[%s9653_s9] ss:$0 sm:$0xff] }
 0x780   :  { %v8520_v51 = vadd.f32 %v5716_v63, %v2399_v33 }
 0x782   :  { %v2422_v2 = vsel %vm68_vm0, %v8520_v51, 0.0 }
 0x783   :  { %2423 = vadd.xlane.f32.xlu0 %v2422_v2 }
 0x785   :  { %v2418_v30 = vpop.xlane.xlu0 %2417 }
 0x786   :  { %v2431_v14 = vmul.f32 0.03125, %v2418_v30 }
 0x788   :  { %v2436_v31 = vsub.f32 %v8506_v8, %v2431_v14 }
 0x789   :  { %v2421_v26 = vpop.xlane.xlu1 %2420 }
 0x78a   :  { %v2432_v54 = vmul.f32 0.03125, %v2421_v26  ;;  %v2441_v36 = vmul.f32 %v2436_v31, %v2436_v31 }
 0x78c   :  { %v2437_v48 = vsub.f32 %v8513_v25, %v2432_v54  ;;  %v2446_v18 = vsel %vm68_vm0, %v2441_v36, 0.0 }
 0x78e   :  { %v2442_v53 = vmul.f32 %v2437_v48, %v2437_v48 }
 0x790   :  { %v2449_v52 = vsel %vm68_vm0, %v2442_v53, 0.0  ;;  %v2670_v53 = vld [vmem:[%s9656_s12 + $0x30] sm:$0xff] }
 0x7b0   :  { %v2388_v35 = vpop.f32.mrb[64].mxu0 }
 0x7b1   :  { %v2400_v38 = vadd.f32 %v7522_v0, %v2388_v35  ;;  %v6444_v32 = vpop.f32.mrb[65].mxu0  ;;  %v2664_v35 = vld [vmem:[%s9656_s12] sm:$0xff] }
 0x7b3   :  { %v8528_v46 = vadd.f32 %v5716_v63, %v2400_v38 }
 0x7b5   :  { %v2393_v16 = vpop.f32.mrb[66].mxu0  ;;  %v2425_v45 = vsel %vm68_vm0, %v8528_v46, 0.0 }
 0x7b6   :  { %v2401_v47 = vadd.f32 %v7523_v5, %v2393_v16  ;;  %2426 = vadd.xlane.f32.xlu0 %v2425_v45  ;;  %v6447_v10 = vpop.f32.mrb[67].mxu0  ;;  %v2666_v16 = vld [vmem:[%s9656_s12 + $0x10] sm:$0xff]  ;;  %v2667_v45 = vld [vmem:[%s9656_s12 + $0x18] sm:$0xff]  ;;  %v2668_v5 = vld [vmem:[%s9656_s12 + $0x20] sm:$0xff] }
 0x7b7   :  { %v6963_v36 = vpack.c.bf16 %v2667_v45, %v2666_v16 }
 0x7b8   :  { %v8536_v50 = vadd.f32 %v5716_v63, %v2401_v47  ;;  %v2669_v47 = vld [vmem:[%s9656_s12 + $0x28] sm:$0xff] }
 0x7ba   :  { %2447 = vadd.xlane.f32.xlu0 %v2446_v18  ;;  %v2428_v21 = vsel %vm81_vm1, %v8536_v50, 0.0  ;;  %v6966_v18 = vpack.c.bf16 %v2669_v47, %v2668_v5 }
 0x7bb   :  { %2429 = vadd.xlane.f32.xlu1 %v2428_v21 }
 0x7bf   :  { %2450 = vadd.xlane.f32.xlu1 %v2449_v52  ;;  %v2671_v52 = vld [vmem:[%s9656_s12 + $0x38] sm:$0xff] }
 0x7c0   :  { %v6969_v12 = vpack.c.bf16 %v2671_v52, %v2670_v53 }
 0x810   :  { %v2424_v62 = vpop.xlane.xlu0 %2423 }
 0x811   :  { %v2433_v43 = vmul.f32 0.03125, %v2424_v62  ;;  %v2675_v62 = vld [vmem:[%s9656_s12 + $0x58] sm:$0xff] }
 0x813   :  { %v2438_v7 = vsub.f32 %v8520_v51, %v2433_v43  ;;  %v6975_v43 = vpack.c.bf16 %v2675_v62, %v2674_v39 }
 0x815   :  { %v2443_v59 = vmul.f32 %v2438_v7, %v2438_v7 }
 0x817   :  { %v2452_v29 = vsel %vm68_vm0, %v2443_v59, 0.0  ;;  %v2677_v59 = vld [vmem:[%s9656_s12 + $0x68] sm:$0xff] }
 0x818   :  { %2453 = vadd.xlane.f32.xlu0 %v2452_v29 }
 0x843   :  { %v2427_v49 = vpop.xlane.xlu0 %2426 }
 0x844   :  { %v2434_v9 = vmul.f32 0.03125, %v2427_v49  ;;  %v2678_v49 = vld [vmem:[%s9656_s12 + $0x70] sm:$0xff] }
 0x846   :  { %v8559_v37 = vsub.f32 %v8528_v46, %v2434_v9  ;;  %v2679_v9 = vld [vmem:[%s9656_s12 + $0x78] sm:$0xff] }
 0x847   :  { %v2448_v19 = vpop.xlane.xlu0 %2447 }
 0x848   :  { %v2461_v57 = vmul.f32 0.03125, %v2448_v19  ;;  %v2430_v42 = vpop.xlane.xlu1 %2429  ;;  %v2444_v3 = vmul.f32 %v8559_v37, %v8559_v37  ;;  %v6981_v19 = vpack.c.bf16 %v2679_v9, %v2678_v49 }
 0x849   :  { %v2435_v58 = vmul.f32 0.03125, %v2430_v42 }
 0x84a   :  { %v2466_v63 = vadd.f32 1e-06, %v2461_v57  ;;  %v2455_v4 = vsel %vm68_vm0, %v2444_v3, 0.0 }
 0x84b   :  { %v8565_v17 = vsub.f32 %v8536_v50, %v2435_v58  ;;  %2456 = vadd.xlane.f32.xlu1 %v2455_v4 }
 0x84c   :  { %7371 = vrsqrt.f32 %v2466_v63  ;;  %v2451_v23 = vpop.xlane.xlu1 %2450 }
 0x84d   :  { %v2462_v6 = vmul.f32 0.03125, %v2451_v23  ;;  %v2445_v24 = vmul.f32 %v8565_v17, %v8565_v17 }
 0x84f   :  { %v2467_v20 = vadd.f32 1e-06, %v2462_v6  ;;  %v2458_v13 = vsel %vm81_vm1, %v2445_v24, 0.0 }
 0x850   :  { %2459 = vadd.xlane.f32.xlu0 %v2458_v13 }
 0x851   :  { %7373 = vrsqrt.f32 %v2467_v20 }
 0x856   :  { %v7372_v11 = vpop.eup %7371 }
 0x857   :  { %v2476_v27 = vmul.f32 %v7372_v11, %v2436_v31  ;;  %v2665_v31 = vld [vmem:[%s9656_s12 + $0x8] sm:$0xff] }
 0x858   :  { %v6960_v0 = vpack.c.bf16 %v2665_v31, %v2664_v35 }
 0x859   :  { %v2487_v33 = vmul.f32 %v8573_v34, %v2476_v27 }
 0x85a   :  { %6961 = vmatpush3.bf16.msra.mxu0 %v6960_v0 }
 0x85b   :  { %v7374_v44 = vpop.eup %7373  ;;  %v2498_v2 = vadd.f32 %v8578_v61, %v2487_v33  ;;  %6962 = vmatprep.subr.bf16.mxu0 %v7548_v40 }
 0x85c   :  { %v2477_v30 = vmul.f32 %v7374_v44, %v2437_v48 }
 0x85d   :  { %6457 = vmatmul.mubr.msk.f32.vlgmr.msra.gmra.mrb[48].mxu1 %vm68_vm0, %v2498_v2 }
 0x85e   :  { %6459 = vmatprep.mubr.msk.f32.mxu1 %vm7549_vm2, %v7550_v41  ;;  %v2488_v14 = vmul.f32 %v8573_v34, %v2477_v30  ;;  %6964 = vmatpush3.bf16.msra.mxu0 %v6963_v36 }
 0x85f   :  { %6965 = vmatprep.subr.bf16.mxu0 %v7548_v40 }
 0x860   :  { %v2499_v26 = vadd.f32 %v8578_v61, %v2488_v14 }
 0x862   :  { %6460 = vmatmul.mubr.msk.f32.gmra.mrb[50].mxu1 %vm68_vm0, %v2499_v26  ;;  %6967 = vmatpush3.bf16.msra.mxu0 %v6966_v18 }
 0x863   :  { %6462 = vmatprep.mubr.msk.f32.mxu1 %vm7549_vm2, %v7550_v41  ;;  %6968 = vmatprep.subr.bf16.mxu0 %v7548_v40 }
 0x866   :  { %6970 = vmatpush3.bf16.msra.mxu0 %v6969_v12 }
 0x867   :  { %6971 = vmatprep.subr.bf16.mxu0 %v7548_v40 }
 0x86a   :  { %6973 = vmatpush3.bf16.msra.mxu0 %v6972_v22 }
 0x86b   :  { %6974 = vmatprep.subr.bf16.mxu0 %v7548_v40 }
 0x86e   :  { %6976 = vmatpush3.bf16.msra.mxu0 %v6975_v43 }
 0x86f   :  { %6977 = vmatprep.subr.bf16.mxu0 %v7548_v40 }
 0x8a5   :  { %v2454_v38 = vpop.xlane.xlu0 %2453 }
 0x8a6   :  { %v2463_v32 = vmul.f32 0.03125, %v2454_v38 }
 0x8a8   :  { %v2468_v54 = vadd.f32 1e-06, %v2463_v32 }
 0x8aa   :  { %7375 = vrsqrt.f32 %v2468_v54 }
 0x8b4   :  { %v7376_v48 = vpop.eup %7375 }
 0x8b5   :  { %v2478_v10 = vmul.f32 %v7376_v48, %v2438_v7  ;;  %v2676_v7 = vld [vmem:[%s9656_s12 + $0x60] sm:$0xff] }
 0x8b6   :  { %v6978_v29 = vpack.c.bf16 %v2677_v59, %v2676_v7 }
 0x8b7   :  { %v2489_v21 = vmul.f32 %v8573_v34, %v2478_v10 }
 0x8b8   :  { %6979 = vmatpush3.bf16.msra.mxu0 %v6978_v29 }
 0x8b9   :  { %v2500_v1 = vadd.f32 %v8578_v61, %v2489_v21  ;;  %6980 = vmatprep.subr.bf16.mxu0 %v7548_v40 }
 0x8bb   :  { %6463 = vmatmul.mubr.msk.f32.gmra.mrb[52].mxu1 %vm68_vm0, %v2500_v1 }
 0x8bc   :  { %6465 = vmatprep.mubr.msk.f32.mxu1 %vm7549_vm2, %v7550_v41  ;;  %6982 = vmatpush3.bf16.msra.mxu0 %v6981_v19 }
 0x8bd   :  { %6993 = vmatprep.subr.bf16.mxu0 %v7548_v40 }
 0x8d8   :  { %v2457_v57 = vpop.xlane.xlu1 %2456 }
 0x8d9   :  { %v2464_v42 = vmul.f32 0.03125, %v2457_v57 }
 0x8db   :  { %v2469_v3 = vadd.f32 1e-06, %v2464_v42 }
 0x8dd   :  { %7377 = vrsqrt.f32 %v2469_v3  ;;  %v2460_v58 = vpop.xlane.xlu0 %2459 }
 0x8de   :  { %v2465_v63 = vmul.f32 0.03125, %v2460_v58 }
 0x8e0   :  { %v2470_v4 = vadd.f32 1e-06, %v2465_v63 }
 0x8e2   :  { %7379 = vrsqrt.f32 %v2470_v4 }
 0x8e7   :  { %v7378_v23 = vpop.eup %7377 }
 0x8e8   :  { %v2479_v6 = vmul.f32 %v7378_v23, %v8559_v37  ;;  %v5719_v37 = vld [vmem:[%s9655_s11] ss:$0 sm:$0xff] }
 0x8ea   :  { %v2490_v24 = vmul.f32 %v8573_v34, %v2479_v6 }
 0x8ec   :  { %v7380_v20 = vpop.eup %7379  ;;  %v2501_v13 = vadd.f32 %v8578_v61, %v2490_v24 }
 0x8ed   :  { %v2480_v11 = vmul.f32 %v7380_v20, %v8565_v17 }
 0x8ee   :  { %6466 = vmatmul.mubr.msk.f32.gmra.mrb[54].mxu1 %vm68_vm0, %v2501_v13 }
 0x8ef   :  { %6468 = vmatprep.mubr.msk.f32.mxu1 %vm7549_vm2, %v7550_v41  ;;  %v2491_v27 = vmul.f32 %v8573_v34, %v2480_v11 }
 0x8f1   :  { %v2502_v33 = vadd.f32 %v8578_v61, %v2491_v27 }
 0x8f3   :  { %6469 = vmatmul.mubr.msk.f32.gmra.mrb[56].mxu1 %vm68_vm0, %v2502_v33 }
 0x8f4   :  { %6526 = vmatprep.mubr.msk.f32.mxu1 %vm7549_vm2, %v7550_v41 }
 0x930   :  { %v2595_v44 = vpop.f32.mrb[48].mxu1 }
 0x931   :  { %v2596_v17 = vadd.f32 %v5719_v37, %v2595_v44  ;;  %v6458_v2 = vpop.f32.mrb[49].mxu1 }
 0x933   :  { %v2624_v30 = vmul.f32 0.044715, %v2596_v17  ;;  %v2619_v48 = vmul.f32 0.5, %v2596_v17 }
 0x935   :  { %v2629_v14 = vmul.f32 %v2624_v30, %v2596_v17  ;;  %v2600_v26 = vpop.f32.mrb[50].mxu1 }
 0x936   :  { %v2601_v35 = vadd.f32 %v5719_v37, %v2600_v26  ;;  %v6461_v31 = vpop.f32.mrb[51].mxu1 }
 0x937   :  { %v2634_v34 = vmul.f32 %v2629_v14, %v2596_v17 }
 0x938   :  { %v2625_v0 = vmul.f32 0.044715, %v2601_v35  ;;  %v2620_v18 = vmul.f32 0.5, %v2601_v35 }
 0x939   :  { %v2639_v61 = vadd.f32 %v2634_v34, %v2596_v17 }
 0x93a   :  { %v2630_v38 = vmul.f32 %v2625_v0, %v2601_v35 }
 0x93b   :  { %v2644_v32 = vmul.f32 0.7978846, %v2639_v61 }
 0x93c   :  { %v2635_v54 = vmul.f32 %v2630_v38, %v2601_v35 }
 0x93d   :  { %7381 = vtanh.f32 %v2644_v32 }
 0x93e   :  { %v2640_v16 = vadd.f32 %v2635_v54, %v2601_v35  ;;  %v5725_v35 = vld [vmem:[%s9657_s13] ss:$0 sm:$0xff] }
 0x940   :  { %v2645_v45 = vmul.f32 0.7978846, %v2640_v16 }
 0x942   :  { %7383 = vtanh.f32 %v2645_v45 }
 0x947   :  { %v7382_v36 = vpop.eup %7381 }
 0x948   :  { %v2654_v5 = vadd.f32 1.0, %v7382_v36 }
 0x94a   :  { %v2659_v47 = vmul.f32 %v2654_v5, %v2619_v48 }
 0x94c   :  { %v7384_v10 = vpop.eup %7383  ;;  %6504 = vmatmul.mubr.f32.vlgmr.msra.gmra.mrb[68].mxu0 %v2659_v47 }
 0x94d   :  { %6506 = vmatprep.mubr.msk.f32.mxu0 %vm7549_vm2, %v7550_v41  ;;  %v2655_v21 = vadd.f32 1.0, %v7384_v10 }
 0x94f   :  { %v2660_v53 = vmul.f32 %v2655_v21, %v2620_v18 }
 0x951   :  { %6507 = vmatmul.mubr.f32.gmra.mrb[70].mxu0 %v2660_v53 }
 0x952   :  { %6509 = vmatprep.mubr.msk.f32.mxu0 %vm7549_vm2, %v7550_v41 }
 0x98e   :  { %v2605_v52 = vpop.f32.mrb[52].mxu1 }
 0x98f   :  { %v2606_v1 = vadd.f32 %v5719_v37, %v2605_v52  ;;  %v6464_v12 = vpop.f32.mrb[53].mxu1 }
 0x991   :  { %v2626_v28 = vmul.f32 0.044715, %v2606_v1  ;;  %v2621_v7 = vmul.f32 0.5, %v2606_v1 }
 0x993   :  { %v2631_v56 = vmul.f32 %v2626_v28, %v2606_v1 }
 0x995   :  { %v2636_v22 = vmul.f32 %v2631_v56, %v2606_v1 }
 0x997   :  { %v2641_v39 = vadd.f32 %v2636_v22, %v2606_v1 }
 0x999   :  { %v2646_v62 = vmul.f32 0.7978846, %v2641_v39 }
 0x99b   :  { %7385 = vtanh.f32 %v2646_v62 }
 0x9a5   :  { %v7386_v43 = vpop.eup %7385 }
 0x9a6   :  { %v2656_v59 = vadd.f32 1.0, %v7386_v43 }
 0x9a8   :  { %v2661_v29 = vmul.f32 %v2656_v59, %v2621_v7 }
 0x9aa   :  { %6510 = vmatmul.mubr.f32.gmra.mrb[72].mxu0 %v2661_v29 }
 0x9ab   :  { %6512 = vmatprep.mubr.msk.f32.mxu0 %vm7549_vm2, %v7550_v41 }
 0x9c1   :  { %v2610_v49 = vpop.f32.mrb[54].mxu1 }
 0x9c2   :  { %v2611_v9 = vadd.f32 %v5719_v37, %v2610_v49  ;;  %v6467_v19 = vpop.f32.mrb[55].mxu1 }
 0x9c3   :  { %v5730_v19 = vld [vmem:[%s9648_s4 + $0x20] sm:$0xff] }
 0x9c4   :  { %v2627_v57 = vmul.f32 0.044715, %v2611_v9  ;;  %v2622_v44 = vmul.f32 0.5, %v2611_v9 }
 0x9c6   :  { %v2632_v42 = vmul.f32 %v2627_v57, %v2611_v9  ;;  %v2615_v3 = vpop.f32.mrb[56].mxu1 }
 0x9c7   :  { %v2616_v58 = vadd.f32 %v5719_v37, %v2615_v3  ;;  %v6470_v63 = vpop.f32.mrb[57].mxu1  ;;  %v5733_v3 = vld [vmem:[%s9648_s4 + $0x38] sm:$0xff] }
 0x9c8   :  { %v2637_v4 = vmul.f32 %v2632_v42, %v2611_v9  ;;  %v5732_v42 = vld [vmem:[%s9648_s4 + $0x30] sm:$0xff] }
 0x9c9   :  { %v2628_v23 = vmul.f32 0.044715, %v2616_v58  ;;  %v2623_v37 = vmul.f32 0.5, %v2616_v58 }
 0x9ca   :  { %v2642_v6 = vadd.f32 %v2637_v4, %v2611_v9 }
 0x9cb   :  { %v2633_v24 = vmul.f32 %v2628_v23, %v2616_v58 }
 0x9cc   :  { %v2647_v20 = vmul.f32 0.7978846, %v2642_v6 }
 0x9cd   :  { %v2638_v13 = vmul.f32 %v2633_v24, %v2616_v58 }
 0x9ce   :  { %7387 = vtanh.f32 %v2647_v20 }
 0x9cf   :  { %v2643_v11 = vadd.f32 %v2638_v13, %v2616_v58  ;;  %v6987_v58 = vpack.c.bf16 %v5733_v3, %v5732_v42 }
 0x9d1   :  { %v2648_v27 = vmul.f32 0.7978846, %v2643_v11 }
 0x9d3   :  { %7389 = vtanh.f32 %v2648_v27 }
 0x9d8   :  { %v7388_v33 = vpop.eup %7387 }
 0x9d9   :  { %v2657_v17 = vadd.f32 1.0, %v7388_v33 }
 0x9db   :  { %v2662_v2 = vmul.f32 %v2657_v17, %v2622_v44 }
 0x9dd   :  { %v7390_v30 = vpop.eup %7389  ;;  %6513 = vmatmul.mubr.f32.gmra.mrb[74].mxu0 %v2662_v2 }
 0x9de   :  { %6515 = vmatprep.mubr.msk.f32.mxu0 %vm7549_vm2, %v7550_v41  ;;  %v2658_v14 = vadd.f32 1.0, %v7390_v30 }
 0x9e0   :  { %v2663_v26 = vmul.f32 %v2658_v14, %v2623_v37 }
 0x9e2   :  { %6516 = vmatmul.mubr.f32.gmra.mrb[76].mxu0 %v2663_v26 }
 0x9e3   :  { %6562 = vmatprep.mubr.msk.f32.mxu0 %vm7549_vm2, %v7550_v41 }
 0xa1f   :  { %v2753_v31 = vpop.f32.mrb[68].mxu0 }
 0xa20   :  { %v2754_v34 = vadd.f32 %v5725_v35, %v2753_v31  ;;  %v6505_v0 = vpop.f32.mrb[69].mxu0 }
 0xa22   :  { %v8680_v61 = vadd.f32 %v2754_v34, %v8506_v8 }
 0xa24   :  { %v2758_v38 = vpop.f32.mrb[70].mxu0  ;;  %v2786_v32 = vsel %vm68_vm0, %v8680_v61, 0.0 }
 0xa25   :  { %v2759_v54 = vadd.f32 %v5725_v35, %v2758_v38  ;;  %2787 = vadd.xlane.f32.xlu1 %v2786_v32  ;;  %v6508_v16 = vpop.f32.mrb[71].mxu0  ;;  %v5728_v32 = vld [vmem:[%s9687_s20 + $0x1] ss:$0 sm:$0xff] }
 0xa26   :  { %v5729_v16 = vld [vmem:[%s9647_s3 + $0x1] ss:$0 sm:$0xff] }
 0xa27   :  { %v8685_v45 = vadd.f32 %v2759_v54, %v8513_v25 }
 0xa29   :  { %v2789_v36 = vsel %vm68_vm0, %v8685_v45, 0.0 }
 0xa2a   :  { %2790 = vadd.xlane.f32.xlu0 %v2789_v36 }
 0xa7d   :  { %v2763_v48 = vpop.f32.mrb[72].mxu0 }
 0xa7e   :  { %v2764_v5 = vadd.f32 %v5725_v35, %v2763_v48  ;;  %v6511_v47 = vpop.f32.mrb[73].mxu0 }
 0xa80   :  { %v8690_v8 = vadd.f32 %v2764_v5, %v8520_v51 }
 0xa82   :  { %v2792_v10 = vsel %vm68_vm0, %v8690_v8, 0.0 }
 0xa83   :  { %2793 = vadd.xlane.f32.xlu1 %v2792_v10 }
 0xab0   :  { %v2768_v18 = vpop.f32.mrb[74].mxu0 }
 0xab1   :  { %v2769_v21 = vadd.f32 %v5725_v35, %v2768_v18  ;;  %v6514_v53 = vpop.f32.mrb[75].mxu0 }
 0xab2   :  { %v2788_v52 = vpop.xlane.xlu1 %2787 }
 0xab3   :  { %v8695_v25 = vadd.f32 %v2769_v21, %v8528_v46  ;;  %v2801_v1 = vmul.f32 0.03125, %v2788_v52 }
 0xab5   :  { %v2806_v12 = vsub.f32 %v8680_v61, %v2801_v1  ;;  %v2773_v28 = vpop.f32.mrb[76].mxu0  ;;  %v2795_v56 = vsel %vm68_vm0, %v8695_v25, 0.0 }
 0xab6   :  { %v2774_v51 = vadd.f32 %v5725_v35, %v2773_v28  ;;  %2796 = vadd.xlane.f32.xlu0 %v2795_v56  ;;  %v6517_v22 = vpop.f32.mrb[77].mxu0 }
 0xab7   :  { %v2791_v39 = vpop.xlane.xlu0 %2790  ;;  %v2811_v62 = vmul.f32 %v2806_v12, %v2806_v12 }
 0xab8   :  { %v8701_v43 = vadd.f32 %v2774_v51, %v8536_v50  ;;  %v2802_v7 = vmul.f32 0.03125, %v2791_v39  ;;  %v5731_v50 = vld [vmem:[%s9648_s4 + $0x28] sm:$0xff] }
 0xab9   :  { %v2816_v59 = vsel %vm68_vm0, %v2811_v62, 0.0  ;;  %v6984_v57 = vpack.c.bf16 %v5731_v50, %v5730_v19 }
 0xaba   :  { %v2807_v46 = vsub.f32 %v8685_v45, %v2802_v7  ;;  %2817 = vadd.xlane.f32.xlu0 %v2816_v59  ;;  %v2798_v29 = vsel %vm81_vm1, %v8701_v43, 0.0 }
 0xabb   :  { %2799 = vadd.xlane.f32.xlu1 %v2798_v29  ;;  %6985 = vmatpush3.bf16.msra.mxu1 %v6984_v57 }
 0xabc   :  { %v2812_v49 = vmul.f32 %v2807_v46, %v2807_v46  ;;  %6986 = vmatprep.subr.bf16.mxu1 %v7548_v40 }
 0xabe   :  { %v2819_v9 = vsel %vm68_vm0, %v2812_v49, 0.0 }
 0xabf   :  { %2820 = vadd.xlane.f32.xlu1 %v2819_v9  ;;  %6988 = vmatpush3.bf16.msra.mxu1 %v6987_v58 }
 0xac0   :  { %6989 = vmatprep.subr.bf16.mxu1 %v7548_v40 }
 0xb10   :  { %v2794_v63 = vpop.xlane.xlu1 %2793 }
 0xb11   :  { %v2803_v4 = vmul.f32 0.03125, %v2794_v63  ;;  %v5735_v63 = vld [vmem:[%s9649_s5 + $0x1] ss:$0 sm:$0xff]  ;;  %s9691_s5 = smov 112  }
 0xb13   :  { %v2808_v23 = vsub.f32 %v8690_v8, %v2803_v4 }
 0xb15   :  { %v2813_v6 = vmul.f32 %v2808_v23, %v2808_v23 }
 0xb17   :  { %v2822_v24 = vsel %vm68_vm0, %v2813_v6, 0.0 }
 0xb18   :  { %2823 = vadd.xlane.f32.xlu0 %v2822_v24 }
 0xb43   :  { %v2797_v20 = vpop.xlane.xlu0 %2796 }
 0xb44   :  { %v2804_v13 = vmul.f32 0.03125, %v2797_v20 }
 0xb46   :  { %v2809_v11 = vsub.f32 %v8695_v25, %v2804_v13 }
 0xb47   :  { %v2818_v27 = vpop.xlane.xlu0 %2817 }
 0xb48   :  { %v2831_v33 = vmul.f32 0.03125, %v2818_v27  ;;  %v2800_v44 = vpop.xlane.xlu1 %2799  ;;  %v2814_v17 = vmul.f32 %v2809_v11, %v2809_v11 }
 0xb49   :  { %v2805_v2 = vmul.f32 0.03125, %v2800_v44 }
 0xb4a   :  { %v2836_v30 = vadd.f32 1e-06, %v2831_v33  ;;  %v2825_v37 = vsel %vm68_vm0, %v2814_v17, 0.0 }
 0xb4b   :  { %v2810_v14 = vsub.f32 %v8701_v43, %v2805_v2  ;;  %2826 = vadd.xlane.f32.xlu1 %v2825_v37 }
 0xb4c   :  { %7391 = vrsqrt.f32 %v2836_v30  ;;  %v2821_v26 = vpop.xlane.xlu1 %2820 }
 0xb4d   :  { %v2832_v35 = vmul.f32 0.03125, %v2821_v26  ;;  %v2815_v31 = vmul.f32 %v2810_v14, %v2810_v14 }
 0xb4f   :  { %v2837_v34 = vadd.f32 1e-06, %v2832_v35  ;;  %v2828_v0 = vsel %vm81_vm1, %v2815_v31, 0.0 }
 0xb50   :  { %2829 = vadd.xlane.f32.xlu0 %v2828_v0 }
 0xb51   :  { %7393 = vrsqrt.f32 %v2837_v34 }
 0xb56   :  { %v7392_v38 = vpop.eup %7391 }
 0xb57   :  { %v2846_v54 = vmul.f32 %v7392_v38, %v2806_v12 }
 0xb59   :  { %v2857_v36 = vmul.f32 %v5728_v32, %v2846_v54 }
 0xb5b   :  { %v7394_v48 = vpop.eup %7393  ;;  %v2868_v5 = vadd.f32 %v5729_v16, %v2857_v36 }
 0xb5c   :  { %v2847_v47 = vmul.f32 %v7394_v48, %v2807_v46 }
 0xb5d   :  { %6527 = vmatmul.mubr.msk.f32.vlgmr.msra.gmra.mrb[58].mxu1 %vm68_vm0, %v2868_v5 }
 0xb5e   :  { %6529 = vmatprep.mubr.msk.f32.mxu1 %vm7549_vm2, %v7550_v41  ;;  %v2858_v10 = vmul.f32 %v5728_v32, %v2847_v47 }
 0xb60   :  { %v2869_v18 = vadd.f32 %v5729_v16, %v2858_v10 }
 0xb62   :  { %6530 = vmatmul.mubr.msk.f32.gmra.mrb[60].mxu1 %vm68_vm0, %v2869_v18 }
 0xb63   :  { %6532 = vmatprep.mubr.msk.f32.mxu1 %vm7549_vm2, %v7550_v41 }
 0xba5   :  { %v2824_v21 = vpop.xlane.xlu0 %2823 }
 0xba6   :  { %v2833_v53 = vmul.f32 0.03125, %v2824_v21 }
 0xba8   :  { %v2838_v52 = vadd.f32 1e-06, %v2833_v53 }
 0xbaa   :  { %7395 = vrsqrt.f32 %v2838_v52 }
 0xbb4   :  { %v7396_v1 = vpop.eup %7395 }
 0xbb5   :  { %v2848_v12 = vmul.f32 %v7396_v1, %v2808_v23 }
 0xbb7   :  { %v2859_v28 = vmul.f32 %v5728_v32, %v2848_v12 }
 0xbb9   :  { %v2870_v56 = vadd.f32 %v5729_v16, %v2859_v28 }
 0xbbb   :  { %6533 = vmatmul.mubr.msk.f32.gmra.mrb[62].mxu1 %vm68_vm0, %v2870_v56 }
 0xbbc   :  { %6535 = vmatprep.mubr.msk.f32.mxu1 %vm7549_vm2, %v7550_v41 }
 0xbd8   :  { %v2827_v51 = vpop.xlane.xlu1 %2826 }
 0xbd9   :  { %v2834_v22 = vmul.f32 0.03125, %v2827_v51 }
 0xbdb   :  { %v2839_v39 = vadd.f32 1e-06, %v2834_v22 }
 0xbdd   :  { %7397 = vrsqrt.f32 %v2839_v39  ;;  %v2830_v62 = vpop.xlane.xlu0 %2829 }
 0xbde   :  { %v2835_v7 = vmul.f32 0.03125, %v2830_v62 }
 0xbe0   :  { %v2840_v59 = vadd.f32 1e-06, %v2835_v7 }
 0xbe2   :  { %7399 = vrsqrt.f32 %v2840_v59 }
 0xbe7   :  { %v7398_v46 = vpop.eup %7397 }
 0xbe8   :  { %v2849_v29 = vmul.f32 %v7398_v46, %v2809_v11 }
 0xbea   :  { %v2860_v49 = vmul.f32 %v5728_v32, %v2849_v29 }
 0xbec   :  { %v7400_v9 = vpop.eup %7399  ;;  %v2871_v19 = vadd.f32 %v5729_v16, %v2860_v49 }
 0xbed   :  { %v2850_v50 = vmul.f32 %v7400_v9, %v2810_v14 }
 0xbee   :  { %6536 = vmatmul.mubr.msk.f32.gmra.mrb[64].mxu1 %vm68_vm0, %v2871_v19 }
 0xbef   :  { %6538 = vmatprep.mubr.msk.f32.mxu1 %vm7549_vm2, %v7550_v41  ;;  %v2861_v57 = vmul.f32 %v5728_v32, %v2850_v50 }
 0xbf1   :  { %v2872_v42 = vadd.f32 %v5729_v16, %v2861_v57 }
 0xbf3   :  { %6539 = vmatmul.mubr.msk.f32.gmra.mrb[66].mxu1 %vm68_vm0, %v2872_v42 }
 0xbf4   :  { %6547 = vmatprep.mubr.msk.f32.mxu1 %vm7549_vm2, %v7550_v41 }
 0xc30   :  { %v2967_v3 = vpop.f32.mrb[58].mxu1 }
 0xc31   :  { %v6528_v58 = vpop.f32.mrb[59].mxu1  ;;  %v2968_v23 = vadd.f32 %v5735_v63, %v2967_v3 }
 0xc33   :  { %v8764_v33 = vmul.f32 0.35355338, %v2968_v23 }
 0xc35   :  { %v2972_v4 = vpop.f32.mrb[60].mxu1 }
 0xc36   :  { %v2973_v6 = vadd.f32 %v5735_v63, %v2972_v4  ;;  %v6531_v24 = vpop.f32.mrb[61].mxu1 }
 0xc38   :  { %v8752_v20 = vpack.i.bf16 %v2973_v6, %v2968_v23  ;;  %v8770_v44 = vmul.f32 0.35355338, %v2973_v6 }
 0xc3a   :  { %7186 = vrot.lane.b32.xlu1 %v8752_v20, %s7551_s24 }
 0xc3e   :  { %7191 = vrot.lane.b32.xlu1 %v8752_v20, %s7553_s26 }
 0xc8e   :  { %v2977_v13 = vpop.f32.mrb[62].mxu1 }
 0xc8f   :  { %v8758_v11 = vadd.f32 %v5735_v63, %v2977_v13  ;;  %v6534_v27 = vpop.f32.mrb[63].mxu1 }
 0xc91   :  { %3240 = vrot.lane.b32.xlu1 %v8758_v11, %s7553_s26  ;;  %3001 = vrot.lane.b32.xlu0 %v8758_v11, %s7551_s24  ;;  %v8773_v17 = vmul.f32 0.35355338, %v8758_v11  ;;  %v3994_v54 = vrot.slane %v8758_v11, 3 }
 0xc93   :  { %v3987_v52 = vrot.slane %v8773_v17, 3 }
 0xc95   :  { %3230 = vrot.lane.b32.xlu1 %v8764_v33, %s7554_s27  ;;  %7196 = vrot.lane.b32.xlu0 %v8752_v20, %s7552_s25 }
 0xc99   :  { %3232 = vrot.lane.b32.xlu0 %v8770_v44, %s7554_s27  ;;  %3234 = vrot.lane.b32.xlu1 %v8773_v17, %s7554_s27 }
 0xc9d   :  { %3476 = vrot.lane.b32.xlu0 %v8758_v11, %s7552_s25  ;;  %7201 = vrot.lane.b32.xlu1 %v8752_v20, %s7556_s30 }
 0xca1   :  { %3466 = vrot.lane.b32.xlu0 %v8764_v33, %s9691_s5  ;;  %3468 = vrot.lane.b32.xlu1 %v8770_v44, %s9691_s5 }
 0xca5   :  { %3470 = vrot.lane.b32.xlu0 %v8773_v17, %s9691_s5  ;;  %3712 = vrot.lane.b32.xlu1 %v8758_v11, %s7556_s30 }
 0xca9   :  { %3702 = vrot.lane.b32.xlu1 %v8764_v33, %s9692_s21 }
 0xcac   :  { %v7187_v2 = vpop.permute.xlu1 %7186 }
 0xcad   :  { %v7189_v30 = vunpack.i.h.bf16 %v7187_v2  ;;  %v7188_v37 = vunpack.i.l.bf16 %v7187_v2  ;;  %3706 = vrot.lane.b32.xlu1 %v8773_v17, %s9692_s21 }
 0xcaf   :  { %v6990_v14 = vpack.c.bf16 %v7189_v30, %v7188_v37 }
 0xcb0   :  { %v7192_v12 = vpop.permute.xlu1 %7191 }
 0xcb1   :  { %6992 = vmatpush3.bf16.xpose.msk.msra.mxu1 %vm7870_vm5, %v6990_v14  ;;  %v7194_v28 = vunpack.i.h.bf16 %v7192_v12  ;;  %v7193_v56 = vunpack.i.l.bf16 %v7192_v12 }
 0xcb2   :  { %6545 = vmatprep.subr.mxu1 %v7550_v41 }
 0xcb3   :  { %v6997_v39 = vpack.c.bf16 %v7194_v28, %v7193_v56 }
 0xcc1   :  { %v2982_v26 = vpop.f32.mrb[64].mxu1 }
 0xcc2   :  { %v6537_v35 = vpop.f32.mrb[65].mxu1  ;;  %v2983_v31 = vadd.f32 %v5735_v63, %v2982_v26 }
 0xcc4   :  { %v3995_v0 = vrot.slane %v2983_v31, 3  ;;  %v3983_v10 = vmul.f32 0.35355338, %v2983_v31 }
 0xcc6   :  { %v2987_v34 = vpop.f32.mrb[66].mxu1  ;;  %v3996_v36 = vsel %vm1284_vm3, %v3994_v54, %v3995_v0  ;;  %v3988_v21 = vrot.slane %v3983_v10, 3 }
 0xcc7   :  { %v2988_v38 = vadd.f32 %v5735_v63, %v2987_v34  ;;  %v6540_v32 = vpop.f32.mrb[67].mxu1 }
 0xcc8   :  { %v8830_v1 = vsel %vm1284_vm3, %v3987_v52, %v3988_v21 }
 0xcc9   :  { %v8799_v16 = vrot.slane %v2988_v38, 3  ;;  %v3984_v47 = vmul.f32 0.35355338, %v2988_v38 }
 0xccb   :  { %v3998_v48 = vsel %vm1284_vm3, %v3995_v0, %v8799_v16  ;;  %v8810_v18 = vrot.slane %v3984_v47, 3 }
 0xccc   :  { %v8804_v5 = vpack.i.bf16 %v3998_v48, %v3996_v36 }
 0xccd   :  { %v8818_v53 = vsel %vm1284_vm3, %v3988_v21, %v8810_v18 }
 0xcce   :  { %7211 = vrot.lane.b32.xlu1 %v8804_v5, %s7553_s26  ;;  %7206 = vrot.lane.b32.xlu0 %v8804_v5, %s7551_s24 }
 0xcd2   :  { %7216 = vrot.lane.b32.xlu1 %v8804_v5, %s7552_s25  ;;  %3704 = vrot.lane.b32.xlu0 %v8770_v44, %s9692_s21 }
 0xcd6   :  { %4003 = vrot.lane.b32.xlu0 %v8799_v16, %s7551_s24  ;;  %4231 = vrot.lane.b32.xlu1 %v8818_v53, %s7554_s27  ;;  %s9693_s24 = smov 64  }
 0xcda   :  { %4239 = vrot.lane.b32.xlu0 %v8799_v16, %s7553_s26  ;;  %4475 = vrot.lane.b32.xlu1 %v8799_v16, %s7552_s25  ;;  %s9694_s25 = smov 56   ;;  %s9695_s26 = smov 48  }
 0xcde   :  { %4229 = vrot.lane.b32.xlu0 %v8830_v1, %s7554_s27  ;;  %4465 = vrot.lane.b32.xlu1 %v8830_v1, %s9691_s5 }
 0xce2   :  { %4233 = vrot.lane.b32.xlu0 %v8810_v18, %s7554_s27  ;;  %4469 = vrot.lane.b32.xlu1 %v8810_v18, %s9691_s5  ;;  %s9696_s27 = smov 40  }
 0xce6   :  { %7221 = vrot.lane.b32.xlu0 %v8804_v5, %s7556_s30  ;;  %4701 = vrot.lane.b32.xlu1 %v8830_v1, %s9692_s21 }
 0xcea   :  { %4467 = vrot.lane.b32.xlu0 %v8818_v53, %s9691_s5  ;;  %4705 = vrot.lane.b32.xlu1 %v8810_v18, %s9692_s21 }
 0xcee   :  { %4711 = vrot.lane.b32.xlu0 %v8799_v16, %s7556_s30  ;;  %3135 = vrot.lane.b32.xlu1 %v8758_v11, %s9693_s24  ;;  %s9697_s30 = smov 8  }
 0xcf2   :  { %4703 = vrot.lane.b32.xlu0 %v8818_v53, %s9692_s21  ;;  %7231 = vrot.lane.b32.xlu1 %v8752_v20, %s9694_s25 }
 0xcf6   :  { %7226 = vrot.lane.b32.xlu0 %v8752_v20, %s9693_s24  ;;  %7236 = vrot.lane.b32.xlu1 %v8752_v20, %s9695_s26 }
 0xcfa   :  { %3371 = vrot.lane.b32.xlu0 %v8758_v11, %s9694_s25  ;;  %7241 = vrot.lane.b32.xlu1 %v8752_v20, %s9696_s27 }
 0xcfe   :  { %3607 = vrot.lane.b32.xlu0 %v8758_v11, %s9695_s26  ;;  %7246 = vrot.lane.b32.xlu1 %v8804_v5, %s9693_s24 }
 0xd02   :  { %3843 = vrot.lane.b32.xlu0 %v8758_v11, %s9696_s27 }
 0xd03   :  { %v3002_v51 = vpop.permute.xlu0 %3001  ;;  %v3241_v22 = vpop.permute.xlu1 %3240 }
 0xd04   :  { %6546 = vmatpush3.xpose.msk.msra.mxu1 %vm290_vm4, %v3002_v51 }
 0xd05   :  { %6996 = vmatprep.subr.bf16.mxu1 %v7548_v40 }
 0xd06   :  { %4134 = vrot.lane.b32.xlu0 %v8799_v16, %s9693_s24 }
 0xd07   :  { %6548 = vmatmul.mubr.msk.f32.vlgmr.msra.gmra.mrb[68].mxu1 %vm290_vm4, %v8764_v33  ;;  %v7197_v62 = vpop.permute.xlu0 %7196  ;;  %v3231_v7 = vpop.permute.xlu1 %3230 }
 0xd08   :  { %6999 = vmatpush3.bf16.xpose.msk.msra.mxu1 %vm7870_vm5, %v6997_v39  ;;  %6550 = vmatprep.mubr.msk.f32.mxu1 %vm7549_vm2, %v7550_v41  ;;  %v7199_v59 = vunpack.i.h.bf16 %v7197_v62  ;;  %v7198_v46 = vunpack.i.l.bf16 %v7197_v62 }
 0xd09   :  { %6575 = vmatprep.subr.mxu1 %v7550_v41 }
 0xd0a   :  { %v7004_v49 = vpack.c.bf16 %v7199_v59, %v7198_v46 }
 0xd0b   :  { %6551 = vmatmul.mubr.msk.f32.gmra.mrb[70].mxu1 %vm290_vm4, %v8770_v44  ;;  %v3235_v29 = vpop.permute.xlu1 %3234  ;;  %v3233_v9 = vpop.permute.xlu0 %3232 }
 0xd0c   :  { %6553 = vmatprep.mubr.msk.f32.mxu1 %vm7549_vm2, %v7550_v41 }
 0xd0f   :  { %6554 = vmatmul.mubr.msk.f32.gmra.mrb[72].mxu1 %vm290_vm4, %v8773_v17  ;;  %v7202_v19 = vpop.permute.xlu1 %7201  ;;  %v3477_v50 = vpop.permute.xlu0 %3476 }
 0xd10   :  { %6576 = vmatpush3.xpose.msk.msra.mxu1 %vm290_vm4, %v3241_v22  ;;  %6577 = vmatprep.mubr.msk.f32.mxu1 %vm7549_vm2, %v7550_v41  ;;  %v7204_v57 = vunpack.i.h.bf16 %v7202_v19  ;;  %v7203_v42 = vunpack.i.l.bf16 %v7202_v19 }
 0xd11   :  { %7003 = vmatprep.subr.bf16.mxu1 %v7548_v40 }
 0xd12   :  { %v7011_v3 = vpack.c.bf16 %v7204_v57, %v7203_v42 }
 0xd13   :  { %6578 = vmatmul.mubr.msk.f32.vlgmr.msra.gmra.mrb[74].mxu1 %vm290_vm4, %v3231_v7  ;;  %v3467_v58 = vpop.permute.xlu0 %3466  ;;  %v3469_v63 = vpop.permute.xlu1 %3468 }
 0xd14   :  { %7006 = vmatpush3.bf16.xpose.msk.msra.mxu1 %vm7870_vm5, %v7004_v49  ;;  %6580 = vmatprep.mubr.msk.f32.mxu1 %vm7549_vm2, %v7550_v41 }
 0xd15   :  { %6605 = vmatprep.subr.mxu1 %v7550_v41 }
 0xd17   :  { %6581 = vmatmul.mubr.msk.f32.gmra.mrb[76].mxu1 %vm290_vm4, %v3233_v9  ;;  %v3713_v4 = vpop.permute.xlu1 %3712  ;;  %v3471_v23 = vpop.permute.xlu0 %3470 }
 0xd18   :  { %6583 = vmatprep.mubr.msk.f32.mxu1 %vm7549_vm2, %v7550_v41 }
 0xd1b   :  { %6584 = vmatmul.mubr.msk.f32.gmra.mrb[78].mxu1 %vm290_vm4, %v3235_v29  ;;  %v3703_v6 = vpop.permute.xlu1 %3702 }
 0xd1c   :  { %6606 = vmatpush3.xpose.msk.msra.mxu1 %vm290_vm4, %v3477_v50  ;;  %6607 = vmatprep.mubr.msk.f32.mxu1 %vm7549_vm2, %v7550_v41 }
 0xd1d   :  { %7010 = vmatprep.subr.bf16.mxu1 %v7548_v40 }
 0xd1f   :  { %6608 = vmatmul.mubr.msk.f32.vlgmr.msra.gmra.mrb[80].mxu1 %vm290_vm4, %v3467_v58  ;;  %v3707_v24 = vpop.permute.xlu1 %3706 }
 0xd20   :  { %7013 = vmatpush3.bf16.xpose.msk.msra.mxu1 %vm7870_vm5, %v7011_v3  ;;  %6610 = vmatprep.mubr.msk.f32.mxu1 %vm7549_vm2, %v7550_v41 }
 0xd21   :  { %6635 = vmatprep.subr.mxu1 %v7550_v41 }
 0xd23   :  { %6611 = vmatmul.mubr.msk.f32.gmra.mrb[82].mxu1 %vm290_vm4, %v3469_v63 }
 0xd24   :  { %6613 = vmatprep.mubr.msk.f32.mxu1 %vm7549_vm2, %v7550_v41 }
 0xd27   :  { %6614 = vmatmul.mubr.msk.f32.gmra.mrb[84].mxu1 %vm290_vm4, %v3471_v23 }
 0xd28   :  { %6636 = vmatpush3.xpose.msk.msra.mxu1 %vm290_vm4, %v3713_v4  ;;  %6637 = vmatprep.mubr.msk.f32.mxu1 %vm7549_vm2, %v7550_v41 }
 0xd29   :  { %7017 = vmatprep.subr.bf16.mxu1 %v7548_v40 }
 0xd2b   :  { %6638 = vmatmul.mubr.msk.f32.vlgmr.msra.gmra.mrb[86].mxu1 %vm290_vm4, %v3703_v6 }
 0xd2c   :  { %6640 = vmatprep.mubr.msk.f32.mxu1 %vm7549_vm2, %v7550_v41 }
 0xd40   :  { %v7207_v20 = vpop.permute.xlu0 %7206  ;;  %v7212_v13 = vpop.permute.xlu1 %7211 }
 0xd41   :  { %v7209_v11 = vunpack.i.h.bf16 %v7207_v20  ;;  %v7208_v27 = vunpack.i.l.bf16 %v7207_v20  ;;  %v7214_v30 = vunpack.i.h.bf16 %v7212_v13  ;;  %v7213_v37 = vunpack.i.l.bf16 %v7212_v13 }
 0xd43   :  { %v7018_v33 = vpack.c.bf16 %v7209_v11, %v7208_v27  ;;  %v7025_v35 = vpack.c.bf16 %v7214_v30, %v7213_v37 }
 0xd44   :  { %v3705_v44 = vpop.permute.xlu0 %3704  ;;  %v7217_v17 = vpop.permute.xlu1 %7216 }
 0xd45   :  { %6641 = vmatmul.mubr.msk.f32.gmra.mrb[88].mxu1 %vm290_vm4, %v3705_v44  ;;  %v7219_v38 = vunpack.i.h.bf16 %v7217_v17  ;;  %v7218_v32 = vunpack.i.l.bf16 %v7217_v17 }
 0xd46   :  { %7020 = vmatpush3.bf16.xpose.msk.msra.mxu1 %vm7870_vm5, %v7018_v33  ;;  %6643 = vmatprep.mubr.msk.f32.mxu1 %vm7549_vm2, %v7550_v41 }
 0xd47   :  { %6665 = vmatprep.subr.mxu1 %v7550_v41  ;;  %v7032_v48 = vpack.c.bf16 %v7219_v38, %v7218_v32 }
 0xd48   :  { %v4004_v2 = vpop.permute.xlu0 %4003  ;;  %v4232_v14 = vpop.permute.xlu1 %4231 }
 0xd49   :  { %6644 = vmatmul.mubr.msk.f32.gmra.mrb[90].mxu1 %vm290_vm4, %v3707_v24 }
 0xd4a   :  { %6667 = vmatprep.mubr.msk.f32.mxu1 %vm7549_vm2, %v7550_v41 }
 0xd4c   :  { %v4240_v26 = vpop.permute.xlu0 %4239  ;;  %v4476_v34 = vpop.permute.xlu1 %4475 }
 0xd4e   :  { %6666 = vmatpush3.xpose.msk.msra.mxu1 %vm290_vm4, %v4004_v2 }
 0xd4f   :  { %7024 = vmatprep.subr.bf16.mxu1 %v7548_v40 }
 0xd50   :  { %v4230_v31 = vpop.permute.xlu0 %4229  ;;  %v4466_v54 = vpop.permute.xlu1 %4465 }
 0xd51   :  { %6668 = vmatmul.mubr.msk.f32.vlgmr.msra.gmra.mrb[92].mxu1 %vm290_vm4, %v8830_v1 }
 0xd52   :  { %7027 = vmatpush3.bf16.xpose.msk.msra.mxu1 %vm7870_vm5, %v7025_v35  ;;  %6670 = vmatprep.mubr.msk.f32.mxu1 %vm7549_vm2, %v7550_v41 }
 0xd53   :  { %6695 = vmatprep.subr.mxu1 %v7550_v41 }
 0xd54   :  { %v4234_v0 = vpop.permute.xlu0 %4233  ;;  %v4470_v10 = vpop.permute.xlu1 %4469 }
 0xd55   :  { %6671 = vmatmul.mubr.msk.f32.gmra.mrb[94].mxu1 %vm290_vm4, %v8818_v53 }
 0xd56   :  { %6673 = vmatprep.mubr.msk.f32.mxu1 %vm7549_vm2, %v7550_v41 }
 0xd58   :  { %v7222_v36 = vpop.permute.xlu0 %7221  ;;  %v4702_v52 = vpop.permute.xlu1 %4701 }
 0xd59   :  { %6674 = vmatmul.mubr.msk.f32.gmra.mrb[96].mxu1 %vm290_vm4, %v8810_v18  ;;  %v7224_v21 = vunpack.i.h.bf16 %v7222_v36  ;;  %v7223_v53 = vunpack.i.l.bf16 %v7222_v36 }
 0xd5a   :  { %6696 = vmatpush3.xpose.msk.msra.mxu1 %vm290_vm4, %v4240_v26  ;;  %6697 = vmatprep.mubr.msk.f32.mxu1 %vm7549_vm2, %v7550_v41 }
 0xd5b   :  { %7031 = vmatprep.subr.bf16.mxu1 %v7548_v40  ;;  %v7039_v12 = vpack.c.bf16 %v7224_v21, %v7223_v53 }
 0xd5c   :  { %v4468_v47 = vpop.permute.xlu0 %4467  ;;  %v4706_v22 = vpop.permute.xlu1 %4705 }
 0xd5d   :  { %6698 = vmatmul.mubr.msk.f32.vlgmr.msra.gmra.mrb[98].mxu1 %vm290_vm4, %v4230_v31 }
 0xd5e   :  { %7034 = vmatpush3.bf16.xpose.msk.msra.mxu1 %vm7870_vm5, %v7032_v48  ;;  %6700 = vmatprep.mubr.msk.f32.mxu1 %vm7549_vm2, %v7550_v41 }
 0xd5f   :  { %6725 = vmatprep.subr.mxu1 %v7550_v41 }
 0xd60   :  { %v4712_v18 = vpop.permute.xlu0 %4711  ;;  %v3136_v62 = vpop.permute.xlu1 %3135 }
 0xd61   :  { %6701 = vmatmul.mubr.msk.f32.gmra.mrb[100].mxu1 %vm290_vm4, %v4232_v14 }
 0xd62   :  { %6703 = vmatprep.mubr.msk.f32.mxu1 %vm7549_vm2, %v7550_v41 }
 0xd64   :  { %v4704_v1 = vpop.permute.xlu0 %4703 }
 0xd65   :  { %6704 = vmatmul.mubr.msk.f32.gmra.mrb[102].mxu1 %vm290_vm4, %v4234_v0 }
 0xd66   :  { %6726 = vmatpush3.xpose.msk.msra.mxu1 %vm290_vm4, %v4476_v34  ;;  %6727 = vmatprep.mubr.msk.f32.mxu1 %vm7549_vm2, %v7550_v41 }
 0xd67   :  { %7038 = vmatprep.subr.bf16.mxu1 %v7548_v40 }
 0xd68   :  { %v7227_v28 = vpop.permute.xlu0 %7226 }
 0xd69   :  { %v7229_v56 = vunpack.i.h.bf16 %v7227_v28  ;;  %v7228_v51 = vunpack.i.l.bf16 %v7227_v28  ;;  %6728 = vmatmul.mubr.msk.f32.vlgmr.msra.gmra.mrb[104].mxu1 %vm290_vm4, %v4466_v54 }
 0xd6a   :  { %7041 = vmatpush3.bf16.xpose.msk.msra.mxu1 %vm7870_vm5, %v7039_v12  ;;  %6730 = vmatprep.mubr.msk.f32.mxu1 %vm7549_vm2, %v7550_v41 }
 0xd6b   :  { %v6994_v39 = vpack.c.bf16 %v7229_v56, %v7228_v51  ;;  %6755 = vmatprep.subr.mxu1 %v7550_v41 }
 0xd6d   :  { %6731 = vmatmul.mubr.msk.f32.gmra.mrb[106].mxu1 %vm290_vm4, %v4468_v47  ;;  %6995 = vmatpush3.bf16.msra.mxu0 %v6994_v39 }
 0xd6e   :  { %6733 = vmatprep.mubr.msk.f32.mxu1 %vm7549_vm2, %v7550_v41  ;;  %6560 = vmatprep.subr.mxu0 %v7550_v41 }
 0xd71   :  { %6734 = vmatmul.mubr.msk.f32.gmra.mrb[108].mxu1 %vm290_vm4, %v4470_v10  ;;  %6561 = vmatpush3.msk.msra.mxu0 %vm438_vm6, %v3136_v62 }
 0xd72   :  { %6756 = vmatpush3.xpose.msk.msra.mxu1 %vm290_vm4, %v4712_v18  ;;  %6757 = vmatprep.mubr.msk.f32.mxu1 %vm7549_vm2, %v7550_v41 }
 0xd73   :  { %7000 = vmatprep.subr.bf16.mxu0 %v7548_v40  ;;  %7045 = vmatprep.subr.bf16.mxu1 %v7548_v40 }
 0xd75   :  { %6758 = vmatmul.mubr.msk.f32.vlgmr.msra.gmra.mrb[110].mxu1 %vm290_vm4, %v4702_v52 }
 0xd76   :  { %6760 = vmatprep.mubr.msk.f32.mxu1 %vm7549_vm2, %v7550_v41 }
 0xd79   :  { %6761 = vmatmul.mubr.msk.f32.gmra.mrb[112].mxu1 %vm290_vm4, %v4704_v1 }
 0xd7a   :  { %6763 = vmatprep.mubr.msk.f32.mxu1 %vm7549_vm2, %v7550_v41 }
 0xd7d   :  { %6764 = vmatmul.mubr.msk.f32.gmra.mrb[114].mxu1 %vm290_vm4, %v4706_v22 }
 0xd7e   :  { %6789 = vmatprep.mubr.msk.f32.mxu1 %vm7549_vm2, %v7550_v41 }
 0xdda   :  { %v3084_v55 = vpop.f32.mrb[68].mxu1 }
 0xddb   :  { %v8991_v7 = vadd.f32 %v3084_v55, %v8004_v60  ;;  %v6549_v59 = vpop.f32.mrb[69].mxu1 }
 0xddd   :  { %v3098_v46 = vsel %vm386_vm7, %v8991_v7, -inf }
 0xdde   :  { %3099 = vmax.xlane.f32.xlu0 %v3098_v46  ;;  %v3089_v29 = vpop.f32.mrb[70].mxu1 }
 0xddf   :  { %v8996_v49 = vadd.f32 %v3089_v29, %v8004_v60  ;;  %v6552_v9 = vpop.f32.mrb[71].mxu1 }
 0xde1   :  { %v3101_v19 = vsel %vm386_vm7, %v8996_v49, -inf }
 0xde2   :  { %3102 = vmax.xlane.f32.xlu1 %v3101_v19  ;;  %v3094_v50 = vpop.f32.mrb[72].mxu1 }
 0xde3   :  { %v9001_v57 = vadd.f32 %v3094_v50, %v8004_v60  ;;  %v6555_v42 = vpop.f32.mrb[73].mxu1 }
 0xde5   :  { %v3104_v3 = vsel %vm393_vm8, %v9001_v57, -inf }
 0xde6   :  { %3105 = vmax.xlane.f32.xlu0 %v3104_v3  ;;  %v3320_v58 = vpop.f32.mrb[74].mxu1 }
 0xde7   :  { %v9006_v63 = vadd.f32 %v3320_v58, %v8004_v60  ;;  %v6579_v4 = vpop.f32.mrb[75].mxu1 }
 0xde9   :  { %v3334_v23 = vsel %vm386_vm7, %v9006_v63, -inf }
 0xdea   :  { %3335 = vmax.xlane.f32.xlu0 %v3334_v23  ;;  %v3325_v6 = vpop.f32.mrb[76].mxu1 }
 0xdeb   :  { %v9011_v24 = vadd.f32 %v3325_v6, %v8004_v60  ;;  %v6582_v20 = vpop.f32.mrb[77].mxu1 }
 0xded   :  { %v3337_v13 = vsel %vm386_vm7, %v9011_v24, -inf }
 0xdee   :  { %3338 = vmax.xlane.f32.xlu1 %v3337_v13  ;;  %v3330_v11 = vpop.f32.mrb[78].mxu1 }
 0xdef   :  { %v9016_v27 = vadd.f32 %v3330_v11, %v8004_v60  ;;  %v6585_v33 = vpop.f32.mrb[79].mxu1 }
 0xdf1   :  { %v3340_v44 = vsel %vm393_vm8, %v9016_v27, -inf }
 0xdf2   :  { %3341 = vmax.xlane.f32.xlu0 %v3340_v44  ;;  %v3556_v17 = vpop.f32.mrb[80].mxu1 }
 0xdf3   :  { %v9021_v2 = vadd.f32 %v3556_v17, %v8004_v60  ;;  %v6609_v30 = vpop.f32.mrb[81].mxu1 }
 0xdf5   :  { %v3570_v37 = vsel %vm386_vm7, %v9021_v2, -inf }
 0xdf6   :  { %3571 = vmax.xlane.f32.xlu1 %v3570_v37  ;;  %v3561_v14 = vpop.f32.mrb[82].mxu1 }
 0xdf7   :  { %v9026_v26 = vadd.f32 %v3561_v14, %v8004_v60  ;;  %v6612_v35 = vpop.f32.mrb[83].mxu1 }
 0xdf9   :  { %v3573_v31 = vsel %vm386_vm7, %v9026_v26, -inf }
 0xdfa   :  { %3574 = vmax.xlane.f32.xlu0 %v3573_v31  ;;  %v3566_v34 = vpop.f32.mrb[84].mxu1 }
 0xdfb   :  { %v9031_v0 = vadd.f32 %v3566_v34, %v8004_v60  ;;  %v6615_v38 = vpop.f32.mrb[85].mxu1 }
 0xdfd   :  { %v3576_v32 = vsel %vm393_vm8, %v9031_v0, -inf }
 0xdfe   :  { %3577 = vmax.xlane.f32.xlu1 %v3576_v32  ;;  %v3792_v54 = vpop.f32.mrb[86].mxu1 }
 0xdff   :  { %v9036_v36 = vadd.f32 %v3792_v54, %v8004_v60  ;;  %v6639_v48 = vpop.f32.mrb[87].mxu1 }
 0xe01   :  { %v3806_v47 = vsel %vm386_vm7, %v9036_v36, -inf }
 0xe02   :  { %3807 = vmax.xlane.f32.xlu0 %v3806_v47 }
 0xe18   :  { %v3797_v10 = vpop.f32.mrb[88].mxu1 }
 0xe19   :  { %v9041_v18 = vadd.f32 %v3797_v10, %v8004_v60  ;;  %v6642_v21 = vpop.f32.mrb[89].mxu1 }
 0xe1b   :  { %v3809_v53 = vsel %vm386_vm7, %v9041_v18, -inf }
 0xe1c   :  { %3810 = vmax.xlane.f32.xlu1 %v3809_v53  ;;  %v3802_v52 = vpop.f32.mrb[90].mxu1 }
 0xe1d   :  { %v9046_v1 = vadd.f32 %v3802_v52, %v8004_v60  ;;  %v6645_v12 = vpop.f32.mrb[91].mxu1 }
 0xe1f   :  { %v3812_v28 = vsel %vm393_vm8, %v9046_v1, -inf }
 0xe20   :  { %3813 = vmax.xlane.f32.xlu0 %v3812_v28 }
 0xe24   :  { %v4083_v56 = vpop.f32.mrb[92].mxu1 }
 0xe25   :  { %v9051_v51 = vadd.f32 %v4083_v56, %v8072_v15  ;;  %v6669_v22 = vpop.f32.mrb[93].mxu1 }
 0xe27   :  { %v4097_v39 = vsel %vm386_vm7, %v9051_v51, -inf }
 0xe28   :  { %4098 = vmax.xlane.f32.xlu1 %v4097_v39  ;;  %v4088_v62 = vpop.f32.mrb[94].mxu1 }
 0xe29   :  { %v9056_v55 = vadd.f32 %v4088_v62, %v8072_v15  ;;  %v6672_v60 = vpop.f32.mrb[95].mxu1 }
 0xe2b   :  { %v4100_v59 = vsel %vm386_vm7, %v9056_v55, -inf }
 0xe2c   :  { %4101 = vmax.xlane.f32.xlu0 %v4100_v59  ;;  %v4093_v46 = vpop.f32.mrb[96].mxu1 }
 0xe2d   :  { %v9061_v29 = vadd.f32 %v4093_v46, %v8072_v15  ;;  %v6675_v9 = vpop.f32.mrb[97].mxu1  ;;  %v9110_v46 = vpop.permute.xlu0 %3371 }
 0xe2e   :  { %v9112_v9 = vpop.permute.xlu1 %7231 }
 0xe2f   :  { %v4103_v19 = vsel %vm393_vm8, %v9061_v29, -inf }
 0xe30   :  { %4104 = vmax.xlane.f32.xlu1 %v4103_v19  ;;  %v4319_v50 = vpop.f32.mrb[98].mxu1 }
 0xe31   :  { %v9066_v42 = vadd.f32 %v4319_v50, %v8072_v15  ;;  %v6699_v3 = vpop.f32.mrb[99].mxu1  ;;  %v9114_v19 = vpop.permute.xlu0 %3607 }
 0xe32   :  { %v9116_v50 = vpop.permute.xlu1 %7236 }
 0xe33   :  { %v4333_v58 = vsel %vm386_vm7, %v9066_v42, -inf }
 0xe34   :  { %4334 = vmax.xlane.f32.xlu0 %v4333_v58  ;;  %v4324_v4 = vpop.f32.mrb[100].mxu1 }
 0xe35   :  { %v9071_v23 = vadd.f32 %v4324_v4, %v8072_v15  ;;  %v6702_v6 = vpop.f32.mrb[101].mxu1  ;;  %v9118_v3 = vpop.permute.xlu0 %3843 }
 0xe36   :  { %v9120_v58 = vpop.permute.xlu1 %7241 }
 0xe37   :  { %v4336_v20 = vsel %vm386_vm7, %v9071_v23, -inf }
 0xe38   :  { %4337 = vmax.xlane.f32.xlu1 %v4336_v20  ;;  %v4329_v13 = vpop.f32.mrb[102].mxu1 }
 0xe39   :  { %v9076_v11 = vadd.f32 %v4329_v13, %v8072_v15  ;;  %v6705_v33 = vpop.f32.mrb[103].mxu1  ;;  %v9122_v4 = vpop.permute.xlu0 %4134 }
 0xe3b   :  { %v4339_v44 = vsel %vm393_vm8, %v9076_v11, -inf }
 0xe3c   :  { %4340 = vmax.xlane.f32.xlu0 %v4339_v44  ;;  %v4555_v17 = vpop.f32.mrb[104].mxu1 }
 0xe3d   :  { %v9081_v30 = vadd.f32 %v4555_v17, %v8072_v15  ;;  %v6729_v37 = vpop.f32.mrb[105].mxu1 }
 0xe3f   :  { %v4569_v14 = vsel %vm386_vm7, %v9081_v30, -inf }
 0xe40   :  { %4570 = vmax.xlane.f32.xlu1 %v4569_v14  ;;  %v4560_v35 = vpop.f32.mrb[106].mxu1 }
 0xe41   :  { %v9086_v31 = vadd.f32 %v4560_v35, %v8072_v15  ;;  %v6732_v34 = vpop.f32.mrb[107].mxu1 }
 0xe43   :  { %v4572_v38 = vsel %vm386_vm7, %v9086_v31, -inf }
 0xe44   :  { %4573 = vmax.xlane.f32.xlu0 %v4572_v38  ;;  %v4565_v32 = vpop.f32.mrb[108].mxu1 }
 0xe45   :  { %v9091_v54 = vadd.f32 %v4565_v32, %v8072_v15  ;;  %v6735_v48 = vpop.f32.mrb[109].mxu1 }
 0xe47   :  { %v4575_v47 = vsel %vm393_vm8, %v9091_v54, -inf }
 0xe48   :  { %4576 = vmax.xlane.f32.xlu1 %v4575_v47  ;;  %v4791_v10 = vpop.f32.mrb[110].mxu1 }
 0xe49   :  { %v9096_v21 = vadd.f32 %v4791_v10, %v8072_v15  ;;  %v6759_v53 = vpop.f32.mrb[111].mxu1 }
 0xe4b   :  { %v4805_v52 = vsel %vm386_vm7, %v9096_v21, -inf }
 0xe4c   :  { %4806 = vmax.xlane.f32.xlu0 %v4805_v52  ;;  %v4796_v12 = vpop.f32.mrb[112].mxu1 }
 0xe4d   :  { %v9101_v28 = vadd.f32 %v4796_v12, %v8072_v15  ;;  %v6762_v56 = vpop.f32.mrb[113].mxu1 }
 0xe4f   :  { %v4808_v22 = vsel %vm386_vm7, %v9101_v28, -inf }
 0xe50   :  { %4809 = vmax.xlane.f32.xlu0 %v4808_v22  ;;  %v4801_v39 = vpop.f32.mrb[114].mxu1 }
 0xe51   :  { %v9106_v62 = vadd.f32 %v4801_v39, %v8072_v15  ;;  %v6765_v60 = vpop.f32.mrb[115].mxu1  ;;  %v9124_v15 = vpop.permute.xlu1 %7246 }
 0xe53   :  { %v4811_v59 = vsel %vm393_vm8, %v9106_v62, -inf }
 0xe54   :  { %4812 = vmax.xlane.f32.xlu0 %v4811_v59 }
 0xe6b   :  { %v3100_v6 = vpop.xlane.xlu0 %3099 }
 0xe6c   :  { %v3107_v20 = vsub.f32 %v8991_v7, %v3100_v6 }
 0xe6e   :  { %v3110_v13 = vmul.f32 1.442695, %v3107_v20 }
 0xe6f   :  { %v3103_v33 = vpop.xlane.xlu1 %3102 }
 0xe70   :  { %7401 = vpow2.f32 %v3110_v13  ;;  %v3108_v44 = vsub.f32 %v8996_v49, %v3103_v33 }
 0xe72   :  { %v3112_v17 = vmul.f32 1.442695, %v3108_v44 }
 0xe73   :  { %v3106_v37 = vpop.xlane.xlu0 %3105 }
 0xe74   :  { %7403 = vpow2.f32 %v3112_v17  ;;  %v3109_v14 = vsub.f32 %v9001_v57, %v3106_v37 }
 0xe76   :  { %v3114_v35 = vmul.f32 1.442695, %v3109_v14 }
 0xe77   :  { %v3336_v34 = vpop.xlane.xlu0 %3335 }
 0xe78   :  { %7405 = vpow2.f32 %v3114_v35  ;;  %v3343_v38 = vsub.f32 %v9006_v63, %v3336_v34 }
 0xe7a   :  { %v9130_v32 = vpop.eup %7401  ;;  %v3346_v48 = vmul.f32 1.442695, %v3343_v38 }
 0xe7b   :  { %v3116_v7 = vsel %vm386_vm7, %v9130_v32, 0.0  ;;  %v3339_v52 = vpop.xlane.xlu1 %3338 }
 0xe7c   :  { %7407 = vpow2.f32 %v3346_v48  ;;  %3117 = vadd.xlane.f32.xlu1 %v3116_v7  ;;  %v3344_v56 = vsub.f32 %v9011_v24, %v3339_v52 }
 0xe7e   :  { %v9134_v47 = vpop.eup %7403  ;;  %v3348_v60 = vmul.f32 1.442695, %v3344_v56 }
 0xe7f   :  { %v3119_v49 = vsel %vm386_vm7, %v9134_v47, 0.0  ;;  %v3342_v12 = vpop.xlane.xlu0 %3341 }
 0xe80   :  { %3120 = vadd.xlane.f32.xlu1 %v3119_v49  ;;  %v3345_v39 = vsub.f32 %v9016_v27, %v3342_v12  ;;  %7409 = vpow2.f32 %v3348_v60 }
 0xe82   :  { %v9138_v57 = vpop.eup %7405  ;;  %v3350_v13 = vmul.f32 1.442695, %v3345_v39 }
 0xe83   :  { %v3122_v10 = vsel %vm393_vm8, %v9138_v57, 0.0  ;;  %v3572_v59 = vpop.xlane.xlu1 %3571 }
 0xe84   :  { %3123 = vadd.xlane.f32.xlu1 %v3122_v10  ;;  %v3579_v33 = vsub.f32 %v9021_v2, %v3572_v59  ;;  %7411 = vpow2.f32 %v3350_v13 }
 0xe86   :  { %v9142_v63 = vpop.eup %7407  ;;  %v3582_v35 = vmul.f32 1.442695, %v3579_v33 }
 0xe87   :  { %v3352_v53 = vsel %vm386_vm7, %v9142_v63, 0.0  ;;  %v3575_v22 = vpop.xlane.xlu0 %3574 }
 0xe88   :  { %3353 = vadd.xlane.f32.xlu0 %v3352_v53  ;;  %v3580_v6 = vsub.f32 %v9026_v26, %v3575_v22 }
 0xe8a   :  { %v3584_v44 = vmul.f32 1.442695, %v3580_v6  ;;  %v9158_v7 = vpop.eup %7409 }
 0xe8b   :  { %v3578_v17 = vpop.xlane.xlu1 %3577 }
 0xe8c   :  { %v3581_v24 = vsub.f32 %v9031_v0, %v3578_v17  ;;  %7413 = vpow2.f32 %v3584_v44 }
 0xe8d   :  { %7415 = vpow2.f32 %v3582_v35 }
 0xe8e   :  { %v3586_v26 = vmul.f32 1.442695, %v3581_v24  ;;  %v9161_v0 = vpop.eup %7411 }
 0xe8f   :  { %v3808_v20 = vpop.xlane.xlu0 %3807  ;;  %v3358_v22 = vsel %vm393_vm8, %v9161_v0, 0.0 }
 0xe90   :  { %v3815_v37 = vsub.f32 %v9036_v36, %v3808_v20 }
 0xe92   :  { %v3818_v27 = vmul.f32 1.442695, %v3815_v37 }
 0xe94   :  { %7417 = vpow2.f32 %v3818_v27 }
 0xe95   :  { %4370 = vrot.lane.b32.xlu1 %v8799_v16, %s9694_s25  ;;  %7419 = vpow2.f32 %v3586_v26 }
 0xe96   :  { %v9165_v53 = vpop.eup %7413 }
 0xe97   :  { %v9168_v56 = vpop.eup %7415 }
 0xe98   :  { %v3588_v13 = vsel %vm386_vm7, %v9168_v56, 0.0 }
 0xe9e   :  { %7251 = vrot.lane.b32.xlu0 %v8804_v5, %s9694_s25  ;;  %v9174_v39 = vpop.eup %7417 }
 0xe9f   :  { %v9177_v20 = vpop.eup %7419  ;;  %v3824_v33 = vsel %vm386_vm7, %v9174_v39, 0.0 }
 0xea9   :  { %v3811_v38 = vpop.xlane.xlu1 %3810 }
 0xeaa   :  { %v3816_v2 = vsub.f32 %v9041_v18, %v3811_v38 }
 0xeac   :  { %v3820_v36 = vmul.f32 1.442695, %v3816_v2 }
 0xead   :  { %v3814_v14 = vpop.xlane.xlu0 %3813 }
 0xeae   :  { %v3817_v34 = vsub.f32 %v9046_v1, %v3814_v14  ;;  %v3355_v1 = vsel %vm386_vm7, %v9158_v7, 0.0  ;;  %v3594_v14 = vsel %vm393_vm8, %v9177_v20, 0.0 }
 0xeb0   :  { %v3822_v48 = vmul.f32 1.442695, %v3817_v34 }
 0xeb2   :  { %7421 = vpow2.f32 %v3822_v48 }
 0xeb3   :  { %7423 = vpow2.f32 %v3820_v36 }
 0xeb5   :  { %v4099_v49 = vpop.xlane.xlu1 %4098 }
 0xeb6   :  { %v4106_v10 = vsub.f32 %v9051_v51, %v4099_v49  ;;  %v3591_v51 = vsel %vm386_vm7, %v9165_v53, 0.0 }
 0xeb8   :  { %v4109_v18 = vmul.f32 1.442695, %v4106_v10 }
 0xeb9   :  { %v4102_v52 = vpop.xlane.xlu0 %4101  ;;  %3356 = vadd.xlane.f32.xlu1 %v3355_v1 }
 0xeba   :  { %v4107_v12 = vsub.f32 %v9056_v55, %v4102_v52  ;;  %7425 = vpow2.f32 %v4109_v18 }
 0xebc   :  { %v4111_v6 = vmul.f32 1.442695, %v4107_v12  ;;  %v9183_v44 = vpop.eup %7421 }
 0xebd   :  { %v4105_v60 = vpop.xlane.xlu1 %4104  ;;  %3359 = vadd.xlane.f32.xlu1 %v3358_v22  ;;  %3592 = vadd.xlane.f32.xlu0 %v3591_v51  ;;  %v3830_v35 = vsel %vm393_vm8, %v9183_v44, 0.0  ;;  %v9190_v24 = vpop.eup %7423 }
 0xebe   :  { %v4108_v59 = vsub.f32 %v9061_v29, %v4105_v60 }
 0xec0   :  { %v4113_v55 = vmul.f32 1.442695, %v4108_v59 }
 0xec1   :  { %v4335_v17 = vpop.xlane.xlu0 %4334  ;;  %3589 = vadd.xlane.f32.xlu1 %v3588_v13  ;;  %3825 = vadd.xlane.f32.xlu0 %v3824_v33 }
 0xec2   :  { %7427 = vpow2.f32 %v4113_v55  ;;  %v4342_v37 = vsub.f32 %v9066_v42, %v4335_v17  ;;  %v3827_v42 = vsel %vm386_vm7, %v9190_v24, 0.0 }
 0xec3   :  { %7429 = vpow2.f32 %v4111_v6 }
 0xec4   :  { %v4345_v29 = vmul.f32 1.442695, %v4342_v37  ;;  %v9195_v26 = vpop.eup %7425 }
 0xec5   :  { %v4338_v27 = vpop.xlane.xlu1 %4337  ;;  %3595 = vadd.xlane.f32.xlu1 %v3594_v14  ;;  %3831 = vadd.xlane.f32.xlu0 %v3830_v35  ;;  %v4115_v10 = vsel %vm386_vm7, %v9195_v26, 0.0 }
 0xec6   :  { %v4343_v34 = vsub.f32 %v9071_v23, %v4338_v27  ;;  %7431 = vpow2.f32 %v4345_v29 }
 0xec8   :  { %v4347_v38 = vmul.f32 1.442695, %v4343_v34 }
 0xec9   :  { %v4341_v2 = vpop.xlane.xlu0 %4340  ;;  %3828 = vadd.xlane.f32.xlu1 %v3827_v42 }
 0xeca   :  { %v4344_v48 = vsub.f32 %v9076_v11, %v4341_v2  ;;  %7433 = vpow2.f32 %v4347_v38 }
 0xecc   :  { %v9198_v49 = vpop.eup %7427  ;;  %v4349_v36 = vmul.f32 1.442695, %v4344_v48 }
 0xecd   :  { %v9202_v1 = vpop.eup %7429  ;;  %v4571_v23 = vpop.xlane.xlu1 %4570  ;;  %4116 = vadd.xlane.f32.xlu1 %v4115_v10  ;;  %v4121_v52 = vsel %vm393_vm8, %v9198_v49, 0.0 }
 0xece   :  { %7435 = vpow2.f32 %v4349_v36  ;;  %v4578_v18 = vsub.f32 %v9081_v30, %v4571_v23  ;;  %4122 = vadd.xlane.f32.xlu0 %v4121_v52  ;;  %v4118_v11 = vsel %vm386_vm7, %v9202_v1, 0.0 }
 0xed0   :  { %v4581_v12 = vmul.f32 1.442695, %v4578_v18  ;;  %v9209_v22 = vpop.eup %7431 }
 0xed1   :  { %v4574_v51 = vpop.xlane.xlu0 %4573  ;;  %4119 = vadd.xlane.f32.xlu1 %v4118_v11  ;;  %v4351_v6 = vsel %vm386_vm7, %v9209_v22, 0.0 }
 0xed2   :  { %7437 = vpow2.f32 %v4581_v12  ;;  %v4579_v60 = vsub.f32 %v9086_v31, %v4574_v51 }
 0xed4   :  { %v4583_v59 = vmul.f32 1.442695, %v4579_v60  ;;  %v9214_v55 = vpop.eup %7433 }
 0xed5   :  { %v4577_v13 = vpop.xlane.xlu1 %4576  ;;  %4352 = vadd.xlane.f32.xlu1 %v4351_v6  ;;  %v4354_v37 = vsel %vm386_vm7, %v9214_v55, 0.0  ;;  %v7234_v6 = vunpack.i.h.bf16 %v9112_v9 }
 0xed6   :  { %7439 = vpow2.f32 %v4583_v59  ;;  %v4580_v30 = vsub.f32 %v9091_v54, %v4577_v13  ;;  %v7233_v13 = vunpack.i.l.bf16 %v9112_v9 }
 0xed8   :  { %v9217_v33 = vpop.eup %7435  ;;  %v4585_v17 = vmul.f32 1.442695, %v4580_v30 }
 0xed9   :  { %v4807_v29 = vpop.xlane.xlu0 %4806  ;;  %4355 = vadd.xlane.f32.xlu1 %v4354_v37  ;;  %v4357_v31 = vsel %vm393_vm8, %v9217_v33, 0.0  ;;  %v7001_v37 = vpack.c.bf16 %v7234_v6, %v7233_v13 }
 0xeda   :  { %7441 = vpow2.f32 %v4585_v17  ;;  %v4814_v14 = vsub.f32 %v9096_v21, %v4807_v29  ;;  %4358 = vadd.xlane.f32.xlu0 %v4357_v31  ;;  %v7239_v31 = vunpack.i.h.bf16 %v9116_v50 }
 0xedc   :  { %v9224_v35 = vpop.eup %7437  ;;  %v4817_v27 = vmul.f32 1.442695, %v4814_v14  ;;  %v7238_v14 = vunpack.i.l.bf16 %v9116_v50 }
 0xedd   :  { %v4810_v34 = vpop.xlane.xlu0 %4809  ;;  %v4587_v54 = vsel %vm386_vm7, %v9224_v35, 0.0 }
 0xede   :  { %7443 = vpow2.f32 %v4817_v27  ;;  %v4815_v38 = vsub.f32 %v9101_v28, %v4810_v34  ;;  %4588 = vadd.xlane.f32.xlu1 %v4587_v54  ;;  %v7008_v34 = vpack.c.bf16 %v7239_v31, %v7238_v14 }
 0xee0   :  { %v9229_v42 = vpop.eup %7439  ;;  %v4819_v2 = vmul.f32 1.442695, %v4815_v38 }
 0xee1   :  { %v4590_v48 = vsel %vm386_vm7, %v9229_v42, 0.0  ;;  %v4813_v18 = vpop.xlane.xlu0 %4812 }
 0xee2   :  { %7445 = vpow2.f32 %v4819_v2  ;;  %4591 = vadd.xlane.f32.xlu1 %v4590_v48  ;;  %v4816_v12 = vsub.f32 %v9106_v62, %v4813_v18 }
 0xee4   :  { %v9233_v21 = vpop.eup %7441  ;;  %v4821_v51 = vmul.f32 1.442695, %v4816_v12 }
 0xee5   :  { %v4593_v36 = vsel %vm393_vm8, %v9233_v21, 0.0 }
 0xee6   :  { %4594 = vadd.xlane.f32.xlu1 %v4593_v36 }
 0xee8   :  { %v9237_v10 = vpop.eup %7443 }
 0xee9   :  { %v4823_v28 = vsel %vm386_vm7, %v9237_v10, 0.0 }
 0xeea   :  { %4824 = vadd.xlane.f32.xlu0 %v4823_v28 }
 0xeec   :  { %v9241_v23 = vpop.eup %7445 }
 0xeed   :  { %v4826_v52 = vsel %vm386_vm7, %v9241_v23, 0.0 }
 0xeee   :  { %4827 = vadd.xlane.f32.xlu1 %v4826_v52 }
 0xeff   :  { %4606 = vrot.lane.b32.xlu1 %v8799_v16, %s9695_s26 }
 0xf00   :  { %7256 = vrot.lane.b32.xlu0 %v8804_v5, %s9695_s26 }
 0xf03   :  { %7261 = vrot.lane.b32.xlu1 %v8804_v5, %s9696_s27 }
 0xf07   :  { %4842 = vrot.lane.b32.xlu1 %v8799_v16, %s9696_s27 }
 0xf09   :  { %v3118_v11 = vpop.xlane.xlu1 %3117 }
 0xf0a   :  { %7447 = vrcp.f32 %v3118_v11  ;;  %v7244_v11 = vunpack.i.h.bf16 %v9120_v58 }
 0xf0d   :  { %v3121_v60 = vpop.xlane.xlu1 %3120 }
 0xf0e   :  { %7449 = vrcp.f32 %v3121_v60 }
 0xf0f   :  { %7451 = vpow2.f32 %v4821_v51  ;;  %v7243_v51 = vunpack.i.l.bf16 %v9120_v58 }
 0xf11   :  { %v3124_v59 = vpop.xlane.xlu1 %3123  ;;  %v7015_v13 = vpack.c.bf16 %v7244_v11, %v7243_v51 }
 0xf12   :  { %7453 = vrcp.f32 %v3124_v59 }
 0xf14   :  { %v7448_v30 = vpop.eup %7447 }
 0xf15   :  { %v3128_v5 = vmul.f32 %v7448_v30, %v9130_v32  ;;  %v3354_v17 = vpop.xlane.xlu0 %3353  ;;  %v9286_v50 = vpop.permute.xlu1 %4370 }
 0xf16   :  { %7455 = vrcp.f32 %v3354_v17 }
 0xf17   :  { %6563 = vmatmul.mubr.msk.f32.vlgmr.msra.gmra.mrb[78].mxu0 %vm386_vm7, %v3128_v5 }
 0xf18   :  { %v7450_v16 = vpop.eup %7449  ;;  %7002 = vmatpush3.bf16.msra.mxu0 %v7001_v37  ;;  %6565 = vmatprep.mubr.msk.f32.mxu0 %vm7549_vm2, %v7550_v41 }
 0xf19   :  { %6590 = vmatprep.subr.mxu0 %v7550_v41  ;;  %v3129_v62 = vmul.f32 %v7450_v16, %v9134_v47  ;;  %v9262_v29 = vpop.eup %7451  ;;  %v9288_v54 = vpop.permute.xlu0 %7251  ;;  %v7249_v16 = vunpack.i.h.bf16 %v9124_v15 }
 0xf1a   :  { %v4829_v47 = vsel %vm393_vm8, %v9262_v29, 0.0 }
 0xf1b   :  { %6566 = vmatmul.mubr.msk.f32.gmra.mrb[80].mxu0 %vm386_vm7, %v3129_v62 }
 0xf1c   :  { %v7454_v9 = vpop.eup %7453  ;;  %6591 = vmatpush3.msk.msra.mxu0 %vm438_vm6, %v9110_v46  ;;  %6568 = vmatprep.mubr.msk.f32.mxu0 %vm7549_vm2, %v7550_v41 }
 0xf1d   :  { %v3130_v32 = vmul.f32 %v7454_v9, %v9138_v57  ;;  %7007 = vmatprep.subr.bf16.mxu0 %v7548_v40 }
 0xf1f   :  { %4830 = vadd.xlane.f32.xlu0 %v4829_v47  ;;  %6569 = vmatmul.mubr.msk.f32.gmra.mrb[82].mxu0 %vm386_vm7, %v3130_v32 }
 0xf20   :  { %v7456_v27 = vpop.eup %7455  ;;  %6592 = vmatprep.mubr.msk.f32.mxu0 %vm7549_vm2, %v7550_v41 }
 0xf21   :  { %v3364_v46 = vmul.f32 %v7456_v27, %v9142_v63  ;;  %v7254_v27 = vunpack.i.h.bf16 %v9288_v54 }
 0xf23   :  { %6593 = vmatmul.mubr.msk.f32.vlgmr.msra.gmra.mrb[84].mxu0 %vm386_vm7, %v3364_v46 }
 0xf24   :  { %7009 = vmatpush3.bf16.msra.mxu0 %v7008_v34  ;;  %6595 = vmatprep.mubr.msk.f32.mxu0 %vm7549_vm2, %v7550_v41 }
 0xf25   :  { %6620 = vmatprep.subr.mxu0 %v7550_v41 }
 0xf28   :  { %6621 = vmatpush3.msk.msra.mxu0 %vm438_vm6, %v9114_v19 }
 0xf29   :  { %7014 = vmatprep.subr.bf16.mxu0 %v7548_v40 }
 0xf46   :  { %v3357_v57 = vpop.xlane.xlu1 %3356 }
 0xf47   :  { %7457 = vrcp.f32 %v3357_v57 }
 0xf4a   :  { %v3360_v63 = vpop.xlane.xlu1 %3359  ;;  %v3593_v38 = vpop.xlane.xlu0 %3592 }
 0xf4b   :  { %7459 = vrcp.f32 %v3360_v63 }
 0xf4e   :  { %v3590_v2 = vpop.xlane.xlu1 %3589  ;;  %v3826_v52 = vpop.xlane.xlu0 %3825 }
 0xf4f   :  { %7461 = vrcp.f32 %v3590_v2 }
 0xf50   :  { %7463 = vrcp.f32 %v3593_v38 }
 0xf51   :  { %v7458_v48 = vpop.eup %7457 }
 0xf52   :  { %v3596_v36 = vpop.xlane.xlu1 %3595  ;;  %v3365_v28 = vmul.f32 %v7458_v48, %v9158_v7  ;;  %v3832_v58 = vpop.xlane.xlu0 %3831 }
 0xf53   :  { %7465 = vrcp.f32 %v3596_v36 }
 0xf54   :  { %6596 = vmatmul.mubr.msk.f32.gmra.mrb[86].mxu0 %vm386_vm7, %v3365_v28  ;;  %7467 = vrcp.f32 %v3826_v52 }
 0xf55   :  { %v7460_v19 = vpop.eup %7459  ;;  %6598 = vmatprep.mubr.msk.f32.mxu0 %vm7549_vm2, %v7550_v41 }
 0xf56   :  { %v3829_v18 = vpop.xlane.xlu1 %3828  ;;  %v3366_v12 = vmul.f32 %v7460_v19, %v9161_v0 }
 0xf57   :  { %7469 = vrcp.f32 %v3829_v18 }
 0xf58   :  { %6599 = vmatmul.mubr.msk.f32.gmra.mrb[88].mxu0 %vm386_vm7, %v3366_v12  ;;  %7471 = vrcp.f32 %v3832_v58 }
 0xf59   :  { %v7462_v60 = vpop.eup %7461  ;;  %6622 = vmatprep.mubr.msk.f32.mxu0 %vm7549_vm2, %v7550_v41 }
 0xf5a   :  { %v3600_v7 = vmul.f32 %v7462_v60, %v9168_v56  ;;  %v4117_v59 = vpop.xlane.xlu1 %4116  ;;  %v7464_v6 = vpop.eup %7463 }
 0xf5b   :  { %v3601_v30 = vmul.f32 %v7464_v6, %v9165_v53  ;;  %v7248_v53 = vunpack.i.l.bf16 %v9124_v15  ;;  %7473 = vrcp.f32 %v4117_v59 }
 0xf5c   :  { %6623 = vmatmul.mubr.msk.f32.vlgmr.msra.gmra.mrb[90].mxu0 %vm386_vm7, %v3600_v7 }
 0xf5d   :  { %7016 = vmatpush3.bf16.msra.mxu0 %v7015_v13  ;;  %6625 = vmatprep.mubr.msk.f32.mxu0 %vm7549_vm2, %v7550_v41  ;;  %v7466_v5 = vpop.eup %7465  ;;  %v7022_v32 = vpack.c.bf16 %v7249_v16, %v7248_v53 }
 0xf5e   :  { %v4120_v0 = vpop.xlane.xlu1 %4119  ;;  %6650 = vmatprep.subr.mxu0 %v7550_v41  ;;  %v3602_v17 = vmul.f32 %v7466_v5, %v9177_v20  ;;  %v7468_v37 = vpop.eup %7467 }
 0xf5f   :  { %7475 = vrcp.f32 %v4120_v0  ;;  %v4123_v20 = vpop.xlane.xlu0 %4122 }
 0xf60   :  { %6626 = vmatmul.mubr.msk.f32.gmra.mrb[92].mxu0 %vm386_vm7, %v3601_v30  ;;  %7477 = vrcp.f32 %v4123_v20 }
 0xf61   :  { %6651 = vmatpush3.msk.msra.mxu0 %vm438_vm6, %v9118_v3  ;;  %6628 = vmatprep.mubr.msk.f32.mxu0 %vm7549_vm2, %v7550_v41  ;;  %v3836_v3 = vmul.f32 %v7468_v37, %v9174_v39  ;;  %v7470_v9 = vpop.eup %7469 }
 0xf62   :  { %v4353_v56 = vpop.xlane.xlu1 %4352  ;;  %7021 = vmatprep.subr.bf16.mxu0 %v7548_v40  ;;  %v3837_v15 = vmul.f32 %v7470_v9, %v9190_v24  ;;  %v7472_v31 = vpop.eup %7471  ;;  %v7253_v24 = vunpack.i.l.bf16 %v9288_v54 }
 0xf63   :  { %v3838_v39 = vmul.f32 %v7472_v31, %v9183_v44  ;;  %7479 = vrcp.f32 %v4353_v56 }
 0xf64   :  { %6629 = vmatmul.mubr.msk.f32.gmra.mrb[94].mxu0 %vm386_vm7, %v3602_v17  ;;  %v7029_v57 = vpack.c.bf16 %v7254_v27, %v7253_v24  ;;  %v5824_v27 = vld [vmem:[%s9650_s6 + $0x38] sm:$0xff] }
 0xf65   :  { %6652 = vmatprep.mubr.msk.f32.mxu0 %vm7549_vm2, %v7550_v41  ;;  %v7474_v47 = vpop.eup %7473 }
 0xf66   :  { %v4356_v62 = vpop.xlane.xlu1 %4355 }
 0xf67   :  { %v4359_v63 = vpop.xlane.xlu0 %4358  ;;  %7481 = vrcp.f32 %v4356_v62 }
 0xf68   :  { %6653 = vmatmul.mubr.msk.f32.vlgmr.msra.gmra.mrb[96].mxu0 %vm386_vm7, %v3836_v3  ;;  %7483 = vrcp.f32 %v4359_v63 }
 0xf69   :  { %7023 = vmatpush3.bf16.msra.mxu0 %v7022_v32  ;;  %6655 = vmatprep.mubr.msk.f32.mxu0 %vm7549_vm2, %v7550_v41  ;;  %v7476_v34 = vpop.eup %7475 }
 0xf6a   :  { %6680 = vmatprep.subr.mxu0 %v7550_v41  ;;  %v4128_v44 = vmul.f32 %v7476_v34, %v9202_v1  ;;  %v7478_v54 = vpop.eup %7477 }
 0xf6b   :  { %v4589_v14 = vpop.xlane.xlu1 %4588 }
 0xf6c   :  { %6656 = vmatmul.mubr.msk.f32.gmra.mrb[98].mxu0 %vm386_vm7, %v3837_v15  ;;  %7485 = vrcp.f32 %v4589_v14  ;;  %v5822_v15 = vld [vmem:[%s9650_s6 + $0x28] sm:$0xff] }
 0xf6d   :  { %6681 = vmatpush3.msk.msra.mxu0 %vm438_vm6, %v9122_v4  ;;  %6658 = vmatprep.mubr.msk.f32.mxu0 %vm7549_vm2, %v7550_v41  ;;  %v4127_v4 = vmul.f32 %v7474_v47, %v9195_v26  ;;  %v4129_v26 = vmul.f32 %v7478_v54, %v9198_v49  ;;  %v7480_v48 = vpop.eup %7479  ;;  %v5823_v47 = vld [vmem:[%s9650_s6 + $0x30] sm:$0xff] }
 0xf6e   :  { %7028 = vmatprep.subr.bf16.mxu0 %v7548_v40 }
 0xf6f   :  { %v4592_v46 = vpop.xlane.xlu1 %4591 }
 0xf70   :  { %6659 = vmatmul.mubr.msk.f32.gmra.mrb[100].mxu0 %vm386_vm7, %v3838_v39  ;;  %7487 = vrcp.f32 %v4592_v46  ;;  %v7049_v46 = vpack.c.bf16 %v5824_v27, %v5823_v47 }
 0xf71   :  { %6682 = vmatprep.mubr.msk.f32.mxu0 %vm7549_vm2, %v7550_v41  ;;  %v7482_v18 = vpop.eup %7481 }
 0xf72   :  { %v4364_v49 = vmul.f32 %v7482_v18, %v9214_v55  ;;  %v7484_v11 = vpop.eup %7483 }
 0xf73   :  { %v4595_v38 = vpop.xlane.xlu1 %4594 }
 0xf74   :  { %6683 = vmatmul.mubr.msk.f32.vlgmr.msra.gmra.mrb[102].mxu0 %vm386_vm7, %v4127_v4  ;;  %7489 = vrcp.f32 %v4595_v38 }
 0xf75   :  { %7030 = vmatpush3.bf16.msra.mxu0 %v7029_v57  ;;  %6685 = vmatprep.mubr.msk.f32.mxu0 %vm7549_vm2, %v7550_v41 }
 0xf76   :  { %6710 = vmatprep.subr.mxu0 %v7550_v41  ;;  %v7486_v60 = vpop.eup %7485 }
 0xf77   :  { %v4825_v2 = vpop.xlane.xlu0 %4824  ;;  %v4599_v55 = vmul.f32 %v7486_v60, %v9224_v35 }
 0xf78   :  { %6686 = vmatmul.mubr.msk.f32.gmra.mrb[104].mxu0 %vm386_vm7, %v4128_v44  ;;  %7491 = vrcp.f32 %v4825_v2 }
 0xf79   :  { %6711 = vmatpush3.msk.msra.mxu0 %vm438_vm6, %v9286_v50  ;;  %6688 = vmatprep.mubr.msk.f32.mxu0 %vm7549_vm2, %v7550_v41  ;;  %v4363_v50 = vmul.f32 %v7480_v48, %v9209_v22  ;;  %v4365_v22 = vmul.f32 %v7484_v11, %v9217_v33 }
 0xf7a   :  { %7035 = vmatprep.subr.bf16.mxu0 %v7548_v40  ;;  %v7488_v6 = vpop.eup %7487 }
 0xf7b   :  { %v4828_v36 = vpop.xlane.xlu1 %4827  ;;  %v7257_v28 = vpop.permute.xlu0 %7256  ;;  %v4600_v33 = vmul.f32 %v7488_v6, %v9229_v42 }
 0xf7c   :  { %v7259_v1 = vunpack.i.h.bf16 %v7257_v28  ;;  %v7258_v19 = vunpack.i.l.bf16 %v7257_v28  ;;  %6689 = vmatmul.mubr.msk.f32.gmra.mrb[106].mxu0 %vm386_vm7, %v4129_v26  ;;  %7493 = vrcp.f32 %v4828_v36 }
 0xf7d   :  { %6712 = vmatprep.mubr.msk.f32.mxu0 %vm7549_vm2, %v7550_v41 }
 0xf7e   :  { %v7036_v52 = vpack.c.bf16 %v7259_v1, %v7258_v19  ;;  %v7490_v58 = vpop.eup %7489 }
 0xf7f   :  { %v4607_v12 = vpop.permute.xlu1 %4606  ;;  %v4601_v35 = vmul.f32 %v7490_v58, %v9233_v21 }
 0xf80   :  { %6713 = vmatmul.mubr.msk.f32.vlgmr.msra.gmra.mrb[108].mxu0 %vm386_vm7, %v4363_v50 }
 0xf81   :  { %7037 = vmatpush3.bf16.msra.mxu0 %v7036_v52  ;;  %6715 = vmatprep.mubr.msk.f32.mxu0 %vm7549_vm2, %v7550_v41 }
 0xf82   :  { %6740 = vmatprep.subr.mxu0 %v7550_v41  ;;  %v7492_v30 = vpop.eup %7491 }
 0xf83   :  { %v7262_v51 = vpop.permute.xlu1 %7261  ;;  %v4835_v42 = vmul.f32 %v7492_v30, %v9237_v10 }
 0xf84   :  { %6716 = vmatmul.mubr.msk.f32.gmra.mrb[110].mxu0 %vm386_vm7, %v4364_v49  ;;  %v7264_v7 = vunpack.i.h.bf16 %v7262_v51  ;;  %v7263_v59 = vunpack.i.l.bf16 %v7262_v51 }
 0xf85   :  { %6741 = vmatpush3.msk.msra.mxu0 %vm438_vm6, %v4607_v12  ;;  %6718 = vmatprep.mubr.msk.f32.mxu0 %vm7549_vm2, %v7550_v41 }
 0xf86   :  { %7042 = vmatprep.subr.bf16.mxu0 %v7548_v40  ;;  %v7043_v13 = vpack.c.bf16 %v7264_v7, %v7263_v59  ;;  %v7494_v5 = vpop.eup %7493 }
 0xf87   :  { %v4843_v0 = vpop.permute.xlu1 %4842  ;;  %v4836_v56 = vmul.f32 %v7494_v5, %v9241_v23 }
 0xf88   :  { %6719 = vmatmul.mubr.msk.f32.gmra.mrb[112].mxu0 %vm386_vm7, %v4365_v22 }
 0xf89   :  { %6742 = vmatprep.mubr.msk.f32.mxu0 %vm7549_vm2, %v7550_v41 }
 0xf8c   :  { %6743 = vmatmul.mubr.msk.f32.vlgmr.msra.gmra.mrb[114].mxu0 %vm386_vm7, %v4599_v55 }
 0xf8d   :  { %7044 = vmatpush3.bf16.msra.mxu0 %v7043_v13  ;;  %6745 = vmatprep.mubr.msk.f32.mxu0 %vm7549_vm2, %v7550_v41 }
 0xf8e   :  { %6770 = vmatprep.subr.mxu0 %v7550_v41 }
 0xf90   :  { %6746 = vmatmul.mubr.msk.f32.gmra.mrb[116].mxu0 %vm386_vm7, %v4600_v33 }
 0xf91   :  { %6771 = vmatpush3.msk.msra.mxu0 %vm438_vm6, %v4843_v0  ;;  %6748 = vmatprep.mubr.msk.f32.mxu0 %vm7549_vm2, %v7550_v41 }
 0xf92   :  { %7051 = vmatprep.subr.bf16.mxu0 %v7548_v40 }
 0xf94   :  { %6749 = vmatmul.mubr.msk.f32.gmra.mrb[118].mxu0 %vm386_vm7, %v4601_v35 }
 0xf95   :  { %6772 = vmatprep.mubr.msk.f32.mxu0 %vm7549_vm2, %v7550_v41 }
 0xf98   :  { %6773 = vmatmul.mubr.msk.f32.vlgmr.msra.gmra.mrb[120].mxu0 %vm386_vm7, %v4835_v42 }
 0xf99   :  { %6775 = vmatprep.mubr.msk.f32.mxu0 %vm7549_vm2, %v7550_v41 }
 0xf9c   :  { %6776 = vmatmul.mubr.msk.f32.gmra.mrb[122].mxu0 %vm386_vm7, %v4836_v56 }
 0xf9d   :  { %6778 = vmatprep.mubr.msk.f32.mxu0 %vm7549_vm2, %v7550_v41 }
 0xfac   :  { %v4831_v21 = vpop.xlane.xlu0 %4830 }
 0xfad   :  { %7495 = vrcp.f32 %v4831_v21 }
 0xfb7   :  { %v7496_v17 = vpop.eup %7495 }
 0xfb8   :  { %v4837_v37 = vmul.f32 %v7496_v17, %v9262_v29  ;;  %v5821_v29 = vld [vmem:[%s9650_s6 + $0x20] sm:$0xff]  ;;  %s9699_s6 = smov 24  }
 0xfb9   :  { %v7046_v14 = vpack.c.bf16 %v5822_v15, %v5821_v29 }
 0xfba   :  { %6779 = vmatmul.mubr.msk.f32.gmra.mrb[124].mxu0 %vm386_vm7, %v4837_v37 }
 0xfbb   :  { %6812 = vmatprep.mubr.msk.f32.mxu0 %vm7549_vm2, %v7550_v41  ;;  %7047 = vmatpush3.bf16.msra.mxu1 %v7046_v14 }
 0xfbc   :  { %7048 = vmatprep.subr.bf16.mxu1 %v7548_v40 }
 0xfbf   :  { %7050 = vmatpush3.bf16.msra.mxu1 %v7049_v46 }
 0xfc0   :  { %7057 = vmatprep.subr.bf16.mxu1 %v7548_v40 }
 0xfea   :  { %v9394_v10 = vpop.f32.mrb[78].mxu0 }
 0xfeb   :  { %v6564_v16 = vpop.f32.mrb[79].mxu0 }
 0xfee   :  { %v9396_v53 = vpop.f32.mrb[80].mxu0 }
 0xfef   :  { %v6567_v23 = vpop.f32.mrb[81].mxu0 }
 0xff2   :  { %v9398_v3 = vpop.f32.mrb[82].mxu0 }
 0xff3   :  { %v6570_v62 = vpop.f32.mrb[83].mxu0 }
 0xff6   :  { %v3452_v9 = vpop.f32.mrb[84].mxu0 }
 0xff7   :  { %3941 = vrot.lane.b32.xlu1 %v3452_v9, %s9697_s30  ;;  %v6594_v32 = vpop.f32.mrb[85].mxu0 }
0x1027   :  { %v3457_v20 = vpop.f32.mrb[86].mxu0 }
0x1028   :  { %3943 = vrot.lane.b32.xlu1 %v3457_v20, %s9697_s30  ;;  %v6597_v31 = vpop.f32.mrb[87].mxu0 }
0x102b   :  { %v3462_v39 = vpop.f32.mrb[88].mxu0 }
0x102c   :  { %3945 = vrot.lane.b32.xlu0 %v3462_v39, %s9697_s30  ;;  %v6600_v24 = vpop.f32.mrb[89].mxu0 }
0x102f   :  { %v3688_v4 = vpop.f32.mrb[90].mxu0 }
0x1030   :  { %3953 = vrot.lane.b32.xlu0 %v3688_v4, %s9698_s2  ;;  %v6624_v34 = vpop.f32.mrb[91].mxu0 }
0x1033   :  { %v3693_v57 = vpop.f32.mrb[92].mxu0 }
0x1034   :  { %3955 = vrot.lane.b32.xlu1 %v3693_v57, %s9698_s2  ;;  %v6627_v63 = vpop.f32.mrb[93].mxu0 }
0x1037   :  { %v3698_v44 = vpop.f32.mrb[94].mxu0 }
0x1038   :  { %3957 = vrot.lane.b32.xlu0 %v3698_v44, %s9698_s2  ;;  %v6630_v54 = vpop.f32.mrb[95].mxu0 }
0x103b   :  { %v3924_v38 = vpop.f32.mrb[96].mxu0 }
0x103c   :  { %3965 = vrot.lane.b32.xlu1 %v3924_v38, %s9699_s6  ;;  %v6654_v2 = vpop.f32.mrb[97].mxu0 }
0x103f   :  { %v3929_v26 = vpop.f32.mrb[98].mxu0 }
0x1040   :  { %3967 = vrot.lane.b32.xlu1 %v3929_v26, %s9699_s6  ;;  %v6657_v48 = vpop.f32.mrb[99].mxu0 }
0x1043   :  { %v3934_v36 = vpop.f32.mrb[100].mxu0 }
0x1044   :  { %3969 = vrot.lane.b32.xlu1 %v3934_v36, %s9699_s6  ;;  %v6660_v28 = vpop.f32.mrb[101].mxu0 }
0x1047   :  { %v4215_v1 = vpop.f32.mrb[102].mxu0 }
0x1048   :  { %v6684_v19 = vpop.f32.mrb[103].mxu0 }
0x104b   :  { %v9423_v50 = vpop.f32.mrb[104].mxu0 }
0x104c   :  { %v6687_v52 = vpop.f32.mrb[105].mxu0 }
0x104f   :  { %v9425_v18 = vpop.f32.mrb[106].mxu0 }
0x1050   :  { %v6690_v12 = vpop.f32.mrb[107].mxu0 }
0x1053   :  { %v4451_v49 = vpop.f32.mrb[108].mxu0 }
0x1054   :  { %4940 = vrot.lane.b32.xlu1 %v4451_v49, %s9697_s30  ;;  %v6714_v11 = vpop.f32.mrb[109].mxu0 }
0x1057   :  { %v4456_v51 = vpop.f32.mrb[110].mxu0 }
0x1058   :  { %4942 = vrot.lane.b32.xlu0 %v4456_v51, %s9697_s30  ;;  %v6717_v22 = vpop.f32.mrb[111].mxu0 }
0x105b   :  { %v4461_v60 = vpop.f32.mrb[112].mxu0 }
0x105c   :  { %v6720_v7 = vpop.f32.mrb[113].mxu0 }
0x105d   :  { %v5831_v7 = vld [vmem:[%s9651_s7 + $0x1] ss:$0 sm:$0xff] }
0x105f   :  { %v4687_v59 = vpop.f32.mrb[114].mxu0 }
0x1060   :  { %4952 = vrot.lane.b32.xlu1 %v4687_v59, %s9698_s2  ;;  %v6744_v55 = vpop.f32.mrb[115].mxu0 }
0x1063   :  { %v4692_v6 = vpop.f32.mrb[116].mxu0 }
0x1064   :  { %4954 = vrot.lane.b32.xlu1 %v4692_v6, %s9698_s2  ;;  %v6747_v13 = vpop.f32.mrb[117].mxu0 }
0x1067   :  { %v4697_v33 = vpop.f32.mrb[118].mxu0 }
0x1068   :  { %v6750_v58 = vpop.f32.mrb[119].mxu0 }
0x1069   :  { %v3942_v21 = vpop.permute.xlu1 %3941 }
0x106a   :  { %v3974_v62 = vsel %vm290_vm4, %v9394_v10, %v3942_v21 }
0x106b   :  { %v4923_v0 = vpop.f32.mrb[120].mxu0 }
0x106c   :  { %4964 = vrot.lane.b32.xlu1 %v4923_v0, %s9699_s6  ;;  %v6774_v35 = vpop.f32.mrb[121].mxu0 }
0x106f   :  { %v4928_v30 = vpop.f32.mrb[122].mxu0 }
0x1070   :  { %4944 = vrot.lane.b32.xlu1 %v4461_v60, %s9697_s30  ;;  %4966 = vrot.lane.b32.xlu0 %v4928_v30, %s9699_s6  ;;  %v6777_v42 = vpop.f32.mrb[123].mxu0 }
0x1074   :  { %4956 = vrot.lane.b32.xlu0 %v4697_v33, %s9698_s2 }
0x108d   :  { %v4933_v5 = vpop.f32.mrb[124].mxu0 }
0x108e   :  { %4968 = vrot.lane.b32.xlu1 %v4933_v5, %s9699_s6  ;;  %v6780_v56 = vpop.f32.mrb[125].mxu0 }
0x109a   :  { %v3944_v37 = vpop.permute.xlu1 %3943 }
0x109b   :  { %v3975_v29 = vsel %vm290_vm4, %v9396_v53, %v3944_v37 }
0x109e   :  { %v3946_v17 = vpop.permute.xlu0 %3945 }
0x109f   :  { %v3976_v57 = vsel %vm290_vm4, %v9398_v3, %v3946_v17 }
0x10a2   :  { %v3954_v23 = vpop.permute.xlu0 %3953 }
0x10a3   :  { %v3977_v9 = vsel %vm1268_vm9, %v3974_v62, %v3954_v23 }
0x10a6   :  { %v3956_v16 = vpop.permute.xlu1 %3955 }
0x10a7   :  { %v3978_v15 = vsel %vm1268_vm9, %v3975_v29, %v3956_v16 }
0x10aa   :  { %v3958_v27 = vpop.permute.xlu0 %3957 }
0x10ab   :  { %v3979_v44 = vsel %vm1268_vm9, %v3976_v57, %v3958_v27  ;;  %v5836_v27 = vld [vmem:[%s9654_s10 + $0x20] sm:$0xff] }
0x10ae   :  { %v3966_v32 = vpop.permute.xlu1 %3965 }
0x10af   :  { %v3980_v20 = vsel %vm1272_vm10, %v3977_v9, %v3966_v32 }
0x10b0   :  { %6790 = vmatmul.mubr.msk.f32.vlgmr.msra.gmra.mrb[116].mxu1 %vm68_vm0, %v3980_v20 }
0x10b1   :  { %6792 = vmatprep.mubr.msk.f32.mxu1 %vm7549_vm2, %v7550_v41 }
0x10b2   :  { %v3968_v31 = vpop.permute.xlu1 %3967 }
0x10b3   :  { %v3981_v14 = vsel %vm1272_vm10, %v3978_v15, %v3968_v31 }
0x10b4   :  { %6793 = vmatmul.mubr.msk.f32.gmra.mrb[118].mxu1 %vm68_vm0, %v3981_v14 }
0x10b5   :  { %6795 = vmatprep.mubr.msk.f32.mxu1 %vm7549_vm2, %v7550_v41 }
0x10b6   :  { %v3970_v10 = vpop.permute.xlu1 %3969 }
0x10b7   :  { %v3982_v38 = vsel %vm1272_vm10, %v3979_v44, %v3970_v10 }
0x10c6   :  { %v4941_v39 = vpop.permute.xlu1 %4940 }
0x10c7   :  { %v4973_v53 = vsel %vm290_vm4, %v4215_v1, %v4941_v39 }
0x10ca   :  { %v4943_v46 = vpop.permute.xlu0 %4942 }
0x10cb   :  { %v4974_v2 = vsel %vm290_vm4, %v9423_v50, %v4943_v46  ;;  %v5838_v46 = vld [vmem:[%s9654_s10 + $0x30] sm:$0xff] }
0x10d2   :  { %v4953_v47 = vpop.permute.xlu1 %4952 }
0x10d3   :  { %v4976_v4 = vsel %vm1268_vm9, %v4973_v53, %v4953_v47 }
0x10d6   :  { %v4955_v24 = vpop.permute.xlu1 %4954 }
0x10d7   :  { %v4977_v26 = vsel %vm1268_vm9, %v4974_v2, %v4955_v24  ;;  %v5837_v24 = vld [vmem:[%s9654_s10 + $0x28] sm:$0xff] }
0x10d8   :  { %v7052_v53 = vpack.c.bf16 %v5837_v24, %v5836_v27  ;;  %v5849_v24 = vld [vmem:[%s9656_s12 + $0x90] sm:$0xff] }
0x10da   :  { %7053 = vmatpush3.bf16.msra.mxu0 %v7052_v53  ;;  %v5850_v53 = vld [vmem:[%s9656_s12 + $0x98] sm:$0xff] }
0x10db   :  { %7054 = vmatprep.subr.bf16.mxu0 %v7548_v40 }
0x10de   :  { %v4965_v34 = vpop.permute.xlu1 %4964 }
0x10df   :  { %v4979_v63 = vsel %vm1272_vm10, %v4976_v4, %v4965_v34  ;;  %v5839_v4 = vld [vmem:[%s9654_s10 + $0x38] sm:$0xff] }
0x10e0   :  { %v4985_v54 = vrot.slane %v4979_v63, 5  ;;  %v7055_v34 = vpack.c.bf16 %v5839_v4, %v5838_v46  ;;  %v7061_v46 = vpack.c.bf16 %v5850_v53, %v5849_v24  ;;  %v5851_v4 = vld [vmem:[%s9656_s12 + $0xa0] sm:$0xff] }
0x10e2   :  { %v4967_v48 = vpop.permute.xlu0 %4966  ;;  %v4991_v36 = vsel %vm438_vm6, %v3982_v38, %v4985_v54  ;;  %v4945_v19 = vpop.permute.xlu1 %4944  ;;  %7056 = vmatpush3.bf16.msra.mxu0 %v7055_v34  ;;  %v5852_v34 = vld [vmem:[%s9656_s12 + $0xa8] sm:$0xff] }
0x10e3   :  { %v4980_v28 = vsel %vm1272_vm10, %v4977_v26, %v4967_v48  ;;  %6796 = vmatmul.mubr.msk.f32.gmra.mrb[120].mxu1 %vm68_vm0, %v4991_v36  ;;  %v4975_v52 = vsel %vm290_vm4, %v9425_v18, %v4945_v19 }
0x10e4   :  { %v4986_v3 = vrot.slane %v4980_v28, 5  ;;  %6798 = vmatprep.mubr.msk.f32.mxu1 %vm7549_vm2, %v7550_v41 }
0x10e6   :  { %v4987_v1 = vsel %vm438_vm6, %v4985_v54, %v4986_v3  ;;  %v4957_v50 = vpop.permute.xlu0 %4956 }
0x10e7   :  { %6799 = vmatmul.mubr.msk.f32.gmra.mrb[122].mxu1 %vm68_vm0, %v4987_v1  ;;  %v4978_v12 = vsel %vm1268_vm9, %v4975_v52, %v4957_v50 }
0x10e8   :  { %6801 = vmatprep.mubr.msk.f32.mxu1 %vm7549_vm2, %v7550_v41 }
0x1100   :  { %v4969_v49 = vpop.permute.xlu1 %4968 }
0x1101   :  { %v4981_v11 = vsel %vm1272_vm10, %v4978_v12, %v4969_v49  ;;  %v5847_v12 = vld [vmem:[%s9656_s12 + $0x80] sm:$0xff]  ;;  %v5848_v49 = vld [vmem:[%s9656_s12 + $0x88] sm:$0xff] }
0x1102   :  { %v4988_v51 = vrot.slane %v4981_v11, 5  ;;  %v7058_v11 = vpack.c.bf16 %v5848_v49, %v5847_v12  ;;  %v5841_v49 = vld [vmem:[%s9655_s11 + $0x1] ss:$0 sm:$0xff] }
0x1104   :  { %v4989_v22 = vsel %vm438_vm6, %v4986_v3, %v4988_v51  ;;  %7059 = vmatpush3.bf16.msra.mxu1 %v7058_v11 }
0x1105   :  { %6802 = vmatmul.mubr.msk.f32.gmra.mrb[124].mxu1 %vm68_vm0, %v4989_v22  ;;  %7060 = vmatprep.subr.bf16.mxu1 %v7548_v40 }
0x1106   :  { %6859 = vmatprep.mubr.msk.f32.mxu1 %vm7549_vm2, %v7550_v41 }
0x1108   :  { %7062 = vmatpush3.bf16.msra.mxu1 %v7061_v46 }
0x1109   :  { %7063 = vmatprep.subr.bf16.mxu1 %v7548_v40 }
0x1183   :  { %v5076_v60 = vpop.f32.mrb[116].mxu1 }
0x1184   :  { %v5100_v18 = vadd.f32 %v5076_v60, %v8680_v61  ;;  %v6791_v59 = vpop.f32.mrb[117].mxu1 }
0x1186   :  { %v5113_v55 = vadd.f32 %v5831_v7, %v5100_v18 }
0x1187   :  { %v5081_v6 = vpop.f32.mrb[118].mxu1 }
0x1188   :  { %v5101_v13 = vadd.f32 %v5081_v6, %v8685_v45  ;;  %v6794_v33 = vpop.f32.mrb[119].mxu1  ;;  %v5122_v58 = vsel %vm68_vm0, %v5113_v55, 0.0  ;;  %v5834_v6 = vld [vmem:[%s9652_s8 + $0x1] ss:$0 sm:$0xff] }
0x1189   :  { %5123 = vadd.xlane.f32.xlu0 %v5122_v58  ;;  %v5835_v33 = vld [vmem:[%s9653_s9 + $0x1] ss:$0 sm:$0xff] }
0x118a   :  { %v5114_v0 = vadd.f32 %v5831_v7, %v5101_v13 }
0x118c   :  { %v5125_v35 = vsel %vm68_vm0, %v5114_v0, 0.0 }
0x118d   :  { %5126 = vadd.xlane.f32.xlu1 %v5125_v35 }
0x11b6   :  { %v5086_v30 = vpop.f32.mrb[120].mxu1 }
0x11b7   :  { %v5102_v42 = vadd.f32 %v5086_v30, %v8690_v8  ;;  %v6797_v5 = vpop.f32.mrb[121].mxu1 }
0x11b9   :  { %v9485_v56 = vadd.f32 %v5831_v7, %v5102_v42 }
0x11ba   :  { %v5091_v61 = vpop.f32.mrb[122].mxu1 }
0x11bb   :  { %v5103_v21 = vadd.f32 %v5091_v61, %v8695_v25  ;;  %v6800_v17 = vpop.f32.mrb[123].mxu1  ;;  %v5128_v45 = vsel %vm68_vm0, %v9485_v56, 0.0 }
0x11bc   :  { %5129 = vadd.xlane.f32.xlu0 %v5128_v45 }
0x11bd   :  { %v5116_v37 = vadd.f32 %v5831_v7, %v5103_v21 }
0x11bf   :  { %v5131_v16 = vsel %vm68_vm0, %v5116_v37, 0.0 }
0x11c0   :  { %5132 = vadd.xlane.f32.xlu0 %v5131_v16 }
0x11d8   :  { %v5096_v23 = vpop.f32.mrb[124].mxu1 }
0x11d9   :  { %v5104_v62 = vadd.f32 %v5096_v23, %v8701_v43  ;;  %v6803_v9 = vpop.f32.mrb[125].mxu1 }
0x11db   :  { %v9492_v8 = vadd.f32 %v5831_v7, %v5104_v62 }
0x11dd   :  { %v5134_v32 = vsel %vm81_vm1, %v9492_v8, 0.0 }
0x11de   :  { %5135 = vadd.xlane.f32.xlu0 %v5134_v32 }
0x1216   :  { %v5124_v25 = vpop.xlane.xlu0 %5123 }
0x1217   :  { %v5137_v20 = vmul.f32 0.03125, %v5124_v25 }
0x1219   :  { %v5142_v29 = vsub.f32 %v5113_v55, %v5137_v20 }
0x121a   :  { %v5127_v15 = vpop.xlane.xlu1 %5126 }
0x121b   :  { %v5138_v31 = vmul.f32 0.03125, %v5127_v15  ;;  %v5147_v14 = vmul.f32 %v5142_v29, %v5142_v29 }
0x121d   :  { %v5143_v10 = vsub.f32 %v5114_v0, %v5138_v31  ;;  %v5152_v39 = vsel %vm68_vm0, %v5147_v14, 0.0 }
0x121e   :  { %5153 = vadd.xlane.f32.xlu1 %v5152_v39 }
0x121f   :  { %v5148_v47 = vmul.f32 %v5143_v10, %v5143_v10 }
0x1221   :  { %v5155_v43 = vsel %vm68_vm0, %v5148_v47, 0.0 }
0x1222   :  { %5156 = vadd.xlane.f32.xlu0 %v5155_v43 }
0x1249   :  { %v5130_v57 = vpop.xlane.xlu0 %5129 }
0x124a   :  { %v5139_v63 = vmul.f32 0.03125, %v5130_v57  ;;  %v7064_v57 = vpack.c.bf16 %v5852_v34, %v5851_v4 }
0x124c   :  { %v5144_v44 = vsub.f32 %v9485_v56, %v5139_v63  ;;  %7065 = vmatpush3.bf16.msra.mxu1 %v7064_v57  ;;  %v5853_v63 = vld [vmem:[%s9656_s12 + $0xb0] sm:$0xff] }
0x124d   :  { %v5133_v54 = vpop.xlane.xlu0 %5132  ;;  %7066 = vmatprep.subr.bf16.mxu1 %v7548_v40 }
0x124e   :  { %v5140_v38 = vmul.f32 0.03125, %v5133_v54  ;;  %v5149_v2 = vmul.f32 %v5144_v44, %v5144_v44 }
0x1250   :  { %v5145_v26 = vsub.f32 %v5116_v37, %v5140_v38  ;;  %v5158_v48 = vsel %vm68_vm0, %v5149_v2, 0.0  ;;  %v5855_v38 = vld [vmem:[%s9656_s12 + $0xc0] sm:$0xff]  ;;  %v5856_v2 = vld [vmem:[%s9656_s12 + $0xc8] sm:$0xff] }
0x1251   :  { %5159 = vadd.xlane.f32.xlu1 %v5158_v48  ;;  %v5857_v48 = vld [vmem:[%s9656_s12 + $0xd0] sm:$0xff] }
0x1252   :  { %v5150_v36 = vmul.f32 %v5145_v26, %v5145_v26 }
0x1254   :  { %v5161_v28 = vsel %vm68_vm0, %v5150_v36, 0.0  ;;  %v5858_v36 = vld [vmem:[%s9656_s12 + $0xd8] sm:$0xff] }
0x1255   :  { %5162 = vadd.xlane.f32.xlu0 %v5161_v28  ;;  %v7073_v28 = vpack.c.bf16 %v5858_v36, %v5857_v48 }
0x126b   :  { %v5136_v3 = vpop.xlane.xlu0 %5135 }
0x126c   :  { %v5141_v1 = vmul.f32 0.03125, %v5136_v3  ;;  %v5859_v3 = vld [vmem:[%s9656_s12 + $0xe0] sm:$0xff] }
0x126e   :  { %v5146_v19 = vsub.f32 %v9492_v8, %v5141_v1  ;;  %v5860_v1 = vld [vmem:[%s9656_s12 + $0xe8] sm:$0xff] }
0x1270   :  { %v5151_v50 = vmul.f32 %v5146_v19, %v5146_v19 }
0x1272   :  { %v5164_v52 = vsel %vm81_vm1, %v5151_v50, 0.0  ;;  %v5861_v50 = vld [vmem:[%s9656_s12 + $0xf0] sm:$0xff] }
0x1273   :  { %5165 = vadd.xlane.f32.xlu1 %v5164_v52  ;;  %v5862_v52 = vld [vmem:[%s9656_s12 + $0xf8] sm:$0xff] }
0x1274   :  { %v7079_v12 = vpack.c.bf16 %v5862_v52, %v5861_v50 }
0x12ab   :  { %v5154_v51 = vpop.xlane.xlu1 %5153 }
0x12ac   :  { %v5167_v22 = vmul.f32 0.03125, %v5154_v51 }
0x12ae   :  { %v5172_v60 = vadd.f32 1e-06, %v5167_v22 }
0x12af   :  { %v5157_v7 = vpop.xlane.xlu0 %5156 }
0x12b0   :  { %7497 = vrsqrt.f32 %v5172_v60  ;;  %v5168_v18 = vmul.f32 0.03125, %v5157_v7 }
0x12b2   :  { %v5173_v59 = vadd.f32 1e-06, %v5168_v18 }
0x12b4   :  { %7499 = vrsqrt.f32 %v5173_v59 }
0x12ba   :  { %v7498_v55 = vpop.eup %7497 }
0x12bb   :  { %v5182_v13 = vmul.f32 %v7498_v55, %v5142_v29 }
0x12bd   :  { %v5193_v58 = vmul.f32 %v5834_v6, %v5182_v13 }
0x12be   :  { %v7500_v0 = vpop.eup %7499 }
0x12bf   :  { %v5204_v35 = vadd.f32 %v5835_v33, %v5193_v58  ;;  %v5183_v30 = vmul.f32 %v7500_v0, %v5143_v10 }
0x12c1   :  { %6813 = vmatmul.mubr.msk.f32.vlgmr.msra.gmra.mrb[126].mxu0 %vm68_vm0, %v5204_v35  ;;  %v5194_v42 = vmul.f32 %v5834_v6, %v5183_v30 }
0x12c2   :  { %6815 = vmatprep.mubr.msk.f32.mxu0 %vm7549_vm2, %v7550_v41 }
0x12c3   :  { %v5205_v5 = vadd.f32 %v5835_v33, %v5194_v42 }
0x12c5   :  { %6816 = vmatmul.mubr.msk.f32.gmra.mrb[128].mxu0 %vm68_vm0, %v5205_v5 }
0x12c6   :  { %6818 = vmatprep.mubr.msk.f32.mxu0 %vm7549_vm2, %v7550_v41 }
0x12de   :  { %v5160_v61 = vpop.xlane.xlu1 %5159 }
0x12df   :  { %v5169_v21 = vmul.f32 0.03125, %v5160_v61 }
0x12e1   :  { %v5174_v17 = vadd.f32 1e-06, %v5169_v21 }
0x12e2   :  { %v5163_v45 = vpop.xlane.xlu0 %5162 }
0x12e3   :  { %7501 = vrsqrt.f32 %v5174_v17  ;;  %v5170_v37 = vmul.f32 0.03125, %v5163_v45 }
0x12e5   :  { %v5175_v16 = vadd.f32 1e-06, %v5170_v37 }
0x12e7   :  { %7503 = vrsqrt.f32 %v5175_v16 }
0x12ed   :  { %v7502_v23 = vpop.eup %7501 }
0x12ee   :  { %v5184_v62 = vmul.f32 %v7502_v23, %v5144_v44  ;;  %v5854_v44 = vld [vmem:[%s9656_s12 + $0xb8] sm:$0xff] }
0x12ef   :  { %v7067_v54 = vpack.c.bf16 %v5854_v44, %v5853_v63 }
0x12f0   :  { %v5195_v9 = vmul.f32 %v5834_v6, %v5184_v62 }
0x12f1   :  { %v7504_v32 = vpop.eup %7503  ;;  %7068 = vmatpush3.bf16.msra.mxu1 %v7067_v54 }
0x12f2   :  { %v5206_v25 = vadd.f32 %v5835_v33, %v5195_v9  ;;  %v5185_v20 = vmul.f32 %v7504_v32, %v5145_v26  ;;  %7069 = vmatprep.subr.bf16.mxu1 %v7548_v40  ;;  %v7070_v26 = vpack.c.bf16 %v5856_v2, %v5855_v38 }
0x12f4   :  { %6819 = vmatmul.mubr.msk.f32.gmra.mrb[130].mxu0 %vm68_vm0, %v5206_v25  ;;  %v5196_v29 = vmul.f32 %v5834_v6, %v5185_v20 }
0x12f5   :  { %6821 = vmatprep.mubr.msk.f32.mxu0 %vm7549_vm2, %v7550_v41  ;;  %7071 = vmatpush3.bf16.msra.mxu1 %v7070_v26 }
0x12f6   :  { %v5207_v15 = vadd.f32 %v5835_v33, %v5196_v29  ;;  %7072 = vmatprep.subr.bf16.mxu1 %v7548_v40 }
0x12f8   :  { %6822 = vmatmul.mubr.msk.f32.gmra.mrb[132].mxu0 %vm68_vm0, %v5207_v15 }
0x12f9   :  { %6824 = vmatprep.mubr.msk.f32.mxu0 %vm7549_vm2, %v7550_v41  ;;  %7074 = vmatpush3.bf16.msra.mxu1 %v7073_v28 }
0x12fa   :  { %7075 = vmatprep.subr.bf16.mxu1 %v7548_v40 }
0x1300   :  { %v5166_v31 = vpop.xlane.xlu1 %5165 }
0x1301   :  { %v5171_v14 = vmul.f32 0.03125, %v5166_v31 }
0x1303   :  { %v5176_v10 = vadd.f32 1e-06, %v5171_v14 }
0x1305   :  { %7505 = vrsqrt.f32 %v5176_v10 }
0x130f   :  { %v7506_v39 = vpop.eup %7505 }
0x1310   :  { %v5186_v47 = vmul.f32 %v7506_v39, %v5146_v19  ;;  %v7076_v19 = vpack.c.bf16 %v5860_v1, %v5859_v3 }
0x1312   :  { %v5197_v43 = vmul.f32 %v5834_v6, %v5186_v47  ;;  %7077 = vmatpush3.bf16.msra.mxu1 %v7076_v19 }
0x1313   :  { %7078 = vmatprep.subr.bf16.mxu1 %v7548_v40 }
0x1314   :  { %v5208_v27 = vadd.f32 %v5835_v33, %v5197_v43 }
0x1316   :  { %6825 = vmatmul.mubr.msk.f32.gmra.mrb[134].mxu0 %vm68_vm0, %v5208_v27  ;;  %7080 = vmatpush3.bf16.msra.mxu1 %v7079_v12 }
0x1317   :  { %7081 = vmatprep.subr.bf16.mxu1 %v7548_v40 }
0x1394   :  { %v5303_v11 = vpop.f32.mrb[126].mxu0 }
0x1395   :  { %v5304_v51 = vadd.f32 %v5841_v49, %v5303_v11  ;;  %v6814_v22 = vpop.f32.mrb[127].mxu0 }
0x1397   :  { %v5332_v60 = vmul.f32 0.044715, %v5304_v51  ;;  %v5327_v61 = vmul.f32 0.5, %v5304_v51 }
0x1398   :  { %v5308_v7 = vpop.f32.mrb[128].mxu0 }
0x1399   :  { %v5337_v18 = vmul.f32 %v5332_v60, %v5304_v51  ;;  %v5309_v59 = vadd.f32 %v5841_v49, %v5308_v7  ;;  %v6817_v55 = vpop.f32.mrb[129].mxu0 }
0x139b   :  { %v5342_v6 = vmul.f32 %v5337_v18, %v5304_v51  ;;  %v5333_v13 = vmul.f32 0.044715, %v5309_v59  ;;  %v5328_v37 = vmul.f32 0.5, %v5309_v59 }
0x139d   :  { %v5347_v33 = vadd.f32 %v5342_v6, %v5304_v51  ;;  %v5338_v58 = vmul.f32 %v5333_v13, %v5309_v59  ;;  %v5864_v6 = vld [vmem:[%s9657_s13 + $0x1] ss:$0 sm:$0xff] }
0x139f   :  { %v5352_v0 = vmul.f32 0.7978846, %v5347_v33  ;;  %v5343_v35 = vmul.f32 %v5338_v58, %v5309_v59 }
0x13a1   :  { %7507 = vtanh.f32 %v5352_v0  ;;  %v5348_v30 = vadd.f32 %v5343_v35, %v5309_v59 }
0x13a3   :  { %v5353_v42 = vmul.f32 0.7978846, %v5348_v30 }
0x13a5   :  { %7509 = vtanh.f32 %v5353_v42 }
0x13ab   :  { %v7508_v5 = vpop.eup %7507 }
0x13ac   :  { %v5362_v21 = vadd.f32 1.0, %v7508_v5 }
0x13ae   :  { %v5367_v17 = vmul.f32 %v5362_v21, %v5327_v61 }
0x13af   :  { %v7510_v45 = vpop.eup %7509 }
0x13b0   :  { %6860 = vmatmul.mubr.f32.vlgmr.msra.gmra.mrb[126].mxu1 %v5367_v17  ;;  %v5363_v16 = vadd.f32 1.0, %v7510_v45 }
0x13b1   :  { %6862 = vmatprep.mubr.msk.f32.mxu1 %vm7549_vm2, %v7550_v41 }
0x13b2   :  { %v5368_v23 = vmul.f32 %v5363_v16, %v5328_v37 }
0x13b4   :  { %6863 = vmatmul.mubr.f32.gmra.mrb[128].mxu1 %v5368_v23 }
0x13b5   :  { %6865 = vmatprep.mubr.msk.f32.mxu1 %vm7549_vm2, %v7550_v41 }
0x13c7   :  { %v5313_v62 = vpop.f32.mrb[130].mxu0 }
0x13c8   :  { %v5314_v9 = vadd.f32 %v5841_v49, %v5313_v62  ;;  %v6820_v32 = vpop.f32.mrb[131].mxu0  ;;  %v5526_v62 = vld [vmem:[%s9660_s16 + $0x10] sm:$0xff] }
0x13ca   :  { %v5334_v25 = vmul.f32 0.044715, %v5314_v9  ;;  %v5329_v4 = vmul.f32 0.5, %v5314_v9 }
0x13cb   :  { %v5318_v20 = vpop.f32.mrb[132].mxu0 }
0x13cc   :  { %v5339_v29 = vmul.f32 %v5334_v25, %v5314_v9  ;;  %v5319_v15 = vadd.f32 %v5841_v49, %v5318_v20  ;;  %v6823_v31 = vpop.f32.mrb[133].mxu0 }
0x13cd   :  { %v5865_v31 = vld [vmem:[%s9658_s14] ss:$0 sm:$0xff]  ;;  %s7524_s14 = scalar_lea.vmem %s5616_s19, 64 }
0x13ce   :  { %v5335_v14 = vmul.f32 0.044715, %v5319_v15  ;;  %v5344_v10 = vmul.f32 %v5339_v29, %v5314_v9  ;;  %v5330_v44 = vmul.f32 0.5, %v5319_v15  ;;  %p7525_p0 = scmp.ne.s32.totalorder %s5616_s19, %s7524_s14  ;;  %p7530_p2 = scmp.lt.s32.totalorder %s7524_s14, %s7524_s14 }
0x13d0   :  { %v5340_v39 = vmul.f32 %v5335_v14, %v5319_v15  ;;  %v5349_v47 = vadd.f32 %v5344_v10, %v5314_v9  ;;  %v5527_v9 = vld [vmem:[%s9660_s16 + $0x18] sm:$0xff]  ;;  %v5866_v14 = vld [vmem:[%s9659_s15] ss:$0 sm:$0xff]  ;;  %p7531_p3 = por %p7530_p2, %p7529_p1 }
0x13d1   :  { %v7085_v32 = vpack.c.bf16 %v5527_v9, %v5526_v62 }
0x13d2   :  { %v5354_v43 = vmul.f32 0.7978846, %v5349_v47  ;;  %v5345_v27 = vmul.f32 %v5340_v39, %v5319_v15  ;;  %v5867_v47 = vld [vmem:[%s9661_s17] ss:$0 sm:$0xff]  ;;  %p7532_p4 = pnand %p7531_p3, %p7525_p0 }
0x13d4   :  { %7511 = vtanh.f32 %v5354_v43  ;;  %v5350_v24 = vadd.f32 %v5345_v27, %v5319_v15 }
0x13d6   :  { %v5355_v53 = vmul.f32 0.7978846, %v5350_v24 }
0x13d8   :  { %7513 = vtanh.f32 %v5355_v53 }
0x13de   :  { %v7512_v46 = vpop.eup %7511 }
0x13df   :  { %v5364_v34 = vadd.f32 1.0, %v7512_v46 }
0x13e1   :  { %v5369_v57 = vmul.f32 %v5364_v34, %v5329_v4 }
0x13e2   :  { %v7514_v63 = vpop.eup %7513 }
0x13e3   :  { %6866 = vmatmul.mubr.f32.gmra.mrb[130].mxu1 %v5369_v57  ;;  %v5365_v54 = vadd.f32 1.0, %v7514_v63 }
0x13e4   :  { %6868 = vmatprep.mubr.msk.f32.mxu1 %vm7549_vm2, %v7550_v41 }
0x13e5   :  { %v5370_v38 = vmul.f32 %v5365_v54, %v5330_v44 }
0x13e7   :  { %6869 = vmatmul.mubr.f32.gmra.mrb[132].mxu1 %v5370_v38 }
0x13e8   :  { %6871 = vmatprep.mubr.msk.f32.mxu1 %vm7549_vm2, %v7550_v41 }
0x13e9   :  { %v5323_v2 = vpop.f32.mrb[134].mxu0 }
0x13ea   :  { %v5324_v26 = vadd.f32 %v5841_v49, %v5323_v2  ;;  %v6826_v48 = vpop.f32.mrb[135].mxu0 }
0x13ec   :  { %v5336_v36 = vmul.f32 0.044715, %v5324_v26  ;;  %v5331_v52 = vmul.f32 0.5, %v5324_v26 }
0x13ee   :  { %v5341_v28 = vmul.f32 %v5336_v36, %v5324_v26 }
0x13f0   :  { %v5346_v3 = vmul.f32 %v5341_v28, %v5324_v26 }
0x13f2   :  { %v5351_v1 = vadd.f32 %v5346_v3, %v5324_v26 }
0x13f4   :  { %v5356_v19 = vmul.f32 0.7978846, %v5351_v1 }
0x13f6   :  { %7515 = vtanh.f32 %v5356_v19 }
0x1400   :  { %v7516_v50 = vpop.eup %7515 }
0x1401   :  { %v5366_v12 = vadd.f32 1.0, %v7516_v50 }
0x1403   :  { %v5371_v11 = vmul.f32 %v5366_v12, %v5331_v52 }
0x1405   :  { %6872 = vmatmul.mubr.f32.gmra.mrb[134].mxu1 %v5371_v11 }
0x1406   :  { %6882 = vmatprep.mubr.msk.f32.mxu1 %vm7549_vm2, %v7550_v41 }
0x1483   :  { %v5463_v51 = vpop.f32.mrb[126].mxu1 }
0x1484   :  { %v6861_v22 = vpop.f32.mrb[127].mxu1 }
0x1487   :  { %v5467_v60 = vpop.f32.mrb[128].mxu1 }
0x1488   :  { %v6864_v7 = vpop.f32.mrb[129].mxu1 }
0x14b6   :  { %v5471_v49 = vpop.f32.mrb[130].mxu1 }
0x14b7   :  { %v6867_v18 = vpop.f32.mrb[131].mxu1  ;;  %v5472_v13 = vadd.f32 %v5864_v6, %v5471_v49 }
0x14b9   :  { %v5484_v58 = vadd.f32 %v5472_v13, %v9485_v56  ;;  %v5524_v56 = vld [vmem:[%s9660_s16] sm:$0xff] }
0x14ba   :  { %v5476_v59 = vpop.f32.mrb[132].mxu1 }
0x14bb   :  { %v6870_v55 = vpop.f32.mrb[133].mxu1  ;;  %v5487_v30 = vrot.slane %v5484_v58, 1 }
0x14d8   :  { %v5480_v33 = vpop.f32.mrb[134].mxu1 }
0x14d9   :  { %v5481_v0 = vadd.f32 %v5864_v6, %v5480_v33  ;;  %v6873_v35 = vpop.f32.mrb[135].mxu1 }
0x14db   :  { %v5485_v41 = vadd.f32 %v5481_v0, %v9492_v8  ;;  %v5525_v8 = vld [vmem:[%s9660_s16 + $0x8] sm:$0xff] }
0x14dc   :  { %v7082_v23 = vpack.c.bf16 %v5525_v8, %v5524_v56 }
0x14dd   :  { %v5490_v42 = vrot.slane %v5485_v41, 2 }
0x14de   :  { %7083 = vmatpush3.bf16.msra.mxu1 %v7082_v23 }
0x14df   :  { %v5493_v5 = vsel %vm5492_vm11, %v5487_v30, %v5490_v42  ;;  %7084 = vmatprep.subr.bf16.mxu1 %v7548_v40 }
0x14e0   :  { %v5497_v61 = vsel %vm5496_vm12, %v5493_v5, 0.0 }
0x14e1   :  { %5498 = vadd.xlane.f32.xlu0 %v5497_v61 }
0x14e2   :  { %7086 = vmatpush3.bf16.msra.mxu1 %v7085_v32 }
0x156e   :  { %v5499_v21 = vpop.xlane.xlu0 %5498 }
0x156f   :  { %v5500_v17 = vmul.f32 0.03125, %v5499_v21 }
0x1571   :  { %v5501_v45 = vsub.f32 %v5493_v5, %v5500_v17 }
0x1573   :  { %v5502_v37 = vmul.f32 %v5501_v45, %v5501_v45 }
0x1575   :  { %v5503_v16 = vsel %vm5496_vm12, %v5502_v37, 0.0 }
0x1576   :  { %5504 = vadd.xlane.f32.xlu1 %v5503_v16 }
0x1603   :  { %v5505_v25 = vpop.xlane.xlu1 %5504 }
0x1604   :  { %v5506_v20 = vmul.f32 0.03125, %v5505_v25 }
0x1606   :  { %v5507_v29 = vadd.f32 1e-06, %v5506_v20 }
0x1608   :  { %7517 = vrsqrt.f32 %v5507_v29 }
0x1612   :  { %v7518_v15 = vpop.eup %7517 }
0x1613   :  { %v5509_v40 = vmul.f32 %v7518_v15, %v5501_v45 }
0x1615   :  { %v5516_v10 = vmul.f32 %v5865_v31, %v5509_v40 }
0x1617   :  { %v5523_v39 = vadd.f32 %v5866_v14, %v5516_v10 }
0x1619   :  { %6883 = vmatmul.mubr.msk.f32.vlgmr.msra.gmra.mrb[136].mxu1 %vm68_vm0, %v5523_v39 }
0x16ec   :  { %v5604_v43 = vpop.f32.mrb[136].mxu1 }
0x16ed   :  { %v5605_v27 = vadd.f32 %v5867_v47, %v5604_v43  ;;  %v6884_v24 = vpop.f32.mrb[137].mxu1 }
0x16ef   :  { %5608 = vst [vmem:[#allocation2] sm:$0xf] %v5605_v27 }
0x16f0   :  { %7535 = shalt.err (!%p7532_p4)
}
0x16f1   :  { %s7536_s22 = scalar_lea.hbm %s9662_s18, 64 }
0x16f2   :  { %p7537_p5 = scmp.ne.s32.totalorder %s9662_s18, %s7536_s22  ;;  %p7540_p6 = scmp.lt.u32.totalorder %s7536_s22, %s9662_s18 }
0x16f4   :  { %p7542_p7 = pnand %p7540_p6, %p7537_p5 }
0x16f6   :  { %7545 = shalt.err (!%p7542_p7)
}
0x16f7   :  { %5618 = dma.vmem_to_hbm [thread:$0]  %s5616_s19, 64, %s9662_s18, [#allocation3]  }
0x16f8   :  { %7546 = dma.done.wait [#allocation3], 64  }
0x16f9   :  { %7547 = vsyncadd [#allocation3], 4294967232 }
0x16fa   :  { %5622 = vsyncpa [#allocation3], 1 }

</bundles_post_ra>
